<compile_context>
chip_gen: v7x
topology: tpu7x:2x2x1
jax: 0.10.0
libtpu: 0.0.40
codegen_flags: <defaults>
</compile_context>

<pallas_src>
import functools

import jax
import jax.numpy as jnp
from jax.experimental import pallas as pl
from jax.experimental.pallas import tpu as pltpu


def _transform_attn_kernel(steq_ref, step_ref, x_ref, w_ref, b_ref,
                           o_ref,
                           q_scr, k_scr, v_scr, ctx_scr, *,
                           k, d, G, w_offs, approx_recip):
    """One grid step: TN (node) cells of one batch element."""
    f32 = jnp.float32
    cdt = w_ref.dtype                      # MXU operand dtype (f32 or bf16)
    Q, TN, Cq = steq_ref.shape
    P, _, Cp = step_ref.shape
    Xd = x_ref.shape[-1]
    D = k * d
    GQ, GP = Q * G, P * G
    n_sub = TN // G

    def mm(a, b):                          # MXU matmul, f32 accumulation
        return jnp.dot(a.astype(cdt), b.astype(cdt), preferred_element_type=f32)

    def mm_nt(a, b):                       # a @ b.T without materializing b.T
        return jax.lax.dot_general(
            a.astype(cdt), b.astype(cdt),
            dimension_numbers=(((1,), (1,)), ((), ())),
            preferred_element_type=f32)

    # Packed parameter slabs; every row offset is a multiple of 8 (aligned).
    oq, ok, ov, o1, o2 = w_offs
    wq = w_ref[oq:oq + Cq, :]
    wk = w_ref[ok:ok + Cp, :]
    wv = w_ref[ov:ov + Xd, :]
    w1 = w_ref[o1:o1 + D, :]
    w2 = w_ref[o2:o2 + D, :]
    bq = b_ref[0:1, :]
    bk = b_ref[1:2, :]
    bv = b_ref[2:3, :]
    b1 = b_ref[3:4, :]
    b2 = b_ref[4:5, :]

    # --- batched 1x1-conv projections over the whole TN-cell block (big M) ----
    # 1/sqrt(d) is folded into wq/bq by the wrapper (ReLU commutes with it).
    q_scr[...] = jnp.maximum(mm(steq_ref[...].reshape(Q * TN, Cq), wq) + bq,
                             0.0).reshape(Q, TN, D)
    k_scr[...] = jnp.maximum(mm(step_ref[...].reshape(P * TN, Cp), wk) + bk,
                             0.0).reshape(P, TN, D)
    v_scr[...] = jnp.maximum(mm(x_ref[...].reshape(P * TN, Xd), wv) + bv,
                             0.0).reshape(P, TN, D)

    # --- constant masks (loop invariant, built once per grid step) ------------
    # head_mask[h*GQ + r, l] = 1 iff lane l belongs to head h.
    ll = jax.lax.broadcasted_iota(jnp.int32, (GQ, D), 1)
    head_mask = jnp.concatenate(
        [((ll >= h * d) & (ll < (h + 1) * d)).astype(f32) for h in range(k)],
        axis=0)                                                  # [k*GQ, D]
    # cell_bias kills cross-cell scores.  Rows/cols are time-major within a
    # G-cell subgroup, so the cell index is simply (index & (G-1)), G = 2^m.
    ri = jax.lax.broadcasted_iota(jnp.int32, (k * GQ, GP), 0)
    ci = jax.lax.broadcasted_iota(jnp.int32, (k * GQ, GP), 1)
    cell_bias = jnp.where((ri & (G - 1)) == (ci & (G - 1)),
                          0.0, -1e30).astype(f32)                # [k*GQ, GP]

    # --- masked multi-head attention, G cells (G*P key lanes) at a time -------
    for g in range(n_sub):
        lo = g * G
        qg = q_scr[:, lo:lo + G, :].reshape(GQ, D)               # [Q*G, D]
        kg = k_scr[:, lo:lo + G, :].reshape(GP, D)               # [P*G, D]
        vg = v_scr[:, lo:lo + G, :].reshape(GP, D)               # [P*G, D]

        # Head-expanded queries: row-block h = qg with non-head-h lanes zeroed,
        # so a single [k*GQ, D] x [GP, D]^T matmul yields every head's scores
        # (no d-wide lane slices, no per-head matmuls, no concat of heads).
        qx = jnp.tile(qg, (k, 1)) * head_mask                    # [k*GQ, D]
        s = mm_nt(qx, kg) + cell_bias                            # [k*GQ, GP] f32
        m = jnp.max(s, axis=-1, keepdims=True)
        e = jnp.exp(s - m)
        denom = jnp.sum(e, axis=-1, keepdims=True)
        attn = e * pl.reciprocal(denom, approx=approx_recip)
        ctxx = mm(attn, vg) * head_mask                          # [k*GQ, D]
        # Collapse head-expanded rows: keep head-h lanes of block h and sum.
        ctx = ctxx[0:GQ, :]
        for h in range(1, k):
            ctx = ctx + ctxx[h * GQ:(h + 1) * GQ, :]
        ctx_scr[:, lo:lo + G, :] = ctx.reshape(Q, G, D)

    # --- output MLP: FC(D -> [D, D], [relu, None]) over the whole block -------
    ctx_all = ctx_scr[...].reshape(Q * TN, D)
    h1 = jnp.maximum(mm(ctx_all, w1) + b1, 0.0)
    out = mm(h1, w2) + b2
    o_ref[...] = out.reshape(Q, TN, D).astype(o_ref.dtype)


def transform_attention(X, STE_P, STE_Q, params, k, d, *,
                        cells_per_block=128,
                        matmul_dtype=jnp.bfloat16,
                        approx_recip=True):
    """X:[B,P,N,Xd], STE_P:[B,P,N,Cp], STE_Q:[B,Q,N,Cq] -> [B,Q,N,D] (f32)."""
    B, P, N, Xd = X.shape
    Q = STE_Q.shape[1]
    Cp = STE_P.shape[-1]
    Cq = STE_Q.shape[-1]
    D = k * d

    def rup(a, m):
        return -(-a // m) * m

    # Mask subgroup: largest power of two >= 8 with G*P <= 128 key lanes.
    G = 8
    while G * 2 * P <= 128 and G < 64:
        G *= 2

    # Node-block size: multiple of G, capped by (padded) N.
    TN = max(G, G * (max(1, cells_per_block) // G))
    TN = min(TN, rup(N, G))
    Np = rup(N, TN)
    n_blocks = Np // TN

    if Np != N:
        pad = ((0, 0), (0, 0), (0, Np - N), (0, 0))
        X_, STE_P_, STE_Q_ = jnp.pad(X, pad), jnp.pad(STE_P, pad), jnp.pad(STE_Q, pad)
    else:
        X_, STE_P_, STE_Q_ = X, STE_P, STE_Q

    # --- pack the 10 parameter arrays into two VMEM slabs ---------------------
    # 1/sqrt(d) folded into wq/bq (ReLU commutes with a positive scale).
    scale = 1.0 / (d ** 0.5)
    segs = [("wq", Cq, scale), ("wk", Cp, 1.0), ("wv", Xd, 1.0),
            ("w1", D, 1.0), ("w2", D, 1.0)]
    offs, r = [], 0
    for _, rows, _ in segs:
        offs.append(r)
        r += rup(rows, 8)

    def wseg(name, rows, s):
        w = (params[name] * s).astype(matmul_dtype)
        padr = rup(rows, 8) - rows
        return jnp.pad(w, ((0, padr), (0, 0))) if padr else w

    w_packed = jnp.concatenate([wseg(n, rows, s) for n, rows, s in segs], axis=0)
    b_packed = jnp.concatenate(
        [params["bq"] * scale, params["bk"], params["bv"],
         params["b1"], params["b2"]], axis=0).astype(jnp.float32)   # [5, D]

    def blk(T, C):
        return pl.BlockSpec((None, T, TN, C), lambda b, n: (b, 0, n, 0))

    def full2d(arr):
        return pl.BlockSpec(arr.shape, lambda b, n: (0, 0))

    # Advisory cost estimate (review: add CostEstimate before any depth sweep).
    n_sub = TN // G
    steps = B * n_blocks
    flops = int(steps * (2 * TN * (Q * Cq + P * Cp + P * Xd) * D      # projections
                         + 4 * n_sub * (k * Q * G) * (P * G) * D      # attention
                         + 4 * Q * TN * D * D))                       # out MLP
    transc = int(steps * n_sub * (k * Q * G) * (P * G))
    bytes_acc = int(4 * steps * TN * (Q * Cq + P * Cp + P * Xd + Q * D)
                    + w_packed.size * jnp.dtype(matmul_dtype).itemsize
                    + b_packed.size * 4)

    out = pl.pallas_call(
        functools.partial(_transform_attn_kernel, k=k, d=d, G=G,
                          w_offs=tuple(offs), approx_recip=approx_recip),
        out_shape=jax.ShapeDtypeStruct((B, Q, Np, D), jnp.float32),
        grid=(B, n_blocks),
        in_specs=[blk(Q, Cq), blk(P, Cp), blk(P, Xd),
                  full2d(w_packed), full2d(b_packed)],
        out_specs=blk(Q, D),
        scratch_shapes=[pltpu.VMEM((Q, TN, D), jnp.float32),
                        pltpu.VMEM((P, TN, D), jnp.float32),
                        pltpu.VMEM((P, TN, D), jnp.float32),
                        pltpu.VMEM((Q, TN, D), jnp.float32)],
        compiler_params=pltpu.CompilerParams(
            dimension_semantics=("parallel", "parallel"),
            vmem_limit_bytes=32 * 1024 * 1024),
        cost_estimate=pl.CostEstimate(flops=flops, transcendentals=transc,
                                      bytes_accessed=bytes_acc),
    )(STE_Q_, STE_P_, X_, w_packed, b_packed)

    if Np != N:
        out = out[:, :, :N, :]
    return out


def init_params(key, STE_Q_dim, STE_P_dim, X_dim, k, d):
    """Deterministic synthetic parameters (fan-in scaled normals)."""
    D = k * d
    ks = jax.random.split(key, 10)

    def lin(kk, fan_in, fan_out):
        return jax.random.normal(kk, (fan_in, fan_out), jnp.float32) / jnp.sqrt(
            jnp.float32(fan_in))

    def bias(kk, fan_out):
        return 0.1 * jax.random.normal(kk, (1, fan_out), jnp.float32)

    return {
        "wq": lin(ks[0], STE_Q_dim, D), "bq": bias(ks[1], D),
        "wk": lin(ks[2], STE_P_dim, D), "bk": bias(ks[3], D),
        "wv": lin(ks[4], X_dim, D),     "bv": bias(ks[5], D),
        "w1": lin(ks[6], D, D),         "b1": bias(ks[7], D),
        "w2": lin(ks[8], D, D),         "b2": bias(ks[9], D),
    }


def reference(X, STE_P, STE_Q, params, k, d):
    """Pure-JAX reference reproducing the PyTorch forward semantics."""
    relu = jax.nn.relu
    B, P, N, _ = X.shape
    Q = STE_Q.shape[1]
    D = k * d
    query = relu(jnp.einsum("bqnc,cd->bqnd", STE_Q, params["wq"]) + params["bq"][0])
    key = relu(jnp.einsum("bpnc,cd->bpnd", STE_P, params["wk"]) + params["bk"][0])
    value = relu(jnp.einsum("bpnc,cd->bpnd", X, params["wv"]) + params["bv"][0])
    q4 = query.reshape(B, Q, N, k, d)
    k4 = key.reshape(B, P, N, k, d)
    v4 = value.reshape(B, P, N, k, d)
    scores = jnp.einsum("bqnhe,bpnhe->bnhqp", q4, k4) / (d ** 0.5)
    attn = jax.nn.softmax(scores, axis=-1)
    ctx = jnp.einsum("bnhqp,bpnhe->bqnhe", attn, v4).reshape(B, Q, N, D)
    h1 = relu(jnp.einsum("bqnd,de->bqne", ctx, params["w1"]) + params["b1"][0])
    return jnp.einsum("bqnd,de->bqne", h1, params["w2"]) + params["b2"][0]


if __name__ == "__main__":
    B, P, Q, N = 2, 8, 4, 40            # N=40 exercises node padding (G=16)
    k_heads, d_head = 4, 8
    D = k_heads * d_head
    X_dim, STE_P_dim, STE_Q_dim = 16, 32, 32

    root = jax.random.PRNGKey(0)
    kx, kp, kq, kparams = jax.random.split(root, 4)
    X = jax.random.normal(kx, (B, P, N, X_dim), jnp.float32)
    STE_P = jax.random.normal(kp, (B, P, N, STE_P_dim), jnp.float32)
    STE_Q = jax.random.normal(kq, (B, Q, N, STE_Q_dim), jnp.float32)
    params = init_params(kparams, STE_Q_dim, STE_P_dim, X_dim, k_heads, d_head)

    ref = reference(X, STE_P, STE_Q, params, k_heads, d_head)

    # Exact-math path: f32 MXU operands + exact reciprocal (validation path).
    out = transform_attention(X, STE_P, STE_Q, params, k_heads, d_head,
                              cells_per_block=128,
                              matmul_dtype=jnp.float32, approx_recip=False)
    out = jax.block_until_ready(out)
    assert out.shape == (B, Q, N, D), out.shape
    assert jnp.allclose(out, ref, atol=1e-4, rtol=1e-4), float(
        jnp.max(jnp.abs(out - ref)))

    # Multi-block grid over the node axis, still exact math.
    out_mb = transform_attention(X, STE_P, STE_Q, params, k_heads, d_head,
                                 cells_per_block=16,
                                 matmul_dtype=jnp.float32, approx_recip=False)
    out_mb = jax.block_until_ready(out_mb)
    assert jnp.allclose(out_mb, ref, atol=1e-4, rtol=1e-4), float(
        jnp.max(jnp.abs(out_mb - ref)))

    # Fast path (review default for v6e/v7x): bf16 MXU operands, f32
    # accumulation + f32 softmax, approx EUP reciprocal.
    out_fast = transform_attention(X, STE_P, STE_Q, params, k_heads, d_head)
    out_fast = jax.block_until_ready(out_fast)
    assert out_fast.shape == (B, Q, N, D), out_fast.shape
    assert jnp.allclose(out_fast, ref, atol=1e-1, rtol=1e-1), float(
        jnp.max(jnp.abs(out_fast - ref)))

    print("KERNEL_OK")
</pallas_src>

<mosaic_0001>
module attributes {stable_mosaic.version = 11 : i64} {
  func.func @_transform_attn_kernel(%arg0: i32, %arg1: i32, %arg2: memref<1x4x48x32xf32, #tpu.memory_space<vmem>>, %arg3: memref<1x8x48x32xf32, #tpu.memory_space<vmem>>, %arg4: memref<1x8x48x16xf32, #tpu.memory_space<vmem>>, %arg5: memref<144x32xf32, #tpu.memory_space<vmem>>, %arg6: memref<5x32xf32, #tpu.memory_space<vmem>>, %arg7: memref<1x4x48x32xf32, #tpu.memory_space<vmem>>, %arg8: memref<4x48x32xf32, #tpu.memory_space<vmem>>, %arg9: memref<8x48x32xf32, #tpu.memory_space<vmem>>, %arg10: memref<8x48x32xf32, #tpu.memory_space<vmem>>, %arg11: memref<4x48x32xf32, #tpu.memory_space<vmem>>) attributes {dimension_semantics = [#tpu.dimension_semantics<parallel>, #tpu.dimension_semantics<parallel>], iteration_bounds = array<i64: 2, 1>, scalar_prefetch = 0 : i64, scratch_operands = 4 : i64, tpu.core_type = #tpu.core_type<tc>, window_params = [{transform_indices = @transform_0, window_bounds = array<i64: 1, 4, 48, 32>}, {transform_indices = @transform_1, window_bounds = array<i64: 1, 8, 48, 32>}, {transform_indices = @transform_2, window_bounds = array<i64: 1, 8, 48, 16>}, {pipeline_mode = #tpu.pipeline_mode<synchronous>, transform_indices = @transform_3, window_bounds = array<i64: 144, 32>}, {pipeline_mode = #tpu.pipeline_mode<synchronous>, transform_indices = @transform_4, window_bounds = array<i64: 5, 32>}, {transform_indices = @transform_5, window_bounds = array<i64: 1, 4, 48, 32>}]} {
    %c0 = arith.constant 0 : index
    %c0_0 = arith.constant 0 : index
    %0 = vector.load %arg5[%c0, %c0_0] : memref<144x32xf32, #tpu.memory_space<vmem>>, vector<32x32xf32>
    %c32 = arith.constant 32 : index
    %c0_1 = arith.constant 0 : index
    %1 = vector.load %arg5[%c32, %c0_1] : memref<144x32xf32, #tpu.memory_space<vmem>>, vector<32x32xf32>
    %c64 = arith.constant 64 : index
    %c0_2 = arith.constant 0 : index
    %2 = vector.load %arg5[%c64, %c0_2] : memref<144x32xf32, #tpu.memory_space<vmem>>, vector<16x32xf32>
    %c80 = arith.constant 80 : index
    %c0_3 = arith.constant 0 : index
    %3 = vector.load %arg5[%c80, %c0_3] : memref<144x32xf32, #tpu.memory_space<vmem>>, vector<32x32xf32>
    %c112 = arith.constant 112 : index
    %c0_4 = arith.constant 0 : index
    %4 = vector.load %arg5[%c112, %c0_4] : memref<144x32xf32, #tpu.memory_space<vmem>>, vector<32x32xf32>
    %c0_5 = arith.constant 0 : index
    %c0_6 = arith.constant 0 : index
    %5 = vector.load %arg6[%c0_5, %c0_6] : memref<5x32xf32, #tpu.memory_space<vmem>>, vector<1x32xf32>
    %c1 = arith.constant 1 : index
    %c0_7 = arith.constant 0 : index
    %6 = vector.load %arg6[%c1, %c0_7] : memref<5x32xf32, #tpu.memory_space<vmem>>, vector<1x32xf32>
    %c2 = arith.constant 2 : index
    %c0_8 = arith.constant 0 : index
    %7 = vector.load %arg6[%c2, %c0_8] : memref<5x32xf32, #tpu.memory_space<vmem>>, vector<1x32xf32>
    %c3 = arith.constant 3 : index
    %c0_9 = arith.constant 0 : index
    %8 = vector.load %arg6[%c3, %c0_9] : memref<5x32xf32, #tpu.memory_space<vmem>>, vector<1x32xf32>
    %c4 = arith.constant 4 : index
    %c0_10 = arith.constant 0 : index
    %9 = vector.load %arg6[%c4, %c0_10] : memref<5x32xf32, #tpu.memory_space<vmem>>, vector<1x32xf32>
    %c0_11 = arith.constant 0 : index
    %c0_12 = arith.constant 0 : index
    %c0_13 = arith.constant 0 : index
    %c0_14 = arith.constant 0 : index
    %10 = vector.load %arg2[%c0_11, %c0_12, %c0_13, %c0_14] : memref<1x4x48x32xf32, #tpu.memory_space<vmem>>, vector<1x4x48x32xf32>
    %11 = vector.shape_cast %10 : vector<1x4x48x32xf32> to vector<4x48x32xf32>
    %12 = vector.shape_cast %11 : vector<4x48x32xf32> to vector<192x32xf32>
    %cst = arith.constant dense<0.000000e+00> : vector<192x32xf32>
    %13 = tpu.matmul %12, %0, %cst {dimension_numbers = #tpu.dot_dimension_numbers<[1], [0], [0], [1], [0, 0, 1, 1], [], []>} : vector<192x32xf32>, vector<32x32xf32>, vector<192x32xf32> -> vector<192x32xf32>
    %14 = vector.broadcast %5 : vector<1x32xf32> to vector<192x32xf32>
    %15 = arith.addf %13, %14 : vector<192x32xf32>
    %cst_15 = arith.constant 0.000000e+00 : f32
    %16 = vector.broadcast %cst_15 : f32 to vector<192x32xf32>
    %17 = arith.maximumf %15, %16 : vector<192x32xf32>
    %18 = vector.shape_cast %17 : vector<192x32xf32> to vector<4x48x32xf32>
    %c0_16 = arith.constant 0 : index
    %c0_17 = arith.constant 0 : index
    %c0_18 = arith.constant 0 : index
    %19 = vector.load %arg8[%c0_16, %c0_17, %c0_18] : memref<4x48x32xf32, #tpu.memory_space<vmem>>, vector<4x48x32xf32>
    tpu.vector_store %arg8[%c0_16, %c0_17, %c0_18], %18 {strides = array<i32>} : memref<4x48x32xf32, #tpu.memory_space<vmem>>, vector<4x48x32xf32>,
    %c0_19 = arith.constant 0 : index
    %c0_20 = arith.constant 0 : index
    %c0_21 = arith.constant 0 : index
    %c0_22 = arith.constant 0 : index
    %20 = vector.load %arg3[%c0_19, %c0_20, %c0_21, %c0_22] : memref<1x8x48x32xf32, #tpu.memory_space<vmem>>, vector<1x8x48x32xf32>
    %21 = vector.shape_cast %20 : vector<1x8x48x32xf32> to vector<8x48x32xf32>
    %22 = vector.shape_cast %21 : vector<8x48x32xf32> to vector<384x32xf32>
    %cst_23 = arith.constant dense<0.000000e+00> : vector<384x32xf32>
    %23 = tpu.matmul %22, %1, %cst_23 {dimension_numbers = #tpu.dot_dimension_numbers<[1], [0], [0], [1], [0, 0, 1, 1], [], []>} : vector<384x32xf32>, vector<32x32xf32>, vector<384x32xf32> -> vector<384x32xf32>
    %24 = vector.broadcast %6 : vector<1x32xf32> to vector<384x32xf32>
    %25 = arith.addf %23, %24 : vector<384x32xf32>
    %cst_24 = arith.constant 0.000000e+00 : f32
    %26 = vector.broadcast %cst_24 : f32 to vector<384x32xf32>
    %27 = arith.maximumf %25, %26 : vector<384x32xf32>
    %28 = vector.shape_cast %27 : vector<384x32xf32> to vector<8x48x32xf32>
    %c0_25 = arith.constant 0 : index
    %c0_26 = arith.constant 0 : index
    %c0_27 = arith.constant 0 : index
    %29 = vector.load %arg9[%c0_25, %c0_26, %c0_27] : memref<8x48x32xf32, #tpu.memory_space<vmem>>, vector<8x48x32xf32>
    tpu.vector_store %arg9[%c0_25, %c0_26, %c0_27], %28 {strides = array<i32>} : memref<8x48x32xf32, #tpu.memory_space<vmem>>, vector<8x48x32xf32>,
    %c0_28 = arith.constant 0 : index
    %c0_29 = arith.constant 0 : index
    %c0_30 = arith.constant 0 : index
    %c0_31 = arith.constant 0 : index
    %30 = vector.load %arg4[%c0_28, %c0_29, %c0_30, %c0_31] : memref<1x8x48x16xf32, #tpu.memory_space<vmem>>, vector<1x8x48x16xf32>
    %31 = vector.shape_cast %30 : vector<1x8x48x16xf32> to vector<8x48x16xf32>
    %32 = vector.shape_cast %31 : vector<8x48x16xf32> to vector<384x16xf32>
    %cst_32 = arith.constant dense<0.000000e+00> : vector<384x32xf32>
    %33 = tpu.matmul %32, %2, %cst_32 {dimension_numbers = #tpu.dot_dimension_numbers<[1], [0], [0], [1], [0, 0, 1, 1], [], []>} : vector<384x16xf32>, vector<16x32xf32>, vector<384x32xf32> -> vector<384x32xf32>
    %34 = vector.broadcast %7 : vector<1x32xf32> to vector<384x32xf32>
    %35 = arith.addf %33, %34 : vector<384x32xf32>
    %cst_33 = arith.constant 0.000000e+00 : f32
    %36 = vector.broadcast %cst_33 : f32 to vector<384x32xf32>
    %37 = arith.maximumf %35, %36 : vector<384x32xf32>
    %38 = vector.shape_cast %37 : vector<384x32xf32> to vector<8x48x32xf32>
    %c0_34 = arith.constant 0 : index
    %c0_35 = arith.constant 0 : index
    %c0_36 = arith.constant 0 : index
    %39 = vector.load %arg10[%c0_34, %c0_35, %c0_36] : memref<8x48x32xf32, #tpu.memory_space<vmem>>, vector<8x48x32xf32>
    tpu.vector_store %arg10[%c0_34, %c0_35, %c0_36], %38 {strides = array<i32>} : memref<8x48x32xf32, #tpu.memory_space<vmem>>, vector<8x48x32xf32>,
    %40 = tpu.iota {dimensions = array<i32: 1>} : vector<64x32xi32>
    %c0_i32 = arith.constant 0 : i32
    %41 = vector.broadcast %c0_i32 : i32 to vector<64x32xi32>
    %42 = arith.cmpi sge, %40, %41 : vector<64x32xi32>
    %c8_i32 = arith.constant 8 : i32
    %43 = vector.broadcast %c8_i32 : i32 to vector<64x32xi32>
    %44 = arith.cmpi slt, %40, %43 : vector<64x32xi32>
    %45 = arith.andi %42, %44 : vector<64x32xi1>
    %46 = arith.extui %45 : vector<64x32xi1> to vector<64x32xi32>
    %47 = arith.sitofp %46 : vector<64x32xi32> to vector<64x32xf32>
    %c8_i32_37 = arith.constant 8 : i32
    %48 = vector.broadcast %c8_i32_37 : i32 to vector<64x32xi32>
    %49 = arith.cmpi sge, %40, %48 : vector<64x32xi32>
    %c16_i32 = arith.constant 16 : i32
    %50 = vector.broadcast %c16_i32 : i32 to vector<64x32xi32>
    %51 = arith.cmpi slt, %40, %50 : vector<64x32xi32>
    %52 = arith.andi %49, %51 : vector<64x32xi1>
    %53 = arith.extui %52 : vector<64x32xi1> to vector<64x32xi32>
    %54 = arith.sitofp %53 : vector<64x32xi32> to vector<64x32xf32>
    %c16_i32_38 = arith.constant 16 : i32
    %55 = vector.broadcast %c16_i32_38 : i32 to vector<64x32xi32>
    %56 = arith.cmpi sge, %40, %55 : vector<64x32xi32>
    %c24_i32 = arith.constant 24 : i32
    %57 = vector.broadcast %c24_i32 : i32 to vector<64x32xi32>
    %58 = arith.cmpi slt, %40, %57 : vector<64x32xi32>
    %59 = arith.andi %56, %58 : vector<64x32xi1>
    %60 = arith.extui %59 : vector<64x32xi1> to vector<64x32xi32>
    %61 = arith.sitofp %60 : vector<64x32xi32> to vector<64x32xf32>
    %c24_i32_39 = arith.constant 24 : i32
    %62 = vector.broadcast %c24_i32_39 : i32 to vector<64x32xi32>
    %63 = arith.cmpi sge, %40, %62 : vector<64x32xi32>
    %c32_i32 = arith.constant 32 : i32
    %64 = vector.broadcast %c32_i32 : i32 to vector<64x32xi32>
    %65 = arith.cmpi slt, %40, %64 : vector<64x32xi32>
    %66 = arith.andi %63, %65 : vector<64x32xi1>
    %67 = arith.extui %66 : vector<64x32xi1> to vector<64x32xi32>
    %68 = arith.sitofp %67 : vector<64x32xi32> to vector<64x32xf32>
    %69 = tpu.concatenate %47, %54, %61, %68 in 0 : vector<64x32xf32>, vector<64x32xf32>, vector<64x32xf32>, vector<64x32xf32> -> vector<256x32xf32>
    %70 = tpu.iota {dimensions = array<i32: 0>} : vector<256x128xi32>
    %71 = tpu.iota {dimensions = array<i32: 1>} : vector<256x128xi32>
    %c15_i32 = arith.constant 15 : i32
    %72 = vector.broadcast %c15_i32 : i32 to vector<256x128xi32>
    %73 = arith.andi %70, %72 : vector<256x128xi32>
    %c15_i32_40 = arith.constant 15 : i32
    %74 = vector.broadcast %c15_i32_40 : i32 to vector<256x128xi32>
    %75 = arith.andi %71, %74 : vector<256x128xi32>
    %76 = arith.cmpi eq, %73, %75 : vector<256x128xi32>
    %cst_41 = arith.constant 0.000000e+00 : f32
    %cst_42 = arith.constant -1.000000e+30 : f32
    %77 = vector.broadcast %cst_41 : f32 to vector<256x128xf32>
    %78 = vector.broadcast %cst_42 : f32 to vector<256x128xf32>
    %79 = arith.select %76, %77, %78 : vector<256x128xi1>, vector<256x128xf32>
    %c0_43 = arith.constant 0 : index
    %c0_44 = arith.constant 0 : index
    %c0_45 = arith.constant 0 : index
    %80 = vector.load %arg8[%c0_43, %c0_44, %c0_45] : memref<4x48x32xf32, #tpu.memory_space<vmem>>, vector<4x16x32xf32>
    %81 = vector.shape_cast %80 : vector<4x16x32xf32> to vector<64x32xf32>
    %c0_46 = arith.constant 0 : index
    %c0_47 = arith.constant 0 : index
    %c0_48 = arith.constant 0 : index
    %82 = vector.load %arg9[%c0_46, %c0_47, %c0_48] : memref<8x48x32xf32, #tpu.memory_space<vmem>>, vector<8x16x32xf32>
    %83 = vector.shape_cast %82 : vector<8x16x32xf32> to vector<128x32xf32>
    %c0_49 = arith.constant 0 : index
    %c0_50 = arith.constant 0 : index
    %c0_51 = arith.constant 0 : index
    %84 = vector.load %arg10[%c0_49, %c0_50, %c0_51] : memref<8x48x32xf32, #tpu.memory_space<vmem>>, vector<8x16x32xf32>
    %85 = vector.shape_cast %84 : vector<8x16x32xf32> to vector<128x32xf32>
    %86 = tpu.concatenate %81, %81, %81, %81 in 0 : vector<64x32xf32>, vector<64x32xf32>, vector<64x32xf32>, vector<64x32xf32> -> vector<256x32xf32>
    %87 = arith.mulf %86, %69 : vector<256x32xf32>
    %cst_52 = arith.constant dense<0.000000e+00> : vector<256x128xf32>
    %88 = tpu.matmul %87, %83, %cst_52 {dimension_numbers = #tpu.dot_dimension_numbers<[1], [1], [0], [0], [0, 0, 1, 0], [], []>} : vector<256x32xf32>, vector<128x32xf32>, vector<256x128xf32> -> vector<256x128xf32>
    %89 = arith.addf %88, %79 : vector<256x128xf32>
    %cst_53 = arith.constant dense<0xFF800000> : vector<256xf32>
    %90 = vector.multi_reduction <maximumf>, %89, %cst_53 [1] : vector<256x128xf32> to vector<256xf32>
    %91 = vector.shape_cast %90 : vector<256xf32> to vector<256x1xf32>
    %92 = vector.broadcast %91 : vector<256x1xf32> to vector<256x128xf32>
    %93 = arith.subf %89, %92 : vector<256x128xf32>
    %94 = math.exp %93 : vector<256x128xf32>
    %cst_54 = arith.constant dense<0.000000e+00> : vector<256xf32>
    %95 = vector.multi_reduction <add>, %94, %cst_54 [1] : vector<256x128xf32> to vector<256xf32>
    %96 = vector.shape_cast %95 : vector<256xf32> to vector<256x1xf32>
    %97 = tpu.reciprocal %96 : vector<256x1xf32> -> vector<256x1xf32>
    %98 = vector.broadcast %97 : vector<256x1xf32> to vector<256x128xf32>
    %99 = arith.mulf %94, %98 : vector<256x128xf32>
    %cst_55 = arith.constant dense<0.000000e+00> : vector<256x32xf32>
    %100 = tpu.matmul %99, %85, %cst_55 {dimension_numbers = #tpu.dot_dimension_numbers<[1], [0], [0], [1], [0, 0, 1, 1], [], []>} : vector<256x128xf32>, vector<128x32xf32>, vector<256x32xf32> -> vector<256x32xf32>
    %101 = arith.mulf %100, %69 : vector<256x32xf32>
    %102 = vector.extract_strided_slice %101 {offsets = [0, 0], sizes = [64, 32], strides = [1, 1]} : vector<256x32xf32> to vector<64x32xf32>
    %103 = vector.extract_strided_slice %101 {offsets = [64, 0], sizes = [64, 32], strides = [1, 1]} : vector<256x32xf32> to vector<64x32xf32>
    %104 = arith.addf %102, %103 : vector<64x32xf32>
    %105 = vector.extract_strided_slice %101 {offsets = [128, 0], sizes = [64, 32], strides = [1, 1]} : vector<256x32xf32> to vector<64x32xf32>
    %106 = arith.addf %104, %105 : vector<64x32xf32>
    %107 = vector.extract_strided_slice %101 {offsets = [192, 0], sizes = [64, 32], strides = [1, 1]} : vector<256x32xf32> to vector<64x32xf32>
    %108 = arith.addf %106, %107 : vector<64x32xf32>
    %109 = vector.shape_cast %108 : vector<64x32xf32> to vector<4x16x32xf32>
    %c0_56 = arith.constant 0 : index
    %c0_57 = arith.constant 0 : index
    %c0_58 = arith.constant 0 : index
    %110 = vector.load %arg11[%c0_56, %c0_57, %c0_58] : memref<4x48x32xf32, #tpu.memory_space<vmem>>, vector<4x16x32xf32>
    tpu.vector_store %arg11[%c0_56, %c0_57, %c0_58], %109 {strides = array<i32>} : memref<4x48x32xf32, #tpu.memory_space<vmem>>, vector<4x16x32xf32>,
    %c0_59 = arith.constant 0 : index
    %c16 = arith.constant 16 : index
    %c0_60 = arith.constant 0 : index
    %111 = vector.load %arg8[%c0_59, %c16, %c0_60] : memref<4x48x32xf32, #tpu.memory_space<vmem>>, vector<4x16x32xf32>
    %112 = vector.shape_cast %111 : vector<4x16x32xf32> to vector<64x32xf32>
    %c0_61 = arith.constant 0 : index
    %c16_62 = arith.constant 16 : index
    %c0_63 = arith.constant 0 : index
    %113 = vector.load %arg9[%c0_61, %c16_62, %c0_63] : memref<8x48x32xf32, #tpu.memory_space<vmem>>, vector<8x16x32xf32>
    %114 = vector.shape_cast %113 : vector<8x16x32xf32> to vector<128x32xf32>
    %c0_64 = arith.constant 0 : index
    %c16_65 = arith.constant 16 : index
    %c0_66 = arith.constant 0 : index
    %115 = vector.load %arg10[%c0_64, %c16_65, %c0_66] : memref<8x48x32xf32, #tpu.memory_space<vmem>>, vector<8x16x32xf32>
    %116 = vector.shape_cast %115 : vector<8x16x32xf32> to vector<128x32xf32>
    %117 = tpu.concatenate %112, %112, %112, %112 in 0 : vector<64x32xf32>, vector<64x32xf32>, vector<64x32xf32>, vector<64x32xf32> -> vector<256x32xf32>
    %118 = arith.mulf %117, %69 : vector<256x32xf32>
    %cst_67 = arith.constant dense<0.000000e+00> : vector<256x128xf32>
    %119 = tpu.matmul %118, %114, %cst_67 {dimension_numbers = #tpu.dot_dimension_numbers<[1], [1], [0], [0], [0, 0, 1, 0], [], []>} : vector<256x32xf32>, vector<128x32xf32>, vector<256x128xf32> -> vector<256x128xf32>
    %120 = arith.addf %119, %79 : vector<256x128xf32>
    %cst_68 = arith.constant dense<0xFF800000> : vector<256xf32>
    %121 = vector.multi_reduction <maximumf>, %120, %cst_68 [1] : vector<256x128xf32> to vector<256xf32>
    %122 = vector.shape_cast %121 : vector<256xf32> to vector<256x1xf32>
    %123 = vector.broadcast %122 : vector<256x1xf32> to vector<256x128xf32>
    %124 = arith.subf %120, %123 : vector<256x128xf32>
    %125 = math.exp %124 : vector<256x128xf32>
    %cst_69 = arith.constant dense<0.000000e+00> : vector<256xf32>
    %126 = vector.multi_reduction <add>, %125, %cst_69 [1] : vector<256x128xf32> to vector<256xf32>
    %127 = vector.shape_cast %126 : vector<256xf32> to vector<256x1xf32>
    %128 = tpu.reciprocal %127 : vector<256x1xf32> -> vector<256x1xf32>
    %129 = vector.broadcast %128 : vector<256x1xf32> to vector<256x128xf32>
    %130 = arith.mulf %125, %129 : vector<256x128xf32>
    %cst_70 = arith.constant dense<0.000000e+00> : vector<256x32xf32>
    %131 = tpu.matmul %130, %116, %cst_70 {dimension_numbers = #tpu.dot_dimension_numbers<[1], [0], [0], [1], [0, 0, 1, 1], [], []>} : vector<256x128xf32>, vector<128x32xf32>, vector<256x32xf32> -> vector<256x32xf32>
    %132 = arith.mulf %131, %69 : vector<256x32xf32>
    %133 = vector.extract_strided_slice %132 {offsets = [0, 0], sizes = [64, 32], strides = [1, 1]} : vector<256x32xf32> to vector<64x32xf32>
    %134 = vector.extract_strided_slice %132 {offsets = [64, 0], sizes = [64, 32], strides = [1, 1]} : vector<256x32xf32> to vector<64x32xf32>
    %135 = arith.addf %133, %134 : vector<64x32xf32>
    %136 = vector.extract_strided_slice %132 {offsets = [128, 0], sizes = [64, 32], strides = [1, 1]} : vector<256x32xf32> to vector<64x32xf32>
    %137 = arith.addf %135, %136 : vector<64x32xf32>
    %138 = vector.extract_strided_slice %132 {offsets = [192, 0], sizes = [64, 32], strides = [1, 1]} : vector<256x32xf32> to vector<64x32xf32>
    %139 = arith.addf %137, %138 : vector<64x32xf32>
    %140 = vector.shape_cast %139 : vector<64x32xf32> to vector<4x16x32xf32>
    %c0_71 = arith.constant 0 : index
    %c16_72 = arith.constant 16 : index
    %c0_73 = arith.constant 0 : index
    %141 = vector.load %arg11[%c0_71, %c16_72, %c0_73] : memref<4x48x32xf32, #tpu.memory_space<vmem>>, vector<4x16x32xf32>
    tpu.vector_store %arg11[%c0_71, %c16_72, %c0_73], %140 {strides = array<i32>} : memref<4x48x32xf32, #tpu.memory_space<vmem>>, vector<4x16x32xf32>,
    %c0_74 = arith.constant 0 : index
    %c32_75 = arith.constant 32 : index
    %c0_76 = arith.constant 0 : index
    %142 = vector.load %arg8[%c0_74, %c32_75, %c0_76] : memref<4x48x32xf32, #tpu.memory_space<vmem>>, vector<4x16x32xf32>
    %143 = vector.shape_cast %142 : vector<4x16x32xf32> to vector<64x32xf32>
    %c0_77 = arith.constant 0 : index
    %c32_78 = arith.constant 32 : index
    %c0_79 = arith.constant 0 : index
    %144 = vector.load %arg9[%c0_77, %c32_78, %c0_79] : memref<8x48x32xf32, #tpu.memory_space<vmem>>, vector<8x16x32xf32>
    %145 = vector.shape_cast %144 : vector<8x16x32xf32> to vector<128x32xf32>
    %c0_80 = arith.constant 0 : index
    %c32_81 = arith.constant 32 : index
    %c0_82 = arith.constant 0 : index
    %146 = vector.load %arg10[%c0_80, %c32_81, %c0_82] : memref<8x48x32xf32, #tpu.memory_space<vmem>>, vector<8x16x32xf32>
    %147 = vector.shape_cast %146 : vector<8x16x32xf32> to vector<128x32xf32>
    %148 = tpu.concatenate %143, %143, %143, %143 in 0 : vector<64x32xf32>, vector<64x32xf32>, vector<64x32xf32>, vector<64x32xf32> -> vector<256x32xf32>
    %149 = arith.mulf %148, %69 : vector<256x32xf32>
    %cst_83 = arith.constant dense<0.000000e+00> : vector<256x128xf32>
    %150 = tpu.matmul %149, %145, %cst_83 {dimension_numbers = #tpu.dot_dimension_numbers<[1], [1], [0], [0], [0, 0, 1, 0], [], []>} : vector<256x32xf32>, vector<128x32xf32>, vector<256x128xf32> -> vector<256x128xf32>
    %151 = arith.addf %150, %79 : vector<256x128xf32>
    %cst_84 = arith.constant dense<0xFF800000> : vector<256xf32>
    %152 = vector.multi_reduction <maximumf>, %151, %cst_84 [1] : vector<256x128xf32> to vector<256xf32>
    %153 = vector.shape_cast %152 : vector<256xf32> to vector<256x1xf32>
    %154 = vector.broadcast %153 : vector<256x1xf32> to vector<256x128xf32>
    %155 = arith.subf %151, %154 : vector<256x128xf32>
    %156 = math.exp %155 : vector<256x128xf32>
    %cst_85 = arith.constant dense<0.000000e+00> : vector<256xf32>
    %157 = vector.multi_reduction <add>, %156, %cst_85 [1] : vector<256x128xf32> to vector<256xf32>
    %158 = vector.shape_cast %157 : vector<256xf32> to vector<256x1xf32>
    %159 = tpu.reciprocal %158 : vector<256x1xf32> -> vector<256x1xf32>
    %160 = vector.broadcast %159 : vector<256x1xf32> to vector<256x128xf32>
    %161 = arith.mulf %156, %160 : vector<256x128xf32>
    %cst_86 = arith.constant dense<0.000000e+00> : vector<256x32xf32>
    %162 = tpu.matmul %161, %147, %cst_86 {dimension_numbers = #tpu.dot_dimension_numbers<[1], [0], [0], [1], [0, 0, 1, 1], [], []>} : vector<256x128xf32>, vector<128x32xf32>, vector<256x32xf32> -> vector<256x32xf32>
    %163 = arith.mulf %162, %69 : vector<256x32xf32>
    %164 = vector.extract_strided_slice %163 {offsets = [0, 0], sizes = [64, 32], strides = [1, 1]} : vector<256x32xf32> to vector<64x32xf32>
    %165 = vector.extract_strided_slice %163 {offsets = [64, 0], sizes = [64, 32], strides = [1, 1]} : vector<256x32xf32> to vector<64x32xf32>
    %166 = arith.addf %164, %165 : vector<64x32xf32>
    %167 = vector.extract_strided_slice %163 {offsets = [128, 0], sizes = [64, 32], strides = [1, 1]} : vector<256x32xf32> to vector<64x32xf32>
    %168 = arith.addf %166, %167 : vector<64x32xf32>
    %169 = vector.extract_strided_slice %163 {offsets = [192, 0], sizes = [64, 32], strides = [1, 1]} : vector<256x32xf32> to vector<64x32xf32>
    %170 = arith.addf %168, %169 : vector<64x32xf32>
    %171 = vector.shape_cast %170 : vector<64x32xf32> to vector<4x16x32xf32>
    %c0_87 = arith.constant 0 : index
    %c32_88 = arith.constant 32 : index
    %c0_89 = arith.constant 0 : index
    %172 = vector.load %arg11[%c0_87, %c32_88, %c0_89] : memref<4x48x32xf32, #tpu.memory_space<vmem>>, vector<4x16x32xf32>
    tpu.vector_store %arg11[%c0_87, %c32_88, %c0_89], %171 {strides = array<i32>} : memref<4x48x32xf32, #tpu.memory_space<vmem>>, vector<4x16x32xf32>,
    %c0_90 = arith.constant 0 : index
    %c0_91 = arith.constant 0 : index
    %c0_92 = arith.constant 0 : index
    %173 = vector.load %arg11[%c0_90, %c0_91, %c0_92] : memref<4x48x32xf32, #tpu.memory_space<vmem>>, vector<4x48x32xf32>
    %174 = vector.shape_cast %173 : vector<4x48x32xf32> to vector<192x32xf32>
    %cst_93 = arith.constant dense<0.000000e+00> : vector<192x32xf32>
    %175 = tpu.matmul %174, %3, %cst_93 {dimension_numbers = #tpu.dot_dimension_numbers<[1], [0], [0], [1], [0, 0, 1, 1], [], []>} : vector<192x32xf32>, vector<32x32xf32>, vector<192x32xf32> -> vector<192x32xf32>
    %176 = vector.broadcast %8 : vector<1x32xf32> to vector<192x32xf32>
    %177 = arith.addf %175, %176 : vector<192x32xf32>
    %cst_94 = arith.constant 0.000000e+00 : f32
    %178 = vector.broadcast %cst_94 : f32 to vector<192x32xf32>
    %179 = arith.maximumf %177, %178 : vector<192x32xf32>
    %cst_95 = arith.constant dense<0.000000e+00> : vector<192x32xf32>
    %180 = tpu.matmul %179, %4, %cst_95 {dimension_numbers = #tpu.dot_dimension_numbers<[1], [0], [0], [1], [0, 0, 1, 1], [], []>} : vector<192x32xf32>, vector<32x32xf32>, vector<192x32xf32> -> vector<192x32xf32>
    %181 = vector.broadcast %9 : vector<1x32xf32> to vector<192x32xf32>
    %182 = arith.addf %180, %181 : vector<192x32xf32>
    %183 = vector.shape_cast %182 : vector<192x32xf32> to vector<4x48x32xf32>
    %c0_96 = arith.constant 0 : index
    %c0_97 = arith.constant 0 : index
    %c0_98 = arith.constant 0 : index
    %c0_99 = arith.constant 0 : index
    %184 = vector.load %arg7[%c0_96, %c0_97, %c0_98, %c0_99] : memref<1x4x48x32xf32, #tpu.memory_space<vmem>>, vector<1x4x48x32xf32>
    %185 = vector.shape_cast %184 : vector<1x4x48x32xf32> to vector<4x48x32xf32>
    %186 = vector.shape_cast %183 : vector<4x48x32xf32> to vector<1x4x48x32xf32>
    tpu.vector_store %arg7[%c0_96, %c0_97, %c0_98, %c0_99], %186 {strides = array<i32>} : memref<1x4x48x32xf32, #tpu.memory_space<vmem>>, vector<1x4x48x32xf32>,
    return
  }
  func.func @transform_0(%arg0: i32, %arg1: i32) -> (i32, i32, i32, i32) {
    %c0_i32 = arith.constant 0 : i32
    %c0_i32_0 = arith.constant 0 : i32
    %c0_i32_1 = arith.constant 0 : i32
    return %arg0, %c0_i32, %arg1, %c0_i32_0 : i32, i32, i32, i32
  }
  func.func @transform_1(%arg0: i32, %arg1: i32) -> (i32, i32, i32, i32) {
    %c0_i32 = arith.constant 0 : i32
    %c0_i32_0 = arith.constant 0 : i32
    %c0_i32_1 = arith.constant 0 : i32
    return %arg0, %c0_i32, %arg1, %c0_i32_0 : i32, i32, i32, i32
  }
  func.func @transform_2(%arg0: i32, %arg1: i32) -> (i32, i32, i32, i32) {
    %c0_i32 = arith.constant 0 : i32
    %c0_i32_0 = arith.constant 0 : i32
    %c0_i32_1 = arith.constant 0 : i32
    return %arg0, %c0_i32, %arg1, %c0_i32_0 : i32, i32, i32, i32
  }
  func.func @transform_3(%arg0: i32, %arg1: i32) -> (i32, i32) {
    %c0_i32 = arith.constant 0 : i32
    %c0_i32_0 = arith.constant 0 : i32
    %c0_i32_1 = arith.constant 0 : i32
    return %c0_i32, %c0_i32_0 : i32, i32
  }
  func.func @transform_4(%arg0: i32, %arg1: i32) -> (i32, i32) {
    %c0_i32 = arith.constant 0 : i32
    %c0_i32_0 = arith.constant 0 : i32
    %c0_i32_1 = arith.constant 0 : i32
    return %c0_i32, %c0_i32_0 : i32, i32
  }
  func.func @transform_5(%arg0: i32, %arg1: i32) -> (i32, i32, i32, i32) {
    %c0_i32 = arith.constant 0 : i32
    %c0_i32_0 = arith.constant 0 : i32
    %c0_i32_1 = arith.constant 0 : i32
    return %arg0, %c0_i32, %arg1, %c0_i32_0 : i32, i32, i32, i32
  }
}

</mosaic_0001>

<bundles_post_ra>
// kernel: tpu_custom_call.1
= control target key start
LH: loop header
LB: loop body
LE: loop exit
PB: predicated region body
PF: predicated region fallthrough
CT: control target
= control target key end

     0   :  { %s8134_s18 = smov 0   ;;  %s8136_s19 = smov 0   ;;  %s10752_s0 = inlined_call_operand.vmem [shape: f32[2,4,48,32], index: 0, kind: input, shape index: {}]   ;;  %s10753_s1 = inlined_call_operand.vmem [shape: f32[2,8,48,32], index: 1, kind: input, shape index: {}]   ;;  %s10754_s2 = inlined_call_operand.vmem [shape: f32[2,8,48,16], index: 2, kind: input, shape index: {}]   ;;  %s10755_s3 = inlined_call_operand.vmem [shape: f32[144,32], index: 3, kind: input, shape index: {}]   ;;  %s10756_s4 = inlined_call_operand.vmem [shape: f32[5,32], index: 4, kind: input, shape index: {}]   ;;  %s10757_s5 = inlined_call_operand.vmem [shape: f32[2,4,48,32], index: 5, kind: output, shape index: {}]  }
   0x1   :  { %s8138_s20 = smov 0  }
   0x2 LB: > { %s27_s21 = sadd.s32 1, %s8096_s19  ;;  %p5815_p0 = scmp.ge.s32.totalorder %s8100_s20, 1  ;;  %s8100_s20 = sphi %s8138_s20, %s15_s20   ;;  %s8096_s19 = sphi %s8136_s19, %s11092_s19   ;;  %s8092_s18 = sphi %s8134_s18, %s11091_s18  }
   0x3   : > { %p29_p1 = scmp.ge.s32.totalorder %s27_s21, 2  ;;  %p242_p2 = scmp.lt.s32.totalorder %s8100_s20, 3 }
   0x5   : > { %s11094_s21 = smov (%p29_p1, %s27_s21), 0  ;;  %p243_p3 = pnand %p5815_p0, %p242_p2 }
   0x7   : > { %246 = sbr.rel (%p243_p3) target bundleno = 1806 (0x70e), region = 40 }
   0xe   : > { %v336_v0 = vld [vmem:[%s10755_s3] sm:$0xff]  ;;  %v337_v1 = vld [vmem:[%s10755_s3 + $0x8] sm:$0xff]  ;;  %v338_v2 = vld [vmem:[%s10755_s3 + $0x10] sm:$0xff]  ;;  %p297_p4 = scmp.lt.s32.totalorder %s8092_s18, 1  ;;  %vm387_vm0 = vcmask 261120   ;;  %vm1342_vm9 = vcmask 130048  }
   0xf   : > { %v7385_v3 = vpack.c.bf16 %v337_v1, %v336_v0  ;;  %v339_v4 = vld [vmem:[%s10755_s3 + $0x18] sm:$0xff]  ;;  %v340_v6 = vld [vmem:[%s10755_s3 + $0x20] sm:$0xff]  ;;  %v341_v7 = vld [vmem:[%s10755_s3 + $0x28] sm:$0xff] }
  0x10   : > { %v7389_v5 = vpack.c.bf16 %v339_v4, %v338_v2  ;;  %s11096_s18 = smov (!%p297_p4, %s8092_s18), 1  ;;  %v7393_v8 = vpack.c.bf16 %v341_v7, %v340_v6  ;;  %v342_v9 = vld [vmem:[%s10755_s3 + $0x30] sm:$0xff]  ;;  %v343_v10 = vld [vmem:[%s10755_s3 + $0x38] sm:$0xff]  ;;  %vm8414_vm2 = vmpackc.low %vm387_vm0, %vm387_vm0 }
  0x11   : > { %7661 = vmatprep.subr.bf16.mxu1 %v7385_v3  ;;  %7386 = vmatprep.subr.bf16.mxu0 %v7385_v3  ;;  %s7665_s9 = smul.u32 192, %s11096_s18  ;;  %v7397_v14 = vpack.c.bf16 %v343_v10, %v342_v9 }
  0x12   : > { %7663 = vmatpush3.bf16.msra.mxu1 %v7385_v3  ;;  %7388 = vmatpush3.bf16.msra.mxu0 %v7385_v3  ;;  %s7666_s17 = smul.u32 384, %s11096_s18 }
  0x13   : > { %7662 = vmatprep.subr.bf16.mxu1 %v7389_v5  ;;  %7390 = vmatprep.subr.bf16.mxu0 %v7389_v5  ;;  %s8178_s12 = scalar_lea.vmem %s10752_s0, %s7665_s9  ;;  %s10669_s22 = scalar_lea.vmem %s10757_s5, %s7665_s9 }
  0x14   : > { %v371_v11 = vld [vmem:[%s8178_s12 + $0x60] sm:$0xff]  ;;  %v372_v12 = vld [vmem:[%s8178_s12 + $0x68] sm:$0xff]  ;;  %v373_v13 = vld [vmem:[%s8178_s12 + $0x70] sm:$0xff]  ;;  %s8214_s24 = scalar_lea.vmem %s10753_s1, %s7666_s17  ;;  %s8643_s11 = scalar_lea.vmem %s10754_s2, %s7666_s17 }
  0x15   : > { %6643 = vmatprep.mubr.msk.f32.mxu1 %vm387_vm0, %v371_v11  ;;  %v374_v15 = vld [vmem:[%s8178_s12 + $0x78] sm:$0xff]  ;;  %v375_v16 = vld [vmem:[%s8178_s12 + $0x80] sm:$0xff]  ;;  %v376_v17 = vld [vmem:[%s8178_s12 + $0x88] sm:$0xff] }
  0x16   : > { %7664 = vmatpush3.bf16.msra.mxu1 %v7389_v5  ;;  %7392 = vmatpush3.bf16.msra.mxu0 %v7389_v5  ;;  %v377_v18 = vld [vmem:[%s8178_s12 + $0x90] sm:$0xff]  ;;  %v378_v19 = vld [vmem:[%s8178_s12 + $0x98] sm:$0xff]  ;;  %v379_v20 = vld [vmem:[%s8178_s12 + $0xa0] sm:$0xff] }
  0x17   : > { %7394 = vmatprep.subr.bf16.mxu1 %v7393_v8  ;;  %v380_v21 = vld [vmem:[%s8178_s12 + $0xa8] sm:$0xff]  ;;  %v381_v22 = vld [vmem:[%s8178_s12 + $0xb0] sm:$0xff]  ;;  %v359_v23 = vld [vmem:[%s8178_s12] sm:$0xff] }
  0x18   : > { %v360_v24 = vld [vmem:[%s8178_s12 + $0x8] sm:$0xff]  ;;  %6625 = vmatprep.mubr.msk.f32.mxu0 %vm387_vm0, %v359_v23  ;;  %v361_v25 = vld [vmem:[%s8178_s12 + $0x10] sm:$0xff]  ;;  %v382_v26 = vld [vmem:[%s8178_s12 + $0xb8] sm:$0xff] }
  0x19   : > { %6644 = vmatmul.mubr.msk.f32.vlgmr.msra.gmra.mrb[0].mxu1 %vm387_vm0, %v372_v12  ;;  %6626 = vmatmul.mubr.msk.f32.vlgmr.msra.gmra.mrb[0].mxu0 %vm387_vm0, %v360_v24  ;;  %v362_v27 = vld [vmem:[%s8178_s12 + $0x18] sm:$0xff]  ;;  %v693_v28 = vld [vmem:[%s8214_s24] sm:$0xff]  ;;  %v694_v30 = vld [vmem:[%s8214_s24 + $0x8] sm:$0xff] }
  0x1a   : > { %6646 = vmatprep.mubr.msk.f32.mxu1 %vm387_vm0, %v373_v13  ;;  %7396 = vmatpush3.bf16.msra.mxu1 %v7393_v8  ;;  %v363_v29 = vld [vmem:[%s8178_s12 + $0x20] sm:$0xff]  ;;  %v364_v31 = vld [vmem:[%s8178_s12 + $0x28] sm:$0xff]  ;;  %v695_v32 = vld [vmem:[%s8214_s24 + $0x10] sm:$0xff] }
  0x1b   : > { %7398 = vmatprep.subr.bf16.mxu1 %v7397_v14  ;;  %6628 = vmatprep.mubr.msk.f32.mxu0 %vm387_vm0, %v361_v25  ;;  %v365_v33 = vld [vmem:[%s8178_s12 + $0x30] sm:$0xff]  ;;  %v696_v34 = vld [vmem:[%s8214_s24 + $0x18] sm:$0xff]  ;;  %v697_v36 = vld [vmem:[%s8214_s24 + $0x20] sm:$0xff] }
  0x1c   : > { %v366_v35 = vld [vmem:[%s8178_s12 + $0x38] sm:$0xff]  ;;  %v367_v37 = vld [vmem:[%s8178_s12 + $0x40] sm:$0xff]  ;;  %v698_v38 = vld [vmem:[%s8214_s24 + $0x28] sm:$0xff] }
  0x1d   : > { %6647 = vmatmul.mubr.msk.f32.gmra.mrb[2].mxu1 %vm387_vm0, %v374_v15  ;;  %6629 = vmatmul.mubr.msk.f32.gmra.mrb[2].mxu0 %vm387_vm0, %v362_v27  ;;  %v368_v39 = vld [vmem:[%s8178_s12 + $0x48] sm:$0xff]  ;;  %v699_v40 = vld [vmem:[%s8214_s24 + $0x30] sm:$0xff]  ;;  %v700_v41 = vld [vmem:[%s8214_s24 + $0x38] sm:$0xff] }
  0x1e   : > { %6649 = vmatprep.mubr.msk.f32.mxu1 %vm387_vm0, %v375_v16  ;;  %7400 = vmatpush3.bf16.msra.mxu1 %v7397_v14  ;;  %v701_v42 = vld [vmem:[%s8214_s24 + $0x40] sm:$0xff]  ;;  %v702_v43 = vld [vmem:[%s8214_s24 + $0x48] sm:$0xff]  ;;  %v703_v44 = vld [vmem:[%s8214_s24 + $0x50] sm:$0xff] }
  0x1f   : > { %6631 = vmatprep.mubr.msk.f32.mxu0 %vm387_vm0, %v363_v29  ;;  %v704_v45 = vld [vmem:[%s8214_s24 + $0x58] sm:$0xff]  ;;  %v705_v46 = vld [vmem:[%s8214_s24 + $0x60] sm:$0xff]  ;;  %v706_v47 = vld [vmem:[%s8214_s24 + $0x68] sm:$0xff] }
  0x20   : > { %v707_v48 = vld [vmem:[%s8214_s24 + $0x70] sm:$0xff]  ;;  %v708_v49 = vld [vmem:[%s8214_s24 + $0x78] sm:$0xff]  ;;  %v709_v50 = vld [vmem:[%s8214_s24 + $0x80] sm:$0xff] }
  0x21   : > { %6650 = vmatmul.mubr.msk.f32.gmra.mrb[4].mxu1 %vm387_vm0, %v376_v17  ;;  %6632 = vmatmul.mubr.msk.f32.gmra.mrb[4].mxu0 %vm387_vm0, %v364_v31  ;;  %v710_v51 = vld [vmem:[%s8214_s24 + $0x88] sm:$0xff]  ;;  %v711_v52 = vld [vmem:[%s8214_s24 + $0x90] sm:$0xff]  ;;  %v712_v53 = vld [vmem:[%s8214_s24 + $0x98] sm:$0xff] }
  0x22   : > { %6652 = vmatprep.mubr.msk.f32.mxu1 %vm387_vm0, %v377_v18  ;;  %6634 = vmatprep.mubr.msk.f32.mxu0 %vm387_vm0, %v365_v33  ;;  %v713_v54 = vld [vmem:[%s8214_s24 + $0xa0] sm:$0xff]  ;;  %v714_v55 = vld [vmem:[%s8214_s24 + $0xa8] sm:$0xff]  ;;  %v715_v56 = vld [vmem:[%s8214_s24 + $0xb0] sm:$0xff] }
  0x23   : > { %v716_v57 = vld [vmem:[%s8214_s24 + $0xb8] sm:$0xff]  ;;  %v717_v58 = vld [vmem:[%s8214_s24 + $0xc0] sm:$0xff]  ;;  %v718_v59 = vld [vmem:[%s8214_s24 + $0xc8] sm:$0xff] }
  0x24   : > { %v719_v60 = vld [vmem:[%s8214_s24 + $0xd0] sm:$0xff]  ;;  %v720_v61 = vld [vmem:[%s8214_s24 + $0xd8] sm:$0xff]  ;;  %v721_v62 = vld [vmem:[%s8214_s24 + $0xe0] sm:$0xff] }
  0x25   : > { %6653 = vmatmul.mubr.msk.f32.gmra.mrb[6].mxu1 %vm387_vm0, %v378_v19  ;;  %6635 = vmatmul.mubr.msk.f32.gmra.mrb[6].mxu0 %vm387_vm0, %v366_v35  ;;  %v722_v63 = vld [vmem:[%s8214_s24 + $0xe8] sm:$0xff]  ;;  %v723_v0 = vld [vmem:[%s8214_s24 + $0xf0] sm:$0xff]  ;;  %v724_v1 = vld [vmem:[%s8214_s24 + $0xf8] sm:$0xff] }
  0x26   : > { %6655 = vmatprep.mubr.msk.f32.mxu1 %vm387_vm0, %v379_v20  ;;  %6637 = vmatprep.mubr.msk.f32.mxu0 %vm387_vm0, %v367_v37  ;;  %v725_v2 = vld [vmem:[%s8214_s24 + $0x100] sm:$0xff]  ;;  %v726_v3 = vld [vmem:[%s8214_s24 + $0x108] sm:$0xff]  ;;  %v727_v4 = vld [vmem:[%s8214_s24 + $0x110] sm:$0xff] }
  0x27   : > { %v728_v5 = vld [vmem:[%s8214_s24 + $0x118] sm:$0xff]  ;;  %v729_v6 = vld [vmem:[%s8214_s24 + $0x120] sm:$0xff]  ;;  %v730_v7 = vld [vmem:[%s8214_s24 + $0x128] sm:$0xff] }
  0x28   : > { %v731_v8 = vld [vmem:[%s8214_s24 + $0x130] sm:$0xff]  ;;  %v732_v9 = vld [vmem:[%s8214_s24 + $0x138] sm:$0xff]  ;;  %v733_v10 = vld [vmem:[%s8214_s24 + $0x140] sm:$0xff] }
  0x29   : > { %6656 = vmatmul.mubr.msk.f32.gmra.mrb[8].mxu1 %vm387_vm0, %v380_v21  ;;  %6638 = vmatmul.mubr.msk.f32.gmra.mrb[8].mxu0 %vm387_vm0, %v368_v39  ;;  %v734_v11 = vld [vmem:[%s8214_s24 + $0x148] sm:$0xff]  ;;  %v735_v12 = vld [vmem:[%s8214_s24 + $0x150] sm:$0xff]  ;;  %v736_v13 = vld [vmem:[%s8214_s24 + $0x158] sm:$0xff] }
  0x2a   : > { %6658 = vmatprep.mubr.msk.f32.mxu1 %vm387_vm0, %v381_v22  ;;  %v737_v14 = vld [vmem:[%s8214_s24 + $0x160] sm:$0xff]  ;;  %v738_v15 = vld [vmem:[%s8214_s24 + $0x168] sm:$0xff]  ;;  %v739_v16 = vld [vmem:[%s8214_s24 + $0x170] sm:$0xff] }
  0x2b   : > { %v740_v17 = vld [vmem:[%s8214_s24 + $0x178] sm:$0xff]  ;;  %v369_v18 = vld [vmem:[%s8178_s12 + $0x50] sm:$0xff]  ;;  %v8341_v20 = vld [vmem:[%s10756_s4] ss:$0 sm:$0xff] }
  0x2c   : > { %6640 = vmatprep.mubr.msk.f32.mxu0 %vm387_vm0, %v369_v18  ;;  %v370_v19 = vld [vmem:[%s8178_s12 + $0x58] sm:$0xff] }
  0x2d   : > { %6659 = vmatmul.mubr.msk.f32.gmra.mrb[10].mxu1 %vm387_vm0, %v382_v26  ;;  %6641 = vmatmul.mubr.msk.f32.gmra.mrb[10].mxu0 %vm387_vm0, %v370_v19 }
  0x2e   : > { %6669 = vmatprep.mubr.msk.f32.mxu1 %vm387_vm0, %v693_v28 }
  0x31   : > { %6670 = vmatmul.mubr.msk.f32.vlgmr.msra.gmra.mrb[12].mxu1 %vm387_vm0, %v694_v30 }
  0x32   : > { %6672 = vmatprep.mubr.msk.f32.mxu1 %vm387_vm0, %v695_v32 }
  0x35   : > { %6673 = vmatmul.mubr.msk.f32.gmra.mrb[14].mxu1 %vm387_vm0, %v696_v34 }
  0x36   : > { %6675 = vmatprep.mubr.msk.f32.mxu1 %vm387_vm0, %v697_v36 }
  0x39   : > { %6676 = vmatmul.mubr.msk.f32.gmra.mrb[16].mxu1 %vm387_vm0, %v698_v38 }
  0x3a   : > { %6678 = vmatprep.mubr.msk.f32.mxu1 %vm387_vm0, %v699_v40 }
  0x3d   : > { %6679 = vmatmul.mubr.msk.f32.gmra.mrb[18].mxu1 %vm387_vm0, %v700_v41 }
  0x3e   : > { %6681 = vmatprep.mubr.msk.f32.mxu1 %vm387_vm0, %v701_v42 }
  0x41   : > { %6682 = vmatmul.mubr.msk.f32.gmra.mrb[20].mxu1 %vm387_vm0, %v702_v43 }
  0x42   : > { %6684 = vmatprep.mubr.msk.f32.mxu1 %vm387_vm0, %v703_v44 }
  0x45   : > { %6685 = vmatmul.mubr.msk.f32.gmra.mrb[22].mxu1 %vm387_vm0, %v704_v45 }
  0x46   : > { %6687 = vmatprep.mubr.msk.f32.mxu1 %vm387_vm0, %v705_v46 }
  0x49   : > { %6688 = vmatmul.mubr.msk.f32.gmra.mrb[24].mxu1 %vm387_vm0, %v706_v47 }
  0x4a   : > { %6690 = vmatprep.mubr.msk.f32.mxu1 %vm387_vm0, %v707_v48 }
  0x4d   : > { %6691 = vmatmul.mubr.msk.f32.gmra.mrb[26].mxu1 %vm387_vm0, %v708_v49 }
  0x4e   : > { %6693 = vmatprep.mubr.msk.f32.mxu1 %vm387_vm0, %v709_v50 }
  0x51   : > { %6694 = vmatmul.mubr.msk.f32.gmra.mrb[28].mxu1 %vm387_vm0, %v710_v51 }
  0x52   : > { %6696 = vmatprep.mubr.msk.f32.mxu1 %vm387_vm0, %v711_v52 }
  0x55   : > { %6697 = vmatmul.mubr.msk.f32.gmra.mrb[30].mxu1 %vm387_vm0, %v712_v53  ;;  %v1888_v53 = vlaneseq }
  0x56   : > { %6699 = vmatprep.mubr.msk.f32.mxu1 %vm387_vm0, %v713_v54 }
  0x59   : > { %6700 = vmatmul.mubr.msk.f32.gmra.mrb[32].mxu1 %vm387_vm0, %v714_v55 }
  0x5a   : > { %6702 = vmatprep.mubr.msk.f32.mxu1 %vm387_vm0, %v715_v56 }
  0x5d   : > { %6703 = vmatmul.mubr.msk.f32.gmra.mrb[34].mxu1 %vm387_vm0, %v716_v57 }
  0x5e   : > { %6705 = vmatprep.mubr.msk.f32.mxu1 %vm387_vm0, %v717_v58 }
  0x61   : > { %6706 = vmatmul.mubr.msk.f32.gmra.mrb[36].mxu1 %vm387_vm0, %v718_v59 }
  0x62   : > { %6708 = vmatprep.mubr.msk.f32.mxu1 %vm387_vm0, %v719_v60 }
  0x65   : > { %6709 = vmatmul.mubr.msk.f32.gmra.mrb[38].mxu1 %vm387_vm0, %v720_v61 }
  0x66   : > { %6711 = vmatprep.mubr.msk.f32.mxu1 %vm387_vm0, %v721_v62 }
  0x69   : > { %6712 = vmatmul.mubr.msk.f32.gmra.mrb[40].mxu1 %vm387_vm0, %v722_v63 }
  0x6a   : > { %6714 = vmatprep.mubr.msk.f32.mxu1 %vm387_vm0, %v723_v0 }
  0x6d   : > { %6715 = vmatmul.mubr.msk.f32.gmra.mrb[42].mxu1 %vm387_vm0, %v724_v1  ;;  %v8372_v1 = vld [vmem:[%s10756_s4 + $0x1] ss:$0 sm:$0xff] }
  0x6e   : > { %6717 = vmatprep.mubr.msk.f32.mxu1 %vm387_vm0, %v725_v2 }
  0x71   : > { %6718 = vmatmul.mubr.msk.f32.gmra.mrb[44].mxu1 %vm387_vm0, %v726_v3  ;;  %v8377_v3 = vand.u32 127, %v1888_v53 }
  0x72   : > { %6720 = vmatprep.mubr.msk.f32.mxu1 %vm387_vm0, %v727_v4 }
  0x73   : > { %vm1891_vm1 = vcmp.lt.s32.totalorder %v8377_v3, 8  ;;  %vm1895_vm3 = vcmp.ge.s32.totalorder %v8377_v3, 8  ;;  %vm1896_vm4 = vcmp.lt.s32.totalorder %v8377_v3, 16  ;;  %vm1900_vm6 = vcmp.ge.s32.totalorder %v8377_v3, 16 }
  0x74   : > { %vm1897_vm5 = vmand %vm1895_vm3, %vm1896_vm4  ;;  %vm1901_vm7 = vcmp.lt.s32.totalorder %v8377_v3, 24  ;;  %vm1905_vm10 = vcmp.ge.s32.totalorder %v8377_v3, 24  ;;  %vm1906_vm11 = vcmp.lt.s32.totalorder %v8377_v3, 32 }
  0x75   : > { %6721 = vmatmul.mubr.msk.f32.gmra.mrb[46].mxu1 %vm387_vm0, %v728_v5  ;;  %vm1902_vm8 = vmand %vm1900_vm6, %vm1901_vm7 }
  0x76   : > { %6723 = vmatprep.mubr.msk.f32.mxu1 %vm387_vm0, %v729_v6  ;;  %vm1907_vm12 = vmand %vm1905_vm10, %vm1906_vm11 }
  0x79   : > { %6724 = vmatmul.mubr.msk.f32.gmra.mrb[48].mxu1 %vm387_vm0, %v730_v7 }
  0x7a   : > { %6726 = vmatprep.mubr.msk.f32.mxu1 %vm387_vm0, %v731_v8 }
  0x7d   : > { %6727 = vmatmul.mubr.msk.f32.gmra.mrb[50].mxu1 %vm387_vm0, %v732_v9 }
  0x7e   : > { %6729 = vmatprep.mubr.msk.f32.mxu1 %vm387_vm0, %v733_v10 }
  0x81   : > { %6730 = vmatmul.mubr.msk.f32.gmra.mrb[52].mxu1 %vm387_vm0, %v734_v11 }
  0x82   : > { %6732 = vmatprep.mubr.msk.f32.mxu1 %vm387_vm0, %v735_v12 }
  0x85   : > { %6733 = vmatmul.mubr.msk.f32.gmra.mrb[54].mxu1 %vm387_vm0, %v736_v13 }
  0x86   : > { %6735 = vmatprep.mubr.msk.f32.mxu1 %vm387_vm0, %v737_v14 }
  0x89   : > { %6736 = vmatmul.mubr.msk.f32.gmra.mrb[56].mxu1 %vm387_vm0, %v738_v15 }
  0x8a   : > { %6738 = vmatprep.mubr.msk.f32.mxu1 %vm387_vm0, %v739_v16 }
  0x8d   : > { %6739 = vmatmul.mubr.msk.f32.gmra.mrb[58].mxu1 %vm387_vm0, %v740_v17 }
  0xec   : > { %v6645_v21 = vpop.f32.mrb[0].mxu1  ;;  %v6627_v46 = vpop.f32.mrb[0].mxu0 }
  0xed   : > { %v592_v22 = vadd.f32 %v6645_v21, %v8341_v20  ;;  %v586_v23 = vpop.f32.mrb[1].mxu1  ;;  %v532_v49 = vadd.f32 %v6627_v46, %v8341_v20  ;;  %v526_v50 = vpop.f32.mrb[1].mxu0 }
  0xee   : > { %v587_v24 = vadd.f32 %v8341_v20, %v586_v23  ;;  %v527_v52 = vadd.f32 %v8341_v20, %v526_v50 }
  0xef   : > { %v658_v25 = vmax.f32 %v592_v22, 0.0  ;;  %v646_v55 = vmax.f32 %v532_v49, 0.0 }
  0xf0   : > { %v657_v26 = vmax.f32 %v587_v24, 0.0  ;;  %v6648_v27 = vpop.f32.mrb[2].mxu1  ;;  %v645_v58 = vmax.f32 %v527_v52, 0.0  ;;  %v6630_v59 = vpop.f32.mrb[2].mxu0 }
  0xf1   : > { %682 = vst.msk [vmem:[#allocation2 + $0x68] sm:$0xff] %vm387_vm0, %v658_v25  ;;  %v602_v28 = vadd.f32 %v6648_v27, %v8341_v20  ;;  %v596_v29 = vpop.f32.mrb[3].mxu1  ;;  %670 = vst.msk [vmem:[#allocation2 + $0x8] sm:$0xff] %vm387_vm0, %v646_v55  ;;  %v542_v62 = vadd.f32 %v6630_v59, %v8341_v20  ;;  %v536_v63 = vpop.f32.mrb[3].mxu0  ;;  %v8102_v27 = vmov 0.0  }
  0xf2   : > { %681 = vst.msk [vmem:[#allocation2 + $0x60] sm:$0xff] %vm387_vm0, %v657_v26  ;;  %v597_v30 = vadd.f32 %v8341_v20, %v596_v29  ;;  %669 = vst.msk [vmem:[#allocation2] sm:$0xff] %vm387_vm0, %v645_v58  ;;  %v537_v2 = vadd.f32 %v8341_v20, %v536_v63 }
  0xf3   : > { %v660_v31 = vmax.f32 %v602_v28, 0.0  ;;  %v648_v5 = vmax.f32 %v542_v62, 0.0  ;;  %v8393_v28 = vsel %vm1891_vm1, 1.0, %v8102_v27 }
  0xf4   : > { %v659_v32 = vmax.f32 %v597_v30, 0.0  ;;  %v6651_v33 = vpop.f32.mrb[4].mxu1  ;;  %v647_v8 = vmax.f32 %v537_v2, 0.0  ;;  %v6633_v9 = vpop.f32.mrb[4].mxu0  ;;  %10871 = vst [vmem:[#allocation6_spill] sm:$0xff] %v8393_v28 }
  0xf5   : > { %684 = vst.msk [vmem:[#allocation2 + $0x78] sm:$0xff] %vm387_vm0, %v660_v31  ;;  %v612_v34 = vadd.f32 %v6651_v33, %v8341_v20  ;;  %v606_v35 = vpop.f32.mrb[5].mxu1  ;;  %672 = vst.msk [vmem:[#allocation2 + $0x18] sm:$0xff] %vm387_vm0, %v648_v5  ;;  %v552_v12 = vadd.f32 %v6633_v9, %v8341_v20  ;;  %v546_v13 = vpop.f32.mrb[5].mxu0 }
  0xf6   : > { %683 = vst.msk [vmem:[#allocation2 + $0x70] sm:$0xff] %vm387_vm0, %v659_v32  ;;  %v607_v36 = vadd.f32 %v8341_v20, %v606_v35  ;;  %671 = vst.msk [vmem:[#allocation2 + $0x10] sm:$0xff] %vm387_vm0, %v647_v8  ;;  %v547_v15 = vadd.f32 %v8341_v20, %v546_v13 }
  0xf7   : > { %v662_v37 = vmax.f32 %v612_v34, 0.0  ;;  %v650_v17 = vmax.f32 %v552_v12, 0.0 }
  0xf8   : > { %v661_v38 = vmax.f32 %v607_v36, 0.0  ;;  %v6654_v39 = vpop.f32.mrb[6].mxu1  ;;  %v649_v21 = vmax.f32 %v547_v15, 0.0  ;;  %v6636_v22 = vpop.f32.mrb[6].mxu0 }
  0xf9   : > { %686 = vst.msk [vmem:[#allocation2 + $0x88] sm:$0xff] %vm387_vm0, %v662_v37  ;;  %v622_v40 = vadd.f32 %v6654_v39, %v8341_v20  ;;  %v616_v41 = vpop.f32.mrb[7].mxu1  ;;  %674 = vst.msk [vmem:[#allocation2 + $0x28] sm:$0xff] %vm387_vm0, %v650_v17  ;;  %v562_v25 = vadd.f32 %v6636_v22, %v8341_v20  ;;  %v556_v26 = vpop.f32.mrb[7].mxu0  ;;  %v8395_v29 = vld [vmem:[#allocation2] sm:$0xff] }
  0xfa   : > { %685 = vst.msk [vmem:[#allocation2 + $0x80] sm:$0xff] %vm387_vm0, %v661_v38  ;;  %v617_v42 = vadd.f32 %v8341_v20, %v616_v41  ;;  %673 = vst.msk [vmem:[#allocation2 + $0x20] sm:$0xff] %vm387_vm0, %v649_v21  ;;  %v557_v31 = vadd.f32 %v8341_v20, %v556_v26  ;;  %v2080_v32 = vmul.f32 %v8393_v28, %v8395_v29 }
  0xfb   : > { %v664_v43 = vmax.f32 %v622_v40, 0.0  ;;  %v652_v34 = vmax.f32 %v562_v25, 0.0 }
  0xfc   : > { %v663_v44 = vmax.f32 %v617_v42, 0.0  ;;  %v6657_v45 = vpop.f32.mrb[8].mxu1  ;;  %v651_v37 = vmax.f32 %v557_v31, 0.0  ;;  %6849 = vmatprep.mubr.msk.f32.mxu1 %vm387_vm0, %v2080_v32 }
  0xfd   : > { %688 = vst.msk [vmem:[#allocation2 + $0x98] sm:$0xff] %vm387_vm0, %v664_v43  ;;  %v632_v47 = vadd.f32 %v6657_v45, %v8341_v20  ;;  %v626_v48 = vpop.f32.mrb[9].mxu1  ;;  %676 = vst.msk [vmem:[#allocation2 + $0x38] sm:$0xff] %vm387_vm0, %v652_v34 }
  0xfe   : > { %687 = vst.msk [vmem:[#allocation2 + $0x90] sm:$0xff] %vm387_vm0, %v663_v44  ;;  %v627_v51 = vadd.f32 %v8341_v20, %v626_v48  ;;  %675 = vst.msk [vmem:[#allocation2 + $0x30] sm:$0xff] %vm387_vm0, %v651_v37 }
  0xff   : > { %v666_v54 = vmax.f32 %v632_v47, 0.0 }
 0x100   : > { %v665_v56 = vmax.f32 %v627_v51, 0.0  ;;  %v6660_v57 = vpop.f32.mrb[10].mxu1 }
 0x101   : > { %690 = vst.msk [vmem:[#allocation2 + $0xa8] sm:$0xff] %vm387_vm0, %v666_v54  ;;  %v642_v60 = vadd.f32 %v6660_v57, %v8341_v20  ;;  %v636_v61 = vpop.f32.mrb[11].mxu1 }
 0x102   : > { %689 = vst.msk [vmem:[#allocation2 + $0xa0] sm:$0xff] %vm387_vm0, %v665_v56  ;;  %v637_v0 = vadd.f32 %v8341_v20, %v636_v61 }
 0x103   : > { %v668_v4 = vmax.f32 %v642_v60, 0.0 }
 0x104   : > { %v667_v6 = vmax.f32 %v637_v0, 0.0  ;;  %v6671_v7 = vpop.f32.mrb[12].mxu1 }
 0x105   : > { %692 = vst.msk [vmem:[#allocation2 + $0xb8] sm:$0xff] %vm387_vm0, %v668_v4  ;;  %v961_v10 = vadd.f32 %v6671_v7, %v8372_v1  ;;  %v955_v11 = vpop.f32.mrb[13].mxu1 }
 0x106   : > { %691 = vst.msk [vmem:[#allocation2 + $0xb0] sm:$0xff] %vm387_vm0, %v667_v6  ;;  %v956_v14 = vadd.f32 %v8372_v1, %v955_v11 }
 0x107   : > { %v1195_v16 = vmax.f32 %v961_v10, 0.0 }
 0x108   : > { %v1194_v18 = vmax.f32 %v956_v14, 0.0  ;;  %v6674_v19 = vpop.f32.mrb[14].mxu1 }
 0x109   : > { %1243 = vst.msk [vmem:[#allocation3 + $0x8] sm:$0xff] %vm387_vm0, %v1195_v16  ;;  %v971_v23 = vadd.f32 %v6674_v19, %v8372_v1  ;;  %v965_v24 = vpop.f32.mrb[15].mxu1  ;;  %v6639_v16 = vpop.f32.mrb[8].mxu0 }
 0x10a   : > { %1242 = vst.msk [vmem:[#allocation3] sm:$0xff] %vm387_vm0, %v1194_v18  ;;  %v966_v30 = vadd.f32 %v8372_v1, %v965_v24  ;;  %v572_v18 = vadd.f32 %v6639_v16, %v8341_v20  ;;  %v566_v19 = vpop.f32.mrb[9].mxu0 }
 0x10b   : > { %v1197_v33 = vmax.f32 %v971_v23, 0.0  ;;  %v567_v22 = vadd.f32 %v8341_v20, %v566_v19 }
 0x10c   : > { %v1196_v35 = vmax.f32 %v966_v30, 0.0  ;;  %v6677_v36 = vpop.f32.mrb[16].mxu1  ;;  %v654_v25 = vmax.f32 %v572_v18, 0.0 }
 0x10d   : > { %1245 = vst.msk [vmem:[#allocation3 + $0x18] sm:$0xff] %vm387_vm0, %v1197_v33  ;;  %v981_v38 = vadd.f32 %v6677_v36, %v8372_v1  ;;  %v975_v39 = vpop.f32.mrb[17].mxu1  ;;  %v653_v31 = vmax.f32 %v567_v22, 0.0 }
 0x10e   : > { %1244 = vst.msk [vmem:[#allocation3 + $0x10] sm:$0xff] %vm387_vm0, %v1196_v35  ;;  %v976_v40 = vadd.f32 %v8372_v1, %v975_v39  ;;  %678 = vst.msk [vmem:[#allocation2 + $0x48] sm:$0xff] %vm387_vm0, %v654_v25 }
 0x10f   : > { %v1199_v41 = vmax.f32 %v981_v38, 0.0  ;;  %677 = vst.msk [vmem:[#allocation2 + $0x40] sm:$0xff] %vm387_vm0, %v653_v31 }
 0x110   : > { %v1198_v42 = vmax.f32 %v976_v40, 0.0  ;;  %v6680_v43 = vpop.f32.mrb[18].mxu1  ;;  %v2049_v44 = vld [vmem:[#allocation3 + $0x8] sm:$0xff] }
 0x111   : > { %1247 = vst.msk [vmem:[#allocation3 + $0x28] sm:$0xff] %vm387_vm0, %v1199_v41  ;;  %v991_v45 = vadd.f32 %v6680_v43, %v8372_v1  ;;  %v985_v46 = vpop.f32.mrb[19].mxu1  ;;  %v2048_v47 = vld [vmem:[#allocation3] sm:$0xff] }
 0x112   : > { %1246 = vst.msk [vmem:[#allocation3 + $0x20] sm:$0xff] %vm387_vm0, %v1198_v42  ;;  %v986_v49 = vadd.f32 %v8372_v1, %v985_v46  ;;  %v7405_v50 = vpack.c.bf16 %v2049_v44, %v2048_v47 }
 0x113   : > { %v1201_v51 = vmax.f32 %v991_v45, 0.0 }
 0x114   : > { %v1200_v52 = vmax.f32 %v986_v49, 0.0  ;;  %v6683_v54 = vpop.f32.mrb[20].mxu1  ;;  %7407 = vmatprep.subr.msk.bf16.mxu1 %vm8414_vm2, %v7405_v50 }
 0x115   : > { %1249 = vst.msk [vmem:[#allocation3 + $0x38] sm:$0xff] %vm387_vm0, %v1201_v51  ;;  %v1001_v55 = vadd.f32 %v6683_v54, %v8372_v1  ;;  %v995_v56 = vpop.f32.mrb[21].mxu1  ;;  %7410 = vmatpush3.bf16.xpose.msk.msra.mxu1 %vm8414_vm2, %v7405_v50 }
 0x116   : > { %1248 = vst.msk [vmem:[#allocation3 + $0x30] sm:$0xff] %vm387_vm0, %v1200_v52  ;;  %v996_v57 = vadd.f32 %v8372_v1, %v995_v56 }
 0x117   : > { %v1203_v58 = vmax.f32 %v1001_v55, 0.0 }
 0x118   : > { %v1202_v59 = vmax.f32 %v996_v57, 0.0  ;;  %v6686_v60 = vpop.f32.mrb[22].mxu1 }
 0x119   : > { %1251 = vst.msk [vmem:[#allocation3 + $0x48] sm:$0xff] %vm387_vm0, %v1203_v58  ;;  %v1011_v61 = vadd.f32 %v6686_v60, %v8372_v1  ;;  %v1005_v62 = vpop.f32.mrb[23].mxu1 }
 0x11a   : > { %1250 = vst.msk [vmem:[#allocation3 + $0x40] sm:$0xff] %vm387_vm0, %v1202_v59  ;;  %v1006_v63 = vadd.f32 %v8372_v1, %v1005_v62 }
 0x11b   : > { %v1205_v0 = vmax.f32 %v1011_v61, 0.0 }
 0x11c   : > { %v1204_v2 = vmax.f32 %v1006_v63, 0.0  ;;  %v6689_v4 = vpop.f32.mrb[24].mxu1  ;;  %v2051_v5 = vld [vmem:[#allocation3 + $0x38] sm:$0xff] }
 0x11d   : > { %1253 = vst.msk [vmem:[#allocation3 + $0x58] sm:$0xff] %vm387_vm0, %v1205_v0  ;;  %v1021_v6 = vadd.f32 %v6689_v4, %v8372_v1  ;;  %v1015_v7 = vpop.f32.mrb[25].mxu1  ;;  %v2050_v8 = vld [vmem:[#allocation3 + $0x30] sm:$0xff] }
 0x11e   : > { %1252 = vst.msk [vmem:[#allocation3 + $0x50] sm:$0xff] %vm387_vm0, %v1204_v2  ;;  %v1016_v9 = vadd.f32 %v8372_v1, %v1015_v7  ;;  %v7411_v10 = vpack.c.bf16 %v2051_v5, %v2050_v8 }
 0x11f   : > { %v1207_v11 = vmax.f32 %v1021_v6, 0.0 }
 0x120   : > { %v1206_v12 = vmax.f32 %v1016_v9, 0.0  ;;  %v6692_v13 = vpop.f32.mrb[26].mxu1  ;;  %7413 = vmatprep.subr.msk.bf16.mxu1 %vm8414_vm2, %v7411_v10 }
 0x121   : > { %1255 = vst.msk [vmem:[#allocation3 + $0x68] sm:$0xff] %vm387_vm0, %v1207_v11  ;;  %v1031_v14 = vadd.f32 %v6692_v13, %v8372_v1  ;;  %v1025_v15 = vpop.f32.mrb[27].mxu1  ;;  %7416 = vmatpush3.bf16.xpose.msk.msra.mxu1 %vm8414_vm2, %v7411_v10 }
 0x122   : > { %1254 = vst.msk [vmem:[#allocation3 + $0x60] sm:$0xff] %vm387_vm0, %v1206_v12  ;;  %v1026_v17 = vadd.f32 %v8372_v1, %v1025_v15 }
 0x123   : > { %v1209_v21 = vmax.f32 %v1031_v14, 0.0 }
 0x124   : > { %v1208_v23 = vmax.f32 %v1026_v17, 0.0  ;;  %v6695_v24 = vpop.f32.mrb[28].mxu1 }
 0x125   : > { %1257 = vst.msk [vmem:[#allocation3 + $0x78] sm:$0xff] %vm387_vm0, %v1209_v21  ;;  %v1041_v26 = vadd.f32 %v6695_v24, %v8372_v1  ;;  %v1035_v30 = vpop.f32.mrb[29].mxu1 }
 0x126   : > { %1256 = vst.msk [vmem:[#allocation3 + $0x70] sm:$0xff] %vm387_vm0, %v1208_v23  ;;  %v1036_v32 = vadd.f32 %v8372_v1, %v1035_v30 }
 0x127   : > { %v1211_v33 = vmax.f32 %v1041_v26, 0.0 }
 0x128   : > { %v1210_v34 = vmax.f32 %v1036_v32, 0.0  ;;  %v6698_v35 = vpop.f32.mrb[30].mxu1  ;;  %v2053_v36 = vld [vmem:[#allocation3 + $0x68] sm:$0xff] }
 0x129   : > { %1259 = vst.msk [vmem:[#allocation3 + $0x88] sm:$0xff] %vm387_vm0, %v1211_v33  ;;  %v1051_v37 = vadd.f32 %v6698_v35, %v8372_v1  ;;  %v1045_v38 = vpop.f32.mrb[31].mxu1  ;;  %v2052_v39 = vld [vmem:[#allocation3 + $0x60] sm:$0xff] }
 0x12a   : > { %1258 = vst.msk [vmem:[#allocation3 + $0x80] sm:$0xff] %vm387_vm0, %v1210_v34  ;;  %v1046_v40 = vadd.f32 %v8372_v1, %v1045_v38  ;;  %v7417_v41 = vpack.c.bf16 %v2053_v36, %v2052_v39 }
 0x12b   : > { %v1213_v42 = vmax.f32 %v1051_v37, 0.0 }
 0x12c   : > { %v1212_v43 = vmax.f32 %v1046_v40, 0.0  ;;  %v6701_v44 = vpop.f32.mrb[32].mxu1  ;;  %7419 = vmatprep.subr.msk.bf16.mxu1 %vm8414_vm2, %v7417_v41 }
 0x12d   : > { %1261 = vst.msk [vmem:[#allocation3 + $0x98] sm:$0xff] %vm387_vm0, %v1213_v42  ;;  %v1061_v45 = vadd.f32 %v6701_v44, %v8372_v1  ;;  %v1055_v46 = vpop.f32.mrb[33].mxu1  ;;  %7422 = vmatpush3.bf16.xpose.msk.msra.mxu1 %vm8414_vm2, %v7417_v41 }
 0x12e   : > { %1260 = vst.msk [vmem:[#allocation3 + $0x90] sm:$0xff] %vm387_vm0, %v1212_v43  ;;  %v1056_v47 = vadd.f32 %v8372_v1, %v1055_v46 }
 0x12f   : > { %v1215_v49 = vmax.f32 %v1061_v45, 0.0 }
 0x130   : > { %v1214_v50 = vmax.f32 %v1056_v47, 0.0  ;;  %v6704_v51 = vpop.f32.mrb[34].mxu1 }
 0x131   : > { %1263 = vst.msk [vmem:[#allocation3 + $0xa8] sm:$0xff] %vm387_vm0, %v1215_v49  ;;  %v1071_v52 = vadd.f32 %v6704_v51, %v8372_v1  ;;  %v1065_v54 = vpop.f32.mrb[35].mxu1 }
 0x132   : > { %1262 = vst.msk [vmem:[#allocation3 + $0xa0] sm:$0xff] %vm387_vm0, %v1214_v50  ;;  %v1066_v55 = vadd.f32 %v8372_v1, %v1065_v54 }
 0x133   : > { %v1217_v56 = vmax.f32 %v1071_v52, 0.0 }
 0x134   : > { %v1216_v57 = vmax.f32 %v1066_v55, 0.0  ;;  %v6707_v58 = vpop.f32.mrb[36].mxu1  ;;  %v2055_v59 = vld [vmem:[#allocation3 + $0x98] sm:$0xff] }
 0x135   : > { %1265 = vst.msk [vmem:[#allocation3 + $0xb8] sm:$0xff] %vm387_vm0, %v1217_v56  ;;  %v1081_v60 = vadd.f32 %v6707_v58, %v8372_v1  ;;  %v1075_v61 = vpop.f32.mrb[37].mxu1  ;;  %v2054_v62 = vld [vmem:[#allocation3 + $0x90] sm:$0xff] }
 0x136   : > { %1264 = vst.msk [vmem:[#allocation3 + $0xb0] sm:$0xff] %vm387_vm0, %v1216_v57  ;;  %v1076_v63 = vadd.f32 %v8372_v1, %v1075_v61  ;;  %v7423_v0 = vpack.c.bf16 %v2055_v59, %v2054_v62 }
 0x137   : > { %v1219_v2 = vmax.f32 %v1081_v60, 0.0 }
 0x138   : > { %v1218_v4 = vmax.f32 %v1076_v63, 0.0  ;;  %v6710_v5 = vpop.f32.mrb[38].mxu1  ;;  %7425 = vmatprep.subr.msk.bf16.mxu1 %vm8414_vm2, %v7423_v0 }
 0x139   : > { %1267 = vst.msk [vmem:[#allocation3 + $0xc8] sm:$0xff] %vm387_vm0, %v1219_v2  ;;  %v1091_v6 = vadd.f32 %v6710_v5, %v8372_v1  ;;  %v1085_v7 = vpop.f32.mrb[39].mxu1  ;;  %7428 = vmatpush3.bf16.xpose.msk.msra.mxu1 %vm8414_vm2, %v7423_v0 }
 0x13a   : > { %1266 = vst.msk [vmem:[#allocation3 + $0xc0] sm:$0xff] %vm387_vm0, %v1218_v4  ;;  %v1086_v8 = vadd.f32 %v8372_v1, %v1085_v7 }
 0x13b   : > { %v1221_v9 = vmax.f32 %v1091_v6, 0.0 }
 0x13c   : > { %v1220_v10 = vmax.f32 %v1086_v8, 0.0  ;;  %v6713_v11 = vpop.f32.mrb[40].mxu1 }
 0x13d   : > { %1269 = vst.msk [vmem:[#allocation3 + $0xd8] sm:$0xff] %vm387_vm0, %v1221_v9  ;;  %v1101_v12 = vadd.f32 %v6713_v11, %v8372_v1  ;;  %v1095_v13 = vpop.f32.mrb[41].mxu1 }
 0x13e   : > { %1268 = vst.msk [vmem:[#allocation3 + $0xd0] sm:$0xff] %vm387_vm0, %v1220_v10  ;;  %v1096_v14 = vadd.f32 %v8372_v1, %v1095_v13 }
 0x13f   : > { %v1223_v15 = vmax.f32 %v1101_v12, 0.0 }
 0x140   : > { %v1222_v16 = vmax.f32 %v1096_v14, 0.0  ;;  %v6716_v17 = vpop.f32.mrb[42].mxu1  ;;  %v2057_v18 = vld [vmem:[#allocation3 + $0xc8] sm:$0xff] }
 0x141   : > { %1271 = vst.msk [vmem:[#allocation3 + $0xe8] sm:$0xff] %vm387_vm0, %v1223_v15  ;;  %v1111_v19 = vadd.f32 %v6716_v17, %v8372_v1  ;;  %v1105_v21 = vpop.f32.mrb[43].mxu1  ;;  %v2056_v22 = vld [vmem:[#allocation3 + $0xc0] sm:$0xff] }
 0x142   : > { %1270 = vst.msk [vmem:[#allocation3 + $0xe0] sm:$0xff] %vm387_vm0, %v1222_v16  ;;  %v1106_v23 = vadd.f32 %v8372_v1, %v1105_v21  ;;  %v7429_v24 = vpack.c.bf16 %v2057_v18, %v2056_v22 }
 0x143   : > { %v1225_v25 = vmax.f32 %v1111_v19, 0.0 }
 0x144   : > { %v1224_v26 = vmax.f32 %v1106_v23, 0.0  ;;  %v6719_v30 = vpop.f32.mrb[44].mxu1  ;;  %7431 = vmatprep.subr.msk.bf16.mxu1 %vm8414_vm2, %v7429_v24 }
 0x145   : > { %1273 = vst.msk [vmem:[#allocation3 + $0xf8] sm:$0xff] %vm387_vm0, %v1225_v25  ;;  %v1121_v31 = vadd.f32 %v6719_v30, %v8372_v1  ;;  %v1115_v32 = vpop.f32.mrb[45].mxu1  ;;  %7434 = vmatpush3.bf16.xpose.msk.msra.mxu1 %vm8414_vm2, %v7429_v24  ;;  %v6642_v24 = vpop.f32.mrb[10].mxu0 }
 0x146   : > { %1272 = vst.msk [vmem:[#allocation3 + $0xf0] sm:$0xff] %vm387_vm0, %v1224_v26  ;;  %v1116_v33 = vadd.f32 %v8372_v1, %v1115_v32  ;;  %v582_v30 = vadd.f32 %v6642_v24, %v8341_v20  ;;  %v1290_v24 = vld [vmem:[%s8643_s11] sm:$0xff] }
 0x147   : > { %v1227_v34 = vmax.f32 %v1121_v31, 0.0  ;;  %v576_v31 = vpop.f32.mrb[11].mxu0  ;;  %6745 = vmatprep.mubr.msk.f32.mxu0 %vm1342_vm9, %v1290_v24  ;;  %v4089_v24 = vld [vmem:[#allocation3 + $0x88] sm:$0xff] }
 0x148   : > { %v1226_v35 = vmax.f32 %v1116_v33, 0.0  ;;  %v6722_v36 = vpop.f32.mrb[46].mxu1  ;;  %v3066_v33 = vld [vmem:[#allocation3 + $0x10] sm:$0xff] }
 0x149   : > { %1275 = vst.msk [vmem:[#allocation3 + $0x108] sm:$0xff] %vm387_vm0, %v1227_v34  ;;  %v1131_v37 = vadd.f32 %v6722_v36, %v8372_v1  ;;  %v1125_v38 = vpop.f32.mrb[47].mxu1  ;;  %v3067_v34 = vld [vmem:[#allocation3 + $0x18] sm:$0xff] }
 0x14a   : > { %1274 = vst.msk [vmem:[#allocation3 + $0x100] sm:$0xff] %vm387_vm0, %v1226_v35  ;;  %v1126_v39 = vadd.f32 %v8372_v1, %v1125_v38  ;;  %v577_v35 = vadd.f32 %v8341_v20, %v576_v31  ;;  %v8544_v20 = vld [vmem:[#allocation2 + $0x30] sm:$0xff] }
 0x14b   : > { %v1229_v40 = vmax.f32 %v1131_v37, 0.0  ;;  %v656_v37 = vmax.f32 %v582_v30, 0.0 }
 0x14c   : > { %v1228_v41 = vmax.f32 %v1126_v39, 0.0  ;;  %v6725_v42 = vpop.f32.mrb[48].mxu1  ;;  %v2059_v43 = vld [vmem:[#allocation3 + $0xf8] sm:$0xff]  ;;  %v655_v38 = vmax.f32 %v577_v35, 0.0  ;;  %v8546_v39 = vld [vmem:[#allocation2 + $0x8] sm:$0xff] }
 0x14d   : > { %1277 = vst.msk [vmem:[#allocation3 + $0x118] sm:$0xff] %vm387_vm0, %v1229_v40  ;;  %v1141_v44 = vadd.f32 %v6725_v42, %v8372_v1  ;;  %v1135_v45 = vpop.f32.mrb[49].mxu1  ;;  %v2058_v46 = vld [vmem:[#allocation3 + $0xf0] sm:$0xff]  ;;  %680 = vst.msk [vmem:[#allocation2 + $0x58] sm:$0xff] %vm387_vm0, %v656_v37  ;;  %v3068_v40 = vld [vmem:[#allocation3 + $0x40] sm:$0xff]  ;;  %v2082_v42 = vmul.f32 %v8393_v28, %v8544_v20 }
 0x14e   : > { %1276 = vst.msk [vmem:[#allocation3 + $0x110] sm:$0xff] %vm387_vm0, %v1228_v41  ;;  %v1136_v47 = vadd.f32 %v8372_v1, %v1135_v45  ;;  %v7435_v49 = vpack.c.bf16 %v2059_v43, %v2058_v46  ;;  %679 = vst.msk [vmem:[#allocation2 + $0x50] sm:$0xff] %vm387_vm0, %v655_v38  ;;  %v3069_v41 = vld [vmem:[#allocation3 + $0x48] sm:$0xff]  ;;  %v2081_v43 = vmul.f32 %v8393_v28, %v8546_v39  ;;  %v8555_v46 = vld [vmem:[#allocation2 + $0x60] sm:$0xff] }
 0x14f   : > { %v1231_v50 = vmax.f32 %v1141_v44, 0.0  ;;  %v8552_v44 = vld [vmem:[#allocation2 + $0x38] sm:$0xff]  ;;  %v7491_v45 = vpack.c.bf16 %v3069_v41, %v3068_v40  ;;  %v1294_v38 = vld [vmem:[%s8643_s11 + $0x20] sm:$0xff]  ;;  %v8684_v40 = vsel %vm1907_vm12, 1.0, %v8102_v27 }
 0x150   : > { %v1230_v51 = vmax.f32 %v1136_v47, 0.0  ;;  %v6728_v52 = vpop.f32.mrb[50].mxu1  ;;  %7437 = vmatprep.subr.msk.bf16.mxu1 %vm8414_vm2, %v7435_v49  ;;  %v2083_v47 = vmul.f32 %v8393_v28, %v8552_v44  ;;  %10876 = vst [vmem:[#allocation9_spill] sm:$0xff] %v8684_v40  ;;  %v2104_v41 = vmul.f32 %v8684_v40, %v8395_v29 }
 0x151   : > { %1279 = vst.msk [vmem:[#allocation3 + $0x128] sm:$0xff] %vm387_vm0, %v1231_v50  ;;  %v1151_v54 = vadd.f32 %v6728_v52, %v8372_v1  ;;  %v1145_v55 = vpop.f32.mrb[51].mxu1  ;;  %7440 = vmatpush3.bf16.xpose.msk.msra.mxu1 %vm8414_vm2, %v7435_v49  ;;  %v2084_v49 = vmul.f32 %v8393_v28, %v8555_v46  ;;  %v8566_v50 = vld [vmem:[#allocation2 + $0x68] sm:$0xff]  ;;  %v3070_v52 = vld [vmem:[#allocation3 + $0x70] sm:$0xff] }
 0x152   : > { %1278 = vst.msk [vmem:[#allocation3 + $0x120] sm:$0xff] %vm387_vm0, %v1230_v51  ;;  %v1146_v56 = vadd.f32 %v8372_v1, %v1145_v55  ;;  %v8569_v51 = vld [vmem:[#allocation2 + $0x90] sm:$0xff]  ;;  %v2085_v55 = vmul.f32 %v8393_v28, %v8566_v50 }
 0x153   : > { %v1233_v57 = vmax.f32 %v1151_v54, 0.0  ;;  %v3071_v54 = vld [vmem:[#allocation3 + $0x78] sm:$0xff] }
 0x154   : > { %v1232_v58 = vmax.f32 %v1146_v56, 0.0  ;;  %v6731_v59 = vpop.f32.mrb[52].mxu1  ;;  %v2086_v56 = vmul.f32 %v8393_v28, %v8569_v51 }
 0x155   : > { %1281 = vst.msk [vmem:[#allocation3 + $0x138] sm:$0xff] %vm387_vm0, %v1233_v57  ;;  %v1161_v60 = vadd.f32 %v6731_v59, %v8372_v1  ;;  %v1155_v61 = vpop.f32.mrb[53].mxu1  ;;  %v8578_v57 = vld [vmem:[#allocation2 + $0x98] sm:$0xff] }
 0x156   : > { %1280 = vst.msk [vmem:[#allocation3 + $0x130] sm:$0xff] %vm387_vm0, %v1232_v58  ;;  %v1156_v62 = vadd.f32 %v8372_v1, %v1155_v61  ;;  %v7497_v58 = vpack.c.bf16 %v3071_v54, %v3070_v52  ;;  %v2087_v59 = vmul.f32 %v8393_v28, %v8578_v57  ;;  %v1297_v52 = vld [vmem:[%s8643_s11 + $0x38] sm:$0xff]  ;;  %v1298_v54 = vld [vmem:[%s8643_s11 + $0x40] sm:$0xff] }
 0x157   : > { %v1235_v63 = vmax.f32 %v1161_v60, 0.0  ;;  %v8589_v60 = vsel %vm1897_vm5, 1.0, %v8102_v27 }
 0x158   : > { %v1234_v0 = vmax.f32 %v1156_v62, 0.0  ;;  %v6734_v2 = vpop.f32.mrb[54].mxu1  ;;  %v2061_v4 = vld [vmem:[#allocation3 + $0x128] sm:$0xff]  ;;  %10874 = vst [vmem:[#allocation7_spill] sm:$0xff] %v8589_v60  ;;  %v2088_v61 = vmul.f32 %v8589_v60, %v8395_v29  ;;  %v3072_v62 = vld [vmem:[#allocation3 + $0xa0] sm:$0xff] }
 0x159   : > { %1283 = vst.msk [vmem:[#allocation3 + $0x148] sm:$0xff] %vm387_vm0, %v1235_v63  ;;  %v1171_v5 = vadd.f32 %v6734_v2, %v8372_v1  ;;  %v1165_v6 = vpop.f32.mrb[55].mxu1  ;;  %v2060_v7 = vld [vmem:[#allocation3 + $0x120] sm:$0xff]  ;;  %v3073_v63 = vld [vmem:[#allocation3 + $0xa8] sm:$0xff]  ;;  %v2090_v2 = vmul.f32 %v8589_v60, %v8544_v20 }
 0x15a   : > { %1282 = vst.msk [vmem:[#allocation3 + $0x140] sm:$0xff] %vm387_vm0, %v1234_v0  ;;  %v1166_v8 = vadd.f32 %v8372_v1, %v1165_v6  ;;  %v7441_v9 = vpack.c.bf16 %v2061_v4, %v2060_v7  ;;  %v2089_v0 = vmul.f32 %v8589_v60, %v8546_v39  ;;  %v7503_v4 = vpack.c.bf16 %v3073_v63, %v3072_v62  ;;  %v3074_v7 = vld [vmem:[#allocation3 + $0xd0] sm:$0xff] }
 0x15b   : > { %v1237_v10 = vmax.f32 %v1171_v5, 0.0  ;;  %v2091_v5 = vmul.f32 %v8589_v60, %v8552_v44  ;;  %v2092_v6 = vmul.f32 %v8589_v60, %v8555_v46  ;;  %v8726_v63 = vld [vmem:[#allocation2 + $0x10] sm:$0xff] }
 0x15c   : > { %v1236_v11 = vmax.f32 %v1166_v8, 0.0  ;;  %7443 = vmatprep.subr.msk.bf16.mxu1 %vm8414_vm2, %v7441_v9  ;;  %v6737_v12 = vpop.f32.mrb[56].mxu1  ;;  %v3075_v8 = vld [vmem:[#allocation3 + $0xd8] sm:$0xff] }
 0x15d   : > { %1285 = vst.msk [vmem:[#allocation3 + $0x158] sm:$0xff] %vm387_vm0, %v1237_v10  ;;  %7446 = vmatpush3.bf16.xpose.msk.msra.mxu1 %vm8414_vm2, %v7441_v9  ;;  %v1181_v13 = vadd.f32 %v6737_v12, %v8372_v1  ;;  %v1175_v14 = vpop.f32.mrb[57].mxu1  ;;  %v2093_v9 = vmul.f32 %v8589_v60, %v8566_v50  ;;  %v2094_v10 = vmul.f32 %v8589_v60, %v8569_v51  ;;  %v3078_v31 = vld [vmem:[#allocation3 + $0x130] sm:$0xff] }
 0x15e   : > { %1284 = vst.msk [vmem:[#allocation3 + $0x150] sm:$0xff] %vm387_vm0, %v1236_v11  ;;  %v1176_v15 = vadd.f32 %v8372_v1, %v1175_v14  ;;  %v7509_v11 = vpack.c.bf16 %v3075_v8, %v3074_v7  ;;  %v2095_v12 = vmul.f32 %v8589_v60, %v8578_v57  ;;  %v4087_v7 = vld [vmem:[#allocation3 + $0x58] sm:$0xff] }
 0x15f   : > { %v1239_v16 = vmax.f32 %v1181_v13, 0.0  ;;  %v8626_v13 = vsel %vm1902_vm8, 1.0, %v8102_v27  ;;  %v2105_v27 = vmul.f32 %v8684_v40, %v8546_v39 }
 0x160   : > { %v1238_v17 = vmax.f32 %v1176_v15, 0.0  ;;  %v6740_v18 = vpop.f32.mrb[58].mxu1  ;;  %10875 = vst [vmem:[#allocation8_spill] sm:$0xff] %v8626_v13  ;;  %v2096_v14 = vmul.f32 %v8626_v13, %v8395_v29  ;;  %v3077_v15 = vld [vmem:[#allocation3 + $0x108] sm:$0xff]  ;;  %v2100_v30 = vmul.f32 %v8626_v13, %v8555_v46  ;;  %v2102_v35 = vmul.f32 %v8626_v13, %v8569_v51 }
 0x161   : > { %1287 = vst.msk [vmem:[#allocation3 + $0x168] sm:$0xff] %vm387_vm0, %v1239_v16  ;;  %v1191_v19 = vadd.f32 %v6740_v18, %v8372_v1  ;;  %v1185_v21 = vpop.f32.mrb[59].mxu1  ;;  %v3076_v16 = vld [vmem:[#allocation3 + $0x100] sm:$0xff]  ;;  %v345_v18 = vld [vmem:[%s10755_s3 + $0x48] sm:$0xff]  ;;  %v2106_v29 = vmul.f32 %v8684_v40, %v8544_v20 }
 0x162   : > { %1286 = vst.msk [vmem:[#allocation3 + $0x160] sm:$0xff] %vm387_vm0, %v1238_v17  ;;  %v1186_v22 = vadd.f32 %v8372_v1, %v1185_v21  ;;  %v7485_v1 = vpack.c.bf16 %v3067_v34, %v3066_v33  ;;  %v344_v17 = vld [vmem:[%s10755_s3 + $0x40] sm:$0xff]  ;;  %v1292_v33 = vld [vmem:[%s8643_s11 + $0x10] sm:$0xff]  ;;  %v2101_v34 = vmul.f32 %v8626_v13, %v8566_v50 }
 0x163   : > { %v1241_v23 = vmax.f32 %v1191_v19, 0.0  ;;  %v2097_v19 = vmul.f32 %v8626_v13, %v8546_v39  ;;  %v7401_v21 = vpack.c.bf16 %v345_v18, %v344_v17  ;;  %v2107_v39 = vmul.f32 %v8684_v40, %v8552_v44  ;;  %v8771_v18 = vld [vmem:[#allocation2 + $0x78] sm:$0xff] }
 0x164   : > { %v2063_v25 = vld [vmem:[#allocation3 + $0x158] sm:$0xff]  ;;  %v1240_v26 = vmax.f32 %v1186_v22, 0.0  ;;  %v2098_v22 = vmul.f32 %v8626_v13, %v8544_v20  ;;  %v2108_v20 = vmul.f32 %v8684_v40, %v8555_v46 }
 0x165   : > { %v2062_v32 = vld [vmem:[#allocation3 + $0x150] sm:$0xff]  ;;  %1289 = vst.msk [vmem:[#allocation3 + $0x178] sm:$0xff] %vm387_vm0, %v1241_v23  ;;  %v7515_v23 = vpack.c.bf16 %v3077_v15, %v3076_v16  ;;  %7402 = vmatprep.subr.bf16.mxu0 %v7401_v21  ;;  %v1301_v46 = vld [vmem:[%s8643_s11 + $0x58] sm:$0xff]  ;;  %v1306_v16 = vld [vmem:[%s8643_s11 + $0x80] sm:$0xff] }
 0x166   : > { %v7447_v36 = vpack.c.bf16 %v2063_v25, %v2062_v32  ;;  %1288 = vst.msk [vmem:[#allocation3 + $0x170] sm:$0xff] %vm387_vm0, %v1240_v26  ;;  %v2099_v25 = vmul.f32 %v8626_v13, %v8552_v44  ;;  %7404 = vmatpush3.bf16.msra.mxu0 %v7401_v21  ;;  %v1291_v26 = vld [vmem:[%s8643_s11 + $0x8] sm:$0xff]  ;;  %v3079_v32 = vld [vmem:[#allocation3 + $0x138] sm:$0xff]  ;;  %v2109_v44 = vmul.f32 %v8684_v40, %v8566_v50  ;;  %v1302_v50 = vld [vmem:[%s8643_s11 + $0x60] sm:$0xff] }
 0x167   : > { %v7521_v37 = vpack.c.bf16 %v3079_v32, %v3078_v31  ;;  %v8760_v15 = vld [vmem:[#allocation2 + $0x70] sm:$0xff]  ;;  %v8776_v21 = vld [vmem:[#allocation2 + $0xa0] sm:$0xff]  ;;  %v1309_v31 = vld [vmem:[%s8643_s11 + $0x98] sm:$0xff] }
 0x168   : > { %7449 = vmatprep.subr.msk.bf16.mxu1 %vm8414_vm2, %v7447_v36  ;;  %v3102_v17 = vmul.f32 %v8393_v28, %v8760_v15 }
 0x169   : > { %7452 = vmatpush3.bf16.xpose.msk.msra.mxu1 %vm8414_vm2, %v7447_v36  ;;  %6746 = vmatmul.mubr.msk.f32.vlgmr.msra.gmra.mrb[12].mxu0 %vm1342_vm9, %v1291_v26  ;;  %v1293_v36 = vld [vmem:[%s8643_s11 + $0x18] sm:$0xff]  ;;  %v3104_v26 = vmul.f32 %v8393_v28, %v8776_v21 }
 0x16a   : > { %7487 = vmatprep.subr.msk.bf16.mxu1 %vm8414_vm2, %v7485_v1  ;;  %6748 = vmatprep.mubr.msk.f32.mxu0 %vm1342_vm9, %v1292_v33  ;;  %v1310_v33 = vld [vmem:[%s8643_s11 + $0xa0] sm:$0xff] }
 0x16d   : > { %6749 = vmatmul.mubr.msk.f32.gmra.mrb[14].mxu0 %vm1342_vm9, %v1293_v36  ;;  %v1311_v36 = vld [vmem:[%s8643_s11 + $0xa8] sm:$0xff] }
 0x16e   : > { %6751 = vmatprep.mubr.msk.f32.mxu0 %vm1342_vm9, %v1294_v38  ;;  %v4090_v38 = vld [vmem:[#allocation3 + $0xb0] sm:$0xff] }
 0x170   : > { %6850 = vmatmul.mubr.msk.f32.vlgmr.msra.gmra.mrb[60].mxu1 %vm387_vm0, %v2081_v43  ;;  %v3081_v43 = vld [vmem:[#allocation3 + $0x168] sm:$0xff] }
 0x171   : > { %7490 = vmatpush3.bf16.xpose.msk.msra.mxu1 %vm8414_vm2, %v7485_v1  ;;  %6852 = vmatprep.mubr.msk.f32.mxu1 %vm387_vm0, %v2082_v42  ;;  %v2103_v1 = vmul.f32 %v8626_v13, %v8578_v57  ;;  %v3080_v42 = vld [vmem:[#allocation3 + $0x160] sm:$0xff] }
 0x172   : > { %7493 = vmatprep.subr.msk.bf16.mxu1 %vm8414_vm2, %v7491_v45 }
 0x174   : > { %6853 = vmatmul.mubr.msk.f32.gmra.mrb[62].mxu1 %vm387_vm0, %v2083_v47  ;;  %v1296_v47 = vld [vmem:[%s8643_s11 + $0x30] sm:$0xff] }
 0x175   : > { %6855 = vmatprep.mubr.msk.f32.mxu1 %vm387_vm0, %v2084_v49  ;;  %v7527_v49 = vpack.c.bf16 %v3081_v43, %v3080_v42  ;;  %v1313_v43 = vld [vmem:[%s8643_s11 + $0xb8] sm:$0xff] }
 0x178   : > { %6856 = vmatmul.mubr.msk.f32.gmra.mrb[64].mxu1 %vm387_vm0, %v2085_v55  ;;  %v1299_v55 = vld [vmem:[%s8643_s11 + $0x48] sm:$0xff] }
 0x179   : > { %6858 = vmatprep.mubr.msk.f32.mxu1 %vm387_vm0, %v2086_v56  ;;  %7496 = vmatpush3.bf16.xpose.msk.msra.mxu1 %vm8414_vm2, %v7491_v45  ;;  %v1295_v45 = vld [vmem:[%s8643_s11 + $0x28] sm:$0xff]  ;;  %v4084_v56 = vld [vmem:[#allocation3 + $0x20] sm:$0xff] }
 0x17a   : > { %7499 = vmatprep.subr.msk.bf16.mxu1 %vm8414_vm2, %v7497_v58  ;;  %6752 = vmatmul.mubr.msk.f32.gmra.mrb[16].mxu0 %vm1342_vm9, %v1295_v45 }
 0x17b   : > { %6754 = vmatprep.mubr.msk.f32.mxu0 %vm1342_vm9, %v1296_v47  ;;  %v1314_v47 = vld [vmem:[%s8643_s11 + $0xc0] sm:$0xff] }
 0x17c   : > { %6859 = vmatmul.mubr.msk.f32.gmra.mrb[66].mxu1 %vm387_vm0, %v2087_v59  ;;  %v1300_v59 = vld [vmem:[%s8643_s11 + $0x50] sm:$0xff] }
 0x17d   : > { %6861 = vmatprep.mubr.msk.f32.mxu1 %vm387_vm0, %v2088_v61  ;;  %v2110_v61 = vmul.f32 %v8684_v40, %v8569_v51  ;;  %v2111_v51 = vmul.f32 %v8684_v40, %v8578_v57  ;;  %v4086_v57 = vld [vmem:[#allocation3 + $0x50] sm:$0xff] }
 0x17e   : > { %6755 = vmatmul.mubr.msk.f32.gmra.mrb[18].mxu0 %vm1342_vm9, %v1297_v52  ;;  %v4092_v52 = vld [vmem:[#allocation3 + $0xe0] sm:$0xff] }
 0x17f   : > { %6757 = vmatprep.mubr.msk.f32.mxu0 %vm1342_vm9, %v1298_v54  ;;  %v4093_v54 = vld [vmem:[#allocation3 + $0xe8] sm:$0xff] }
 0x180   : > { %6862 = vmatmul.mubr.msk.f32.gmra.mrb[68].mxu1 %vm387_vm0, %v2089_v0  ;;  %v8736_v0 = vld [vmem:[#allocation2 + $0x40] sm:$0xff] }
 0x181   : > { %6864 = vmatprep.mubr.msk.f32.mxu1 %vm387_vm0, %v2090_v2  ;;  %7502 = vmatpush3.bf16.xpose.msk.msra.mxu1 %vm8414_vm2, %v7497_v58  ;;  %v4085_v58 = vld [vmem:[#allocation3 + $0x28] sm:$0xff]  ;;  %v3098_v2 = vmul.f32 %v8393_v28, %v8726_v63  ;;  %v3100_v8 = vmul.f32 %v8393_v28, %v8736_v0  ;;  %v3108_v42 = vmul.f32 %v8589_v60, %v8736_v0 }
 0x182   : > { %7505 = vmatprep.subr.msk.bf16.mxu1 %vm8414_vm2, %v7503_v4  ;;  %6758 = vmatmul.mubr.msk.f32.gmra.mrb[20].mxu0 %vm1342_vm9, %v1299_v55  ;;  %v7565_v62 = vpack.c.bf16 %v4085_v58, %v4084_v56  ;;  %v3112_v55 = vmul.f32 %v8589_v60, %v8776_v21  ;;  %v1317_v56 = vld [vmem:[%s8643_s11 + $0xd8] sm:$0xff]  ;;  %v7589_v58 = vpack.c.bf16 %v4093_v54, %v4092_v52  ;;  %v4081_v54 = vld [vmem:[#allocation2 + $0x88] sm:$0xff] }
 0x183   : > { %6760 = vmatprep.mubr.msk.f32.mxu0 %vm1342_vm9, %v1300_v59  ;;  %v1318_v59 = vld [vmem:[%s8643_s11 + $0xe0] sm:$0xff] }
 0x184   : > { %6865 = vmatmul.mubr.msk.f32.gmra.mrb[70].mxu1 %vm387_vm0, %v2091_v5  ;;  %v1303_v5 = vld [vmem:[%s8643_s11 + $0x68] sm:$0xff] }
 0x185   : > { %6867 = vmatprep.mubr.msk.f32.mxu1 %vm387_vm0, %v2092_v6  ;;  %v1304_v6 = vld [vmem:[%s8643_s11 + $0x70] sm:$0xff] }
 0x186   : > { %6761 = vmatmul.mubr.msk.f32.gmra.mrb[22].mxu0 %vm1342_vm9, %v1301_v46  ;;  %v1319_v46 = vld [vmem:[%s8643_s11 + $0xe8] sm:$0xff] }
 0x187   : > { %6763 = vmatprep.mubr.msk.f32.mxu0 %vm1342_vm9, %v1302_v50  ;;  %v4095_v50 = vld [vmem:[#allocation3 + $0x118] sm:$0xff] }
 0x188   : > { %6868 = vmatmul.mubr.msk.f32.gmra.mrb[72].mxu1 %vm387_vm0, %v2093_v9  ;;  %v8750_v9 = vld [vmem:[#allocation2 + $0x48] sm:$0xff] }
 0x189   : > { %6870 = vmatprep.mubr.msk.f32.mxu1 %vm387_vm0, %v2094_v10  ;;  %7508 = vmatpush3.bf16.xpose.msk.msra.mxu1 %vm8414_vm2, %v7503_v4  ;;  %v8741_v4 = vld [vmem:[#allocation2 + $0x18] sm:$0xff] }
 0x18a   : > { %7511 = vmatprep.subr.msk.bf16.mxu1 %vm8414_vm2, %v7509_v11  ;;  %v3099_v10 = vmul.f32 %v8393_v28, %v8741_v4  ;;  %6764 = vmatmul.mubr.msk.f32.gmra.mrb[24].mxu0 %vm1342_vm9, %v1303_v5  ;;  %v3116_v5 = vmul.f32 %v8626_v13, %v8736_v0 }
 0x18b   : > { %6766 = vmatprep.mubr.msk.f32.mxu0 %vm1342_vm9, %v1304_v6  ;;  %v1321_v6 = vld [vmem:[%s8643_s11 + $0xf8] sm:$0xff] }
 0x18c   : > { %6871 = vmatmul.mubr.msk.f32.gmra.mrb[74].mxu1 %vm387_vm0, %v2095_v12  ;;  %v7571_v12 = vpack.c.bf16 %v4087_v7, %v4086_v57  ;;  %v1322_v7 = vld [vmem:[%s8643_s11 + $0x100] sm:$0xff] }
 0x18d   : > { %6873 = vmatprep.mubr.msk.f32.mxu1 %vm387_vm0, %v2096_v14  ;;  %v3101_v14 = vmul.f32 %v8393_v28, %v8750_v9 }
 0x190   : > { %6874 = vmatmul.mubr.msk.f32.gmra.mrb[76].mxu1 %vm387_vm0, %v2097_v19  ;;  %v1307_v19 = vld [vmem:[%s8643_s11 + $0x88] sm:$0xff] }
 0x191   : > { %6876 = vmatprep.mubr.msk.f32.mxu1 %vm387_vm0, %v2098_v22  ;;  %7514 = vmatpush3.bf16.xpose.msk.msra.mxu1 %vm8414_vm2, %v7509_v11  ;;  %v1305_v11 = vld [vmem:[%s8643_s11 + $0x78] sm:$0xff]  ;;  %v1308_v22 = vld [vmem:[%s8643_s11 + $0x90] sm:$0xff] }
 0x192   : > { %7517 = vmatprep.subr.msk.bf16.mxu1 %vm8414_vm2, %v7515_v23  ;;  %6767 = vmatmul.mubr.msk.f32.gmra.mrb[26].mxu0 %vm1342_vm9, %v1305_v11  ;;  %v1323_v11 = vld [vmem:[%s8643_s11 + $0x108] sm:$0xff] }
 0x193   : > { %6769 = vmatprep.mubr.msk.f32.mxu0 %vm1342_vm9, %v1306_v16  ;;  %v1324_v16 = vld [vmem:[%s8643_s11 + $0x110] sm:$0xff] }
 0x194   : > { %6877 = vmatmul.mubr.msk.f32.gmra.mrb[78].mxu1 %vm387_vm0, %v2099_v25  ;;  %v3103_v25 = vmul.f32 %v8393_v28, %v8771_v18 }
 0x195   : > { %6879 = vmatprep.mubr.msk.f32.mxu1 %vm387_vm0, %v2100_v30  ;;  %v8785_v30 = vld [vmem:[#allocation2 + $0xa8] sm:$0xff] }
 0x196   : > { %6770 = vmatmul.mubr.msk.f32.gmra.mrb[28].mxu0 %vm1342_vm9, %v1307_v19  ;;  %v3120_v19 = vmul.f32 %v8626_v13, %v8776_v21 }
 0x197   : > { %6772 = vmatprep.mubr.msk.f32.mxu0 %vm1342_vm9, %v1308_v22  ;;  %v1325_v22 = vld [vmem:[%s8643_s11 + $0x118] sm:$0xff] }
 0x198   : > { %6880 = vmatmul.mubr.msk.f32.gmra.mrb[80].mxu1 %vm387_vm0, %v2101_v34  ;;  %v3105_v34 = vmul.f32 %v8393_v28, %v8785_v30 }
 0x199   : > { %6882 = vmatprep.mubr.msk.f32.mxu1 %vm387_vm0, %v2102_v35  ;;  %7520 = vmatpush3.bf16.xpose.msk.msra.mxu1 %vm8414_vm2, %v7515_v23  ;;  %v4088_v23 = vld [vmem:[#allocation3 + $0x80] sm:$0xff]  ;;  %v3106_v35 = vmul.f32 %v8589_v60, %v8726_v63 }
 0x19a   : > { %7523 = vmatprep.subr.msk.bf16.mxu1 %vm8414_vm2, %v7521_v37  ;;  %v7577_v32 = vpack.c.bf16 %v4089_v24, %v4088_v23  ;;  %6773 = vmatmul.mubr.msk.f32.gmra.mrb[30].mxu0 %vm1342_vm9, %v1309_v31  ;;  %v1326_v24 = vld [vmem:[%s8643_s11 + $0x120] sm:$0xff]  ;;  %v4098_v31 = vld [vmem:[#allocation3 + $0x170] sm:$0xff] }
 0x19b   : > { %6775 = vmatprep.mubr.msk.f32.mxu0 %vm1342_vm9, %v1310_v33  ;;  %v1327_v33 = vld [vmem:[%s8643_s11 + $0x128] sm:$0xff] }
 0x19c   : > { %6883 = vmatmul.mubr.msk.f32.gmra.mrb[82].mxu1 %vm387_vm0, %v2103_v1  ;;  %v4091_v1 = vld [vmem:[#allocation3 + $0xb8] sm:$0xff] }
 0x19d   : > { %6885 = vmatprep.mubr.msk.f32.mxu1 %vm387_vm0, %v2104_v41  ;;  %v3107_v41 = vmul.f32 %v8589_v60, %v8741_v4  ;;  %v7583_v45 = vpack.c.bf16 %v4091_v1, %v4090_v38  ;;  %v1330_v38 = vld [vmem:[%s8643_s11 + $0x140] sm:$0xff]  ;;  %v1331_v1 = vld [vmem:[%s8643_s11 + $0x148] sm:$0xff] }
 0x19e   : > { %6776 = vmatmul.mubr.msk.f32.gmra.mrb[32].mxu0 %vm1342_vm9, %v1311_v36 }
 0x1a0   : > { %6886 = vmatmul.mubr.msk.f32.gmra.mrb[84].mxu1 %vm387_vm0, %v2105_v27  ;;  %v3109_v27 = vmul.f32 %v8589_v60, %v8750_v9 }
 0x1a1   : > { %6888 = vmatprep.mubr.msk.f32.mxu1 %vm387_vm0, %v2106_v29  ;;  %7526 = vmatpush3.bf16.xpose.msk.msra.mxu1 %vm8414_vm2, %v7521_v37  ;;  %v1312_v37 = vld [vmem:[%s8643_s11 + $0xb0] sm:$0xff]  ;;  %v1315_v29 = vld [vmem:[%s8643_s11 + $0xc8] sm:$0xff] }
 0x1a2   : > { %7529 = vmatprep.subr.msk.bf16.mxu1 %vm8414_vm2, %v7527_v49  ;;  %6778 = vmatprep.mubr.msk.f32.mxu0 %vm1342_vm9, %v1312_v37  ;;  %v1329_v37 = vld [vmem:[%s8643_s11 + $0x138] sm:$0xff] }
 0x1a3   : > { %6779 = vmatmul.mubr.msk.f32.gmra.mrb[34].mxu0 %vm1342_vm9, %v1313_v43  ;;  %v1333_v43 = vld [vmem:[%s8643_s11 + $0x158] sm:$0xff] }
 0x1a4   : > { %6889 = vmatmul.mubr.msk.f32.gmra.mrb[86].mxu1 %vm387_vm0, %v2107_v39  ;;  %6781 = vmatprep.mubr.msk.f32.mxu0 %vm1342_vm9, %v1314_v47  ;;  %v1316_v39 = vld [vmem:[%s8643_s11 + $0xd0] sm:$0xff]  ;;  %v8946_v47 = vld [vmem:[#allocation2 + $0x28] sm:$0xff] }
 0x1a5   : > { %6891 = vmatprep.mubr.msk.f32.mxu1 %vm387_vm0, %v2108_v20  ;;  %v3111_v20 = vmul.f32 %v8589_v60, %v8771_v18 }
 0x1a7   : > { %6782 = vmatmul.mubr.msk.f32.gmra.mrb[36].mxu0 %vm1342_vm9, %v1315_v29  ;;  %v4080_v29 = vld [vmem:[#allocation2 + $0x80] sm:$0xff] }
 0x1a8   : > { %6892 = vmatmul.mubr.msk.f32.gmra.mrb[88].mxu1 %vm387_vm0, %v2109_v44  ;;  %6784 = vmatprep.mubr.msk.f32.mxu0 %vm1342_vm9, %v1316_v39  ;;  %v3113_v44 = vmul.f32 %v8589_v60, %v8785_v30  ;;  %v4120_v52 = vmul.f32 %v8393_v28, %v4080_v29  ;;  %v4082_v39 = vld [vmem:[#allocation2 + $0xb0] sm:$0xff] }
 0x1a9   : > { %6894 = vmatprep.mubr.msk.f32.mxu1 %vm387_vm0, %v2110_v61  ;;  %7532 = vmatpush3.bf16.xpose.msk.msra.mxu1 %vm8414_vm2, %v7527_v49  ;;  %v3110_v49 = vmul.f32 %v8589_v60, %v8760_v15  ;;  %v3114_v61 = vmul.f32 %v8626_v13, %v8726_v63 }
 0x1aa   : > { %7567 = vmatprep.subr.msk.bf16.mxu1 %vm8414_vm2, %v7565_v62 }
 0x1ab   : > { %6785 = vmatmul.mubr.msk.f32.gmra.mrb[38].mxu0 %vm1342_vm9, %v1317_v56  ;;  %v4083_v56 = vld [vmem:[#allocation2 + $0xb8] sm:$0xff] }
 0x1ac   : > { %6895 = vmatmul.mubr.msk.f32.gmra.mrb[90].mxu1 %vm387_vm0, %v2111_v51  ;;  %6787 = vmatprep.mubr.msk.f32.mxu0 %vm1342_vm9, %v1318_v59  ;;  %v1320_v51 = vld [vmem:[%s8643_s11 + $0xf0] sm:$0xff] }
 0x1ad   : > { %7009 = vmatprep.mubr.msk.f32.mxu1 %vm387_vm0, %v3098_v2  ;;  %v3115_v2 = vmul.f32 %v8626_v13, %v8741_v4 }
 0x1af   : > { %6788 = vmatmul.mubr.msk.f32.gmra.mrb[40].mxu0 %vm1342_vm9, %v1319_v46 }
 0x1b0   : > { %7010 = vmatmul.mubr.msk.f32.vlgmr.msra.gmra.mrb[92].mxu1 %vm387_vm0, %v3099_v10  ;;  %6790 = vmatprep.mubr.msk.f32.mxu0 %vm1342_vm9, %v1320_v51  ;;  %v3118_v10 = vmul.f32 %v8626_v13, %v8760_v15 }
 0x1b1   : > { %7570 = vmatpush3.bf16.xpose.msk.msra.mxu1 %vm8414_vm2, %v7565_v62  ;;  %7012 = vmatprep.mubr.msk.f32.mxu1 %vm387_vm0, %v3100_v8  ;;  %v4094_v62 = vld [vmem:[#allocation3 + $0x110] sm:$0xff]  ;;  %v3117_v8 = vmul.f32 %v8626_v13, %v8750_v9 }
 0x1b2   : > { %7573 = vmatprep.subr.msk.bf16.mxu1 %vm8414_vm2, %v7571_v12  ;;  %v7595_v57 = vpack.c.bf16 %v4095_v50, %v4094_v62  ;;  %v8982_v50 = vand.u32 15, %v8377_v3  ;;  %v4129_v3 = vmul.f32 %v8589_v60, %v4081_v54 }
 0x1b3   : > { %6791 = vmatmul.mubr.msk.f32.gmra.mrb[42].mxu0 %vm1342_vm9, %v1321_v6 }
 0x1b4   : > { %7013 = vmatmul.mubr.msk.f32.gmra.mrb[94].mxu1 %vm387_vm0, %v3101_v14  ;;  %6793 = vmatprep.mubr.msk.f32.mxu0 %vm1342_vm9, %v1322_v7  ;;  %v4097_v14 = vld [vmem:[#allocation3 + $0x148] sm:$0xff]  ;;  %v4131_v7 = vmul.f32 %v8589_v60, %v4083_v56 }
 0x1b5   : > { %7015 = vmatprep.mubr.msk.f32.mxu1 %vm387_vm0, %v3102_v17  ;;  %v3119_v17 = vmul.f32 %v8626_v13, %v8771_v18 }
 0x1b7   : > { %6794 = vmatmul.mubr.msk.f32.gmra.mrb[44].mxu0 %vm1342_vm9, %v1323_v11 }
 0x1b8   : > { %7016 = vmatmul.mubr.msk.f32.gmra.mrb[96].mxu1 %vm387_vm0, %v3103_v25  ;;  %6796 = vmatprep.mubr.msk.f32.mxu0 %vm1342_vm9, %v1324_v16  ;;  %v3121_v25 = vmul.f32 %v8626_v13, %v8785_v30  ;;  %v4137_v16 = vmul.f32 %v8626_v13, %v4081_v54 }
 0x1b9   : > { %7018 = vmatprep.mubr.msk.f32.mxu1 %vm387_vm0, %v3104_v26  ;;  %7576 = vmatpush3.bf16.xpose.msk.msra.mxu1 %vm8414_vm2, %v7571_v12  ;;  %v4096_v12 = vld [vmem:[#allocation3 + $0x140] sm:$0xff]  ;;  %v3122_v26 = vmul.f32 %v8684_v40, %v8726_v63  ;;  %v3124_v63 = vmul.f32 %v8684_v40, %v8736_v0  ;;  %v3126_v0 = vmul.f32 %v8684_v40, %v8760_v15 }
 0x1ba   : > { %7579 = vmatprep.subr.msk.bf16.mxu1 %vm8414_vm2, %v7577_v32  ;;  %v7601_v23 = vpack.c.bf16 %v4097_v14, %v4096_v12  ;;  %v8934_v15 = vld [vmem:[#allocation2 + $0x20] sm:$0xff]  ;;  %v4136_v14 = vmul.f32 %v8626_v13, %v4080_v29 }
 0x1bb   : > { %6797 = vmatmul.mubr.msk.f32.gmra.mrb[46].mxu0 %vm1342_vm9, %v1325_v22  ;;  %v4124_v59 = vmul.f32 %v8589_v60, %v8934_v15  ;;  %v4140_v22 = vmul.f32 %v8684_v40, %v8934_v15 }
 0x1bc   : > { %7019 = vmatmul.mubr.msk.f32.gmra.mrb[98].mxu1 %vm387_vm0, %v3105_v34  ;;  %6799 = vmatprep.mubr.msk.f32.mxu0 %vm1342_vm9, %v1326_v24  ;;  %v1328_v34 = vld [vmem:[%s8643_s11 + $0x130] sm:$0xff] }
 0x1bd   : > { %7021 = vmatprep.mubr.msk.f32.mxu1 %vm387_vm0, %v3106_v35  ;;  %v3123_v35 = vmul.f32 %v8684_v40, %v8741_v4  ;;  %v3125_v4 = vmul.f32 %v8684_v40, %v8750_v9  ;;  %v3128_v9 = vmul.f32 %v8684_v40, %v8776_v21  ;;  %v4116_v21 = vmul.f32 %v8393_v28, %v8934_v15 }
 0x1bf   : > { %6800 = vmatmul.mubr.msk.f32.gmra.mrb[48].mxu0 %vm1342_vm9, %v1327_v33  ;;  %v4147_v33 = vmul.f32 %v8684_v40, %v4083_v56 }
 0x1c0   : > { %7022 = vmatmul.mubr.msk.f32.gmra.mrb[100].mxu1 %vm387_vm0, %v3107_v41  ;;  %6802 = vmatprep.mubr.msk.f32.mxu0 %vm1342_vm9, %v1328_v34  ;;  %v1332_v41 = vld [vmem:[%s8643_s11 + $0x150] sm:$0xff] }
 0x1c1   : > { %7024 = vmatprep.mubr.msk.f32.mxu1 %vm387_vm0, %v3108_v42  ;;  %7582 = vmatpush3.bf16.xpose.msk.msra.mxu1 %vm8414_vm2, %v7577_v32  ;;  %v4099_v32 = vld [vmem:[#allocation3 + $0x178] sm:$0xff]  ;;  %v3127_v42 = vmul.f32 %v8684_v40, %v8771_v18  ;;  %v3129_v18 = vmul.f32 %v8684_v40, %v8785_v30  ;;  %v4117_v30 = vmul.f32 %v8393_v28, %v8946_v47 }
 0x1c2   : > { %7585 = vmatprep.subr.msk.bf16.mxu1 %vm8414_vm2, %v7583_v45  ;;  %v7607_v36 = vpack.c.bf16 %v4099_v32, %v4098_v31  ;;  %v4145_v31 = vmul.f32 %v8684_v40, %v4081_v54  ;;  %v4146_v32 = vmul.f32 %v8684_v40, %v4082_v39 }
 0x1c3   : > { %6803 = vmatmul.mubr.msk.f32.gmra.mrb[50].mxu0 %vm1342_vm9, %v1329_v37  ;;  %v1335_v37 = vld [vmem:[%s8643_s11 + $0x168] sm:$0xff] }
 0x1c4   : > { %7025 = vmatmul.mubr.msk.f32.gmra.mrb[102].mxu1 %vm387_vm0, %v3109_v27  ;;  %6805 = vmatprep.mubr.msk.f32.mxu0 %vm1342_vm9, %v1330_v38  ;;  %v8952_v27 = vld [vmem:[#allocation2 + $0x58] sm:$0xff] }
 0x1c5   : > { %7027 = vmatprep.mubr.msk.f32.mxu1 %vm387_vm0, %v3110_v49  ;;  %v4119_v49 = vmul.f32 %v8393_v28, %v8952_v27  ;;  %v4135_v12 = vmul.f32 %v8626_v13, %v8952_v27 }
 0x1c7   : > { %6806 = vmatmul.mubr.msk.f32.gmra.mrb[52].mxu0 %vm1342_vm9, %v1331_v1 }
 0x1c8   : > { %7028 = vmatmul.mubr.msk.f32.gmra.mrb[104].mxu1 %vm387_vm0, %v3111_v20  ;;  %6808 = vmatprep.mubr.msk.f32.mxu0 %vm1342_vm9, %v1332_v41  ;;  %v4121_v20 = vmul.f32 %v8393_v28, %v4081_v54 }
 0x1c9   : > { %7030 = vmatprep.mubr.msk.f32.mxu1 %vm387_vm0, %v3112_v55  ;;  %7588 = vmatpush3.bf16.xpose.msk.msra.mxu1 %vm8414_vm2, %v7583_v45  ;;  %v8941_v45 = vld [vmem:[#allocation2 + $0x50] sm:$0xff]  ;;  %v4122_v55 = vmul.f32 %v8393_v28, %v4082_v39 }
 0x1ca   : > { %7591 = vmatprep.subr.msk.bf16.mxu1 %vm8414_vm2, %v7589_v58  ;;  %v4118_v48 = vmul.f32 %v8393_v28, %v8941_v45  ;;  %v4126_v62 = vmul.f32 %v8589_v60, %v8941_v45  ;;  %v4134_v11 = vmul.f32 %v8626_v13, %v8941_v45  ;;  %v4142_v24 = vmul.f32 %v8684_v40, %v8941_v45 }
 0x1cb   : > { %6809 = vmatmul.mubr.msk.f32.gmra.mrb[54].mxu0 %vm1342_vm9, %v1333_v43 }
 0x1cc   : > { %7031 = vmatmul.mubr.msk.f32.gmra.mrb[106].mxu1 %vm387_vm0, %v3113_v44  ;;  %v8972_v44 = vshrl.u32 %v1888_v53, 7  ;;  %v4127_v53 = vmul.f32 %v8589_v60, %v8952_v27 }
 0x1cd   : > { %7033 = vmatprep.mubr.msk.f32.mxu1 %vm387_vm0, %v3114_v61  ;;  %v4125_v61 = vmul.f32 %v8589_v60, %v8946_v47 }
 0x1ce   : > { %v1942_v46 = vadd.s32 248, %v8972_v44  ;;  %v1912_v34 = vadd.s32 8, %v8972_v44  ;;  %v1943_v38 = vand.u32 15, %v8972_v44  ;;  %v1915_v1 = vadd.s32 32, %v8972_v44 }
 0x1d0   : > { %7034 = vmatmul.mubr.msk.f32.gmra.mrb[108].mxu1 %vm387_vm0, %v3115_v2  ;;  %v1974_v51 = vand.u32 15, %v1942_v46  ;;  %v4128_v2 = vmul.f32 %v8589_v60, %v4080_v29  ;;  %vm1976_vm15 = vcmp.eq.s32.totalorder %v1943_v38, %v8982_v50 }
 0x1d1   : > { %7036 = vmatprep.mubr.msk.f32.mxu1 %vm387_vm0, %v3116_v5  ;;  %7594 = vmatpush3.bf16.xpose.msk.msra.mxu1 %vm8414_vm2, %v7589_v58  ;;  %v4123_v58 = vmul.f32 %v8393_v28, %v4083_v56  ;;  %v8103_v5 = vmov -1e+30  }
 0x1d2   : > { %7597 = vmatprep.subr.msk.bf16.mxu1 %vm8414_vm2, %v7595_v57  ;;  %vm2007_vm13 = vcmp.eq.s32.totalorder %v1974_v51, %v8982_v50 }
 0x1d3   : > { %v8990_v6 = vsel %vm2007_vm13, 0.0, %v8103_v5 }
 0x1d4   : > { %7037 = vmatmul.mubr.msk.f32.gmra.mrb[110].mxu1 %vm387_vm0, %v3117_v8  ;;  %v4132_v8 = vmul.f32 %v8626_v13, %v8934_v15  ;;  %v1947_v15 = vand.u32 15, %v1915_v1 }
 0x1d5   : > { %7039 = vmatprep.mubr.msk.f32.mxu1 %vm387_vm0, %v3118_v10  ;;  %v4133_v10 = vmul.f32 %v8626_v13, %v8946_v47 }
 0x1d6   : > { %vm1980_vm3 = vcmp.eq.s32.totalorder %v1947_v15, %v8982_v50 }
 0x1d8   : > { %7040 = vmatmul.mubr.msk.f32.gmra.mrb[112].mxu1 %vm387_vm0, %v3119_v17  ;;  %v4138_v17 = vmul.f32 %v8626_v13, %v4082_v39 }
 0x1d9   : > { %7042 = vmatprep.mubr.msk.f32.mxu1 %vm387_vm0, %v3120_v19  ;;  %7600 = vmatpush3.bf16.xpose.msk.msra.mxu1 %vm8414_vm2, %v7595_v57  ;;  %v4130_v57 = vmul.f32 %v8589_v60, %v4082_v39  ;;  %v4139_v19 = vmul.f32 %v8626_v13, %v4083_v56  ;;  %v9084_v56 = vsel %vm1980_vm3, 0.0, %v8103_v5  ;;  %v1941_v60 = vadd.s32 240, %v8972_v44 }
 0x1da   : > { %7603 = vmatprep.subr.msk.bf16.mxu1 %vm8414_vm2, %v7601_v23 }
 0x1dc   : > { %7043 = vmatmul.mubr.msk.f32.gmra.mrb[114].mxu1 %vm387_vm0, %v3121_v25  ;;  %v4143_v25 = vmul.f32 %v8684_v40, %v8952_v27 }
 0x1dd   : > { %7045 = vmatprep.mubr.msk.f32.mxu1 %vm387_vm0, %v3122_v26  ;;  %v4144_v26 = vmul.f32 %v8684_v40, %v4080_v29 }
 0x1e0   : > { %7046 = vmatmul.mubr.msk.f32.gmra.mrb[116].mxu1 %vm387_vm0, %v3123_v35  ;;  %v1944_v35 = vand.u32 15, %v1912_v34 }
 0x1e1   : > { %7048 = vmatprep.mubr.msk.f32.mxu1 %vm387_vm0, %v3124_v63  ;;  %7606 = vmatpush3.bf16.xpose.msk.msra.mxu1 %vm8414_vm2, %v7601_v23  ;;  %v4141_v23 = vmul.f32 %v8684_v40, %v8946_v47  ;;  %v1334_v63 = vld [vmem:[%s8643_s11 + $0x160] sm:$0xff]  ;;  %v9061_v47 = vsel %vm1976_vm15, 0.0, %v8103_v5 }
 0x1e2   : > { %7609 = vmatprep.subr.msk.bf16.mxu1 %vm8414_vm2, %v7607_v36  ;;  %6811 = vmatprep.mubr.msk.f32.mxu0 %vm1342_vm9, %v1334_v63  ;;  %vm1977_vm14 = vcmp.eq.s32.totalorder %v1944_v35, %v8982_v50 }
 0x1e3   : > { %6812 = vmatmul.mubr.msk.f32.gmra.mrb[56].mxu0 %vm1342_vm9, %v1335_v37  ;;  %v9051_v41 = vsel %vm1977_vm14, 0.0, %v8103_v5  ;;  %v1926_v37 = vadd.s32 120, %v8972_v44 }
 0x1e4   : > { %7049 = vmatmul.mubr.msk.f32.gmra.mrb[118].mxu1 %vm387_vm0, %v3125_v4 }
 0x1e5   : > { %7051 = vmatprep.mubr.msk.f32.mxu1 %vm387_vm0, %v3126_v0  ;;  %v1913_v0 = vadd.s32 16, %v8972_v44 }
 0x1e8   : > { %7052 = vmatmul.mubr.msk.f32.gmra.mrb[120].mxu1 %vm387_vm0, %v3127_v42  ;;  %v1945_v42 = vand.u32 15, %v1913_v0  ;;  %v1927_v0 = vadd.s32 128, %v8972_v44 }
 0x1e9   : > { %7054 = vmatprep.mubr.msk.f32.mxu1 %vm387_vm0, %v3128_v9  ;;  %7612 = vmatpush3.bf16.xpose.msk.msra.mxu1 %vm8414_vm2, %v7607_v36  ;;  %v1914_v36 = vadd.s32 24, %v8972_v44  ;;  %v1916_v9 = vadd.s32 40, %v8972_v44 }
 0x1ea   : > { %vm1978_vm2 = vcmp.eq.s32.totalorder %v1945_v42, %v8982_v50 }
 0x1eb   : > { %v1946_v4 = vand.u32 15, %v1914_v36  ;;  %v1948_v27 = vand.u32 15, %v1916_v9 }
 0x1ec   : > { %7055 = vmatmul.mubr.msk.f32.gmra.mrb[122].mxu1 %vm387_vm0, %v3129_v18  ;;  %v1917_v18 = vadd.s32 48, %v8972_v44 }
 0x1ed   : > { %7169 = vmatprep.mubr.msk.f32.mxu1 %vm387_vm0, %v4116_v21  ;;  %vm1979_vm1 = vcmp.eq.s32.totalorder %v1946_v4, %v8982_v50  ;;  %vm1981_vm4 = vcmp.eq.s32.totalorder %v1948_v27, %v8982_v50 }
 0x1ee   : > { %v1949_v29 = vand.u32 15, %v1917_v18  ;;  %v1958_v18 = vand.u32 15, %v1926_v37 }
 0x1f0   : > { %7170 = vmatmul.mubr.msk.f32.vlgmr.msra.gmra.mrb[124].mxu1 %vm387_vm0, %v4117_v30  ;;  %v1918_v30 = vadd.s32 56, %v8972_v44  ;;  %vm1982_vm5 = vcmp.eq.s32.totalorder %v1949_v29, %v8982_v50  ;;  %vm1991_vm15 = vcmp.eq.s32.totalorder %v1958_v18, %v8982_v50 }
 0x1f1   : > { %7172 = vmatprep.mubr.msk.f32.mxu1 %vm387_vm0, %v4118_v48  ;;  %v9064_v48 = vsel %vm1979_vm1, 0.0, %v8103_v5 }
 0x1f4   : > { %7173 = vmatmul.mubr.msk.f32.gmra.mrb[126].mxu1 %vm387_vm0, %v4119_v49 }
 0x1f5   : > { %7175 = vmatprep.mubr.msk.f32.mxu1 %vm387_vm0, %v4120_v52  ;;  %v1919_v52 = vadd.s32 64, %v8972_v44 }
 0x1f7   : > { %v1951_v46 = vand.u32 15, %v1919_v52 }
 0x1f8   : > { %7176 = vmatmul.mubr.msk.f32.gmra.mrb[128].mxu1 %vm387_vm0, %v4121_v20 }
 0x1f9   : > { %7178 = vmatprep.mubr.msk.f32.mxu1 %vm387_vm0, %v4122_v55  ;;  %v9078_v55 = vsel %vm1978_vm2, 0.0, %v8103_v5  ;;  %vm1984_vm7 = vcmp.eq.s32.totalorder %v1951_v46, %v8982_v50  ;;  %v1930_v46 = vadd.s32 152, %v8972_v44 }
 0x1fc   : > { %7179 = vmatmul.mubr.msk.f32.gmra.mrb[130].mxu1 %vm387_vm0, %v4123_v58  ;;  %v1950_v58 = vand.u32 15, %v1918_v30  ;;  %v1959_v30 = vand.u32 15, %v1927_v0 }
 0x1fd   : > { %7181 = vmatprep.mubr.msk.f32.mxu1 %vm387_vm0, %v4124_v59  ;;  %v1920_v59 = vadd.s32 72, %v8972_v44 }
 0x1fe   : > { %vm1983_vm6 = vcmp.eq.s32.totalorder %v1950_v58, %v8982_v50  ;;  %vm1992_vm1 = vcmp.eq.s32.totalorder %v1959_v30, %v8982_v50 }
 0x200   : > { %7182 = vmatmul.mubr.msk.f32.gmra.mrb[132].mxu1 %vm387_vm0, %v4125_v61 }
 0x201   : > { %7184 = vmatprep.mubr.msk.f32.mxu1 %vm387_vm0, %v4126_v62  ;;  %v1921_v62 = vadd.s32 80, %v8972_v44 }
 0x204   : > { %7185 = vmatmul.mubr.msk.f32.gmra.mrb[134].mxu1 %vm387_vm0, %v4127_v53 }
 0x205   : > { %7187 = vmatprep.mubr.msk.f32.mxu1 %vm387_vm0, %v4128_v2  ;;  %v9093_v2 = vsel %vm1981_vm4, 0.0, %v8103_v5 }
 0x208   : > { %7188 = vmatmul.mubr.msk.f32.gmra.mrb[136].mxu1 %vm387_vm0, %v4129_v3 }
 0x209   : > { %7190 = vmatprep.mubr.msk.f32.mxu1 %vm387_vm0, %v4130_v57  ;;  %v9101_v57 = vsel %vm1982_vm5, 0.0, %v8103_v5 }
 0x20c   : > { %7191 = vmatmul.mubr.msk.f32.gmra.mrb[138].mxu1 %vm387_vm0, %v4131_v7  ;;  %v1952_v7 = vand.u32 15, %v1920_v59 }
 0x20d   : > { %7193 = vmatprep.mubr.msk.f32.mxu1 %vm387_vm0, %v4132_v8  ;;  %v1922_v8 = vadd.s32 88, %v8972_v44 }
 0x20e   : > { %vm1985_vm8 = vcmp.eq.s32.totalorder %v1952_v7, %v8982_v50  ;;  %v1931_v7 = vadd.s32 160, %v8972_v44 }
 0x20f   : > { %v9129_v34 = vsel %vm1985_vm8, 0.0, %v8103_v5 }
 0x210   : > { %7194 = vmatmul.mubr.msk.f32.gmra.mrb[140].mxu1 %vm387_vm0, %v4133_v10 }
 0x211   : > { %7196 = vmatprep.mubr.msk.f32.mxu1 %vm387_vm0, %v4134_v11  ;;  %v1953_v11 = vand.u32 15, %v1921_v62 }
 0x213   : > { %vm1986_vm10 = vcmp.eq.s32.totalorder %v1953_v11, %v8982_v50  ;;  %v9183_v11 = vsel %vm1991_vm15, 0.0, %v8103_v5 }
 0x214   : > { %7197 = vmatmul.mubr.msk.f32.gmra.mrb[142].mxu1 %vm387_vm0, %v4135_v12  ;;  %v1923_v12 = vadd.s32 96, %v8972_v44  ;;  %v9137_v36 = vsel %vm1986_vm10, 0.0, %v8103_v5 }
 0x215   : > { %7199 = vmatprep.mubr.msk.f32.mxu1 %vm387_vm0, %v4136_v14 }
 0x218   : > { %7200 = vmatmul.mubr.msk.f32.gmra.mrb[144].mxu1 %vm387_vm0, %v4137_v16 }
 0x219   : > { %7202 = vmatprep.mubr.msk.f32.mxu1 %vm387_vm0, %v4138_v17  ;;  %v9111_v17 = vsel %vm1983_vm6, 0.0, %v8103_v5 }
 0x21c   : > { %7203 = vmatmul.mubr.msk.f32.gmra.mrb[146].mxu1 %vm387_vm0, %v4139_v19 }
 0x21d   : > { %7205 = vmatprep.mubr.msk.f32.mxu1 %vm387_vm0, %v4140_v22  ;;  %v9119_v22 = vsel %vm1984_vm7, 0.0, %v8103_v5 }
 0x220   : > { %7206 = vmatmul.mubr.msk.f32.gmra.mrb[148].mxu1 %vm387_vm0, %v4141_v23  ;;  %v1954_v23 = vand.u32 15, %v1922_v8 }
 0x221   : > { %7208 = vmatprep.mubr.msk.f32.mxu1 %vm387_vm0, %v4142_v24  ;;  %v1924_v24 = vadd.s32 104, %v8972_v44 }
 0x222   : > { %vm1987_vm11 = vcmp.eq.s32.totalorder %v1954_v23, %v8982_v50  ;;  %v1962_v23 = vand.u32 15, %v1930_v46 }
 0x223   : > { %v1956_v63 = vand.u32 15, %v1924_v24  ;;  %v9147_v9 = vsel %vm1987_vm11, 0.0, %v8103_v5  ;;  %v1932_v24 = vadd.s32 168, %v8972_v44 }
 0x224   : > { %7209 = vmatmul.mubr.msk.f32.gmra.mrb[150].mxu1 %vm387_vm0, %v4143_v25  ;;  %vm1995_vm4 = vcmp.eq.s32.totalorder %v1962_v23, %v8982_v50  ;;  %v1937_v23 = vadd.s32 208, %v8972_v44 }
 0x225   : > { %7211 = vmatprep.mubr.msk.f32.mxu1 %vm387_vm0, %v4144_v26  ;;  %v1955_v26 = vand.u32 15, %v1923_v12  ;;  %vm1989_vm13 = vcmp.eq.s32.totalorder %v1956_v63, %v8982_v50  ;;  %v1964_v0 = vand.u32 15, %v1932_v24 }
 0x227   : > { %vm1988_vm12 = vcmp.eq.s32.totalorder %v1955_v26, %v8982_v50  ;;  %v1963_v26 = vand.u32 15, %v1931_v7  ;;  %vm1997_vm6 = vcmp.eq.s32.totalorder %v1964_v0, %v8982_v50 }
 0x228   : > { %7212 = vmatmul.mubr.msk.f32.gmra.mrb[152].mxu1 %vm387_vm0, %v4145_v31  ;;  %v1925_v31 = vadd.s32 112, %v8972_v44  ;;  %v9155_v15 = vsel %vm1988_vm12, 0.0, %v8103_v5 }
 0x229   : > { %7214 = vmatprep.mubr.msk.f32.mxu1 %vm387_vm0, %v4146_v32  ;;  %vm1996_vm5 = vcmp.eq.s32.totalorder %v1963_v26, %v8982_v50  ;;  %v9237_v26 = vsel %vm1997_vm6, 0.0, %v8103_v5 }
 0x22a   : > { %v1957_v4 = vand.u32 15, %v1925_v31  ;;  %v1933_v31 = vadd.s32 176, %v8972_v44  ;;  %v9227_v46 = vsel %vm1996_vm5, 0.0, %v8103_v5 }
 0x22c   : > { %7215 = vmatmul.mubr.msk.f32.gmra.mrb[154].mxu1 %vm387_vm0, %v4147_v33  ;;  %vm1990_vm14 = vcmp.eq.s32.totalorder %v1957_v4, %v8982_v50 }
 0x22d   : > { %v9173_v59 = vsel %vm1990_vm14, 0.0, %v8103_v5 }
 0x243   : > { %v6851_v43 = vpop.f32.mrb[60].mxu1 }
 0x244   : > { %v9058_v45 = vadd.f32 %v6851_v43, %v9051_v41  ;;  %v2322_v21 = vpop.f32.mrb[61].mxu1 }
 0x245   : > { %v9072_v54 = vadd.f32 %v2322_v21, %v9061_v47  ;;  %v1928_v21 = vadd.s32 136, %v8972_v44 }
 0x246   : > { %2483 = vmax.xlane.f32.xlu0 %v9058_v45 }
 0x247   : > { %v6854_v49 = vpop.f32.mrb[62].mxu1 }
 0x248   : > { %v9075_v39 = vadd.f32 %v6854_v49, %v9064_v48  ;;  %v2332_v20 = vpop.f32.mrb[63].mxu1  ;;  %v1929_v49 = vadd.s32 144, %v8972_v44 }
 0x249   : > { %v9090_v51 = vadd.f32 %v2332_v20, %v9078_v55  ;;  %v9165_v20 = vsel %vm1989_vm13, 0.0, %v8103_v5 }
 0x24a   : > { %2487 = vmax.xlane.f32.xlu1 %v9075_v39  ;;  %2481 = vmax.xlane.f32.xlu0 %v9072_v54 }
 0x24b   : > { %v6857_v61 = vpop.f32.mrb[64].mxu1 }
 0x24c   : > { %v2342_v53 = vpop.f32.mrb[65].mxu1  ;;  %v9108_v14 = vadd.f32 %v6857_v61, %v9093_v2  ;;  %v1960_v61 = vand.u32 15, %v1928_v21  ;;  %v1965_v21 = vand.u32 15, %v1933_v31 }
 0x24d   : > { %v9096_v3 = vadd.f32 %v2342_v53, %v9084_v56  ;;  %v1961_v53 = vand.u32 15, %v1929_v49 }
 0x24e   : > { %2485 = vmax.xlane.f32.xlu1 %v9090_v51  ;;  %vm1993_vm2 = vcmp.eq.s32.totalorder %v1960_v61, %v8982_v50  ;;  %vm1998_vm7 = vcmp.eq.s32.totalorder %v1965_v21, %v8982_v50 }
 0x24f   : > { %v6860_v10 = vpop.f32.mrb[66].mxu1  ;;  %2489 = vmax.xlane.f32.xlu0 %v9096_v3  ;;  %vm1994_vm3 = vcmp.eq.s32.totalorder %v1961_v53, %v8982_v50  ;;  %v9201_v37 = vsel %vm1993_vm2, 0.0, %v8103_v5  ;;  %v1936_v53 = vadd.s32 200, %v8972_v44 }
 0x250   : > { %v2352_v16 = vpop.f32.mrb[67].mxu1  ;;  %v9126_v32 = vadd.f32 %v6860_v10, %v9111_v17  ;;  %v9209_v4 = vsel %vm1994_vm3, 0.0, %v8103_v5 }
 0x251   : > { %v9114_v19 = vadd.f32 %v2352_v16, %v9101_v57  ;;  %v9191_v16 = vsel %vm1992_vm1, 0.0, %v8103_v5  ;;  %v1968_v0 = vand.u32 15, %v1936_v53 }
 0x252   : > { %2491 = vmax.xlane.f32.xlu1 %v9108_v14 }
 0x253   : > { %v6863_v25 = vpop.f32.mrb[68].mxu1  ;;  %2493 = vmax.xlane.f32.xlu0 %v9114_v19  ;;  %vm2001_vm11 = vcmp.eq.s32.totalorder %v1968_v0, %v8982_v50 }
 0x254   : > { %v2362_v33 = vpop.f32.mrb[69].mxu1  ;;  %v9144_v1 = vadd.f32 %v6863_v25, %v9129_v34  ;;  %v9273_v0 = vsel %vm2001_vm11, 0.0, %v8103_v5 }
 0x255   : > { %v9132_v35 = vadd.f32 %v2362_v33, %v9119_v22 }
 0x256   : > { %2495 = vmax.xlane.f32.xlu1 %v9126_v32 }
 0x257   : > { %v6866_v38 = vpop.f32.mrb[70].mxu1  ;;  %2497 = vmax.xlane.f32.xlu0 %v9132_v35 }
 0x258   : > { %v2372_v42 = vpop.f32.mrb[71].mxu1  ;;  %v9162_v29 = vadd.f32 %v6866_v38, %v9147_v9 }
 0x259   : > { %v9150_v43 = vadd.f32 %v2372_v42, %v9137_v36  ;;  %v1934_v42 = vadd.s32 184, %v8972_v44 }
 0x25a   : > { %2499 = vmax.xlane.f32.xlu1 %v9144_v1 }
 0x25b   : > { %v6869_v27 = vpop.f32.mrb[72].mxu1  ;;  %2501 = vmax.xlane.f32.xlu0 %v9150_v43 }
 0x25c   : > { %v2382_v52 = vpop.f32.mrb[73].mxu1  ;;  %v9180_v8 = vadd.f32 %v6869_v27, %v9165_v20  ;;  %v1935_v27 = vadd.s32 192, %v8972_v44 }
 0x25d   : > { %v9168_v58 = vadd.f32 %v2382_v52, %v9155_v15  ;;  %v9219_v52 = vsel %vm1995_vm4, 0.0, %v8103_v5 }
 0x25e   : > { %2503 = vmax.xlane.f32.xlu1 %v9162_v29  ;;  %10878 = vst [vmem:[#allocation11_spill] sm:$0xff] %v9180_v8 }
 0x25f   : > { %10877 = vst [vmem:[#allocation10_spill] sm:$0xff] %v9168_v58  ;;  %v6872_v62 = vpop.f32.mrb[74].mxu1  ;;  %2505 = vmax.xlane.f32.xlu0 %v9168_v58 }
 0x260   : > { %v2392_v10 = vpop.f32.mrb[75].mxu1  ;;  %v9198_v33 = vadd.f32 %v6872_v62, %v9183_v11  ;;  %v1966_v62 = vand.u32 15, %v1934_v42  ;;  %v1938_v42 = vadd.s32 216, %v8972_v44 }
 0x261   : > { %v9186_v12 = vadd.f32 %v2392_v10, %v9173_v59  ;;  %v1967_v10 = vand.u32 15, %v1935_v27  ;;  %v1939_v27 = vadd.s32 224, %v8972_v44 }
 0x262   : > { %2507 = vmax.xlane.f32.xlu1 %v9180_v8  ;;  %10880 = vst [vmem:[#allocation13_spill] sm:$0xff] %v9198_v33  ;;  %vm1999_vm8 = vcmp.eq.s32.totalorder %v1966_v62, %v8982_v50 }
 0x263   : > { %10879 = vst [vmem:[#allocation12_spill] sm:$0xff] %v9186_v12  ;;  %v6875_v25 = vpop.f32.mrb[76].mxu1  ;;  %2509 = vmax.xlane.f32.xlu0 %v9186_v12  ;;  %vm2000_vm10 = vcmp.eq.s32.totalorder %v1967_v10, %v8982_v50  ;;  %v9255_v62 = vsel %vm1999_vm8, 0.0, %v8103_v5  ;;  %v1970_v10 = vand.u32 15, %v1938_v42 }
 0x264   : > { %v2402_v63 = vpop.f32.mrb[77].mxu1  ;;  %v9216_v30 = vadd.f32 %v6875_v25, %v9201_v37  ;;  %v9263_v53 = vsel %vm2000_vm10, 0.0, %v8103_v5 }
 0x265   : > { %v9204_v38 = vadd.f32 %v2402_v63, %v9191_v16  ;;  %v9245_v63 = vsel %vm1998_vm7, 0.0, %v8103_v5  ;;  %vm2003_vm13 = vcmp.eq.s32.totalorder %v1970_v10, %v8982_v50 }
 0x266   : > { %2511 = vmax.xlane.f32.xlu1 %v9198_v33  ;;  %10882 = vst [vmem:[#allocation15_spill] sm:$0xff] %v9216_v30 }
 0x267   : > { %10881 = vst [vmem:[#allocation14_spill] sm:$0xff] %v9204_v38  ;;  %v6878_v18 = vpop.f32.mrb[78].mxu1  ;;  %2513 = vmax.xlane.f32.xlu0 %v9204_v38 }
 0x268   : > { %v2412_v49 = vpop.f32.mrb[79].mxu1  ;;  %v9234_v24 = vadd.f32 %v6878_v18, %v9219_v52  ;;  %v1969_v18 = vand.u32 15, %v1937_v23  ;;  %v1940_v23 = vadd.s32 232, %v8972_v44  ;;  %v1973_v44 = vand.u32 15, %v1941_v60 }
 0x269   : > { %v9222_v61 = vadd.f32 %v2412_v49, %v9209_v4 }
 0x26a   : > { %2515 = vmax.xlane.f32.xlu1 %v9216_v30  ;;  %10884 = vst [vmem:[#allocation17_spill] sm:$0xff] %v9234_v24  ;;  %vm2002_vm12 = vcmp.eq.s32.totalorder %v1969_v18, %v8982_v50  ;;  %v1972_v18 = vand.u32 15, %v1940_v23  ;;  %vm2006_vm1 = vcmp.eq.s32.totalorder %v1973_v44, %v8982_v50 }
 0x26b   : > { %10883 = vst [vmem:[#allocation16_spill] sm:$0xff] %v9222_v61  ;;  %v6881_v7 = vpop.f32.mrb[80].mxu1  ;;  %2517 = vmax.xlane.f32.xlu0 %v9222_v61  ;;  %v9281_v42 = vsel %vm2002_vm12, 0.0, %v8103_v5 }
 0x26c   : > { %v2422_v25 = vpop.f32.mrb[81].mxu1  ;;  %v9252_v49 = vadd.f32 %v6881_v7, %v9237_v26  ;;  %v1971_v7 = vand.u32 15, %v1939_v27  ;;  %vm2005_vm15 = vcmp.eq.s32.totalorder %v1972_v18, %v8982_v50  ;;  %v9312_v18 = vsel %vm2006_vm1, 0.0, %v8103_v5 }
 0x26d   : > { %v9240_v31 = vadd.f32 %v2422_v25, %v9227_v46 }
 0x26e   : > { %2519 = vmax.xlane.f32.xlu1 %v9234_v24  ;;  %10886 = vst [vmem:[#allocation19_spill] sm:$0xff] %v9252_v49  ;;  %vm2004_vm14 = vcmp.eq.s32.totalorder %v1971_v7, %v8982_v50  ;;  %v9305_v7 = vsel %vm2005_vm15, 0.0, %v8103_v5 }
 0x26f   : > { %10885 = vst [vmem:[#allocation18_spill] sm:$0xff] %v9240_v31  ;;  %v6884_v21 = vpop.f32.mrb[82].mxu1  ;;  %2521 = vmax.xlane.f32.xlu0 %v9240_v31  ;;  %v9297_v10 = vsel %vm2004_vm14, 0.0, %v8103_v5 }
 0x270   : > { %v2432_v25 = vpop.f32.mrb[83].mxu1 }
 0x271   : > { %v9258_v40 = vadd.f32 %v2432_v25, %v9245_v63  ;;  %v9270_v25 = vadd.f32 %v6884_v21, %v9255_v62 }
 0x272   : > { %2523 = vmax.xlane.f32.xlu1 %v9252_v49 }
 0x273   : > { %10887 = vst [vmem:[#allocation20_spill] sm:$0xff] %v9258_v40  ;;  %v6887_v13 = vpop.f32.mrb[84].mxu1  ;;  %2525 = vmax.xlane.f32.xlu0 %v9258_v40  ;;  %10888 = vst [vmem:[#allocation21_spill] sm:$0xff] %v9270_v25 }
 0x274   : > { %v2442_v28 = vpop.f32.mrb[85].mxu1  ;;  %v9286_v21 = vadd.f32 %v6887_v13, %v9273_v0 }
 0x275   : > { %v9276_v49 = vadd.f32 %v2442_v28, %v9263_v53  ;;  %v9289_v28 = vsel %vm2003_vm13, 0.0, %v8103_v5 }
 0x276   : > { %2527 = vmax.xlane.f32.xlu1 %v9270_v25  ;;  %10890 = vst [vmem:[#allocation23_spill] sm:$0xff] %v9286_v21 }
 0x277   : > { %10889 = vst [vmem:[#allocation22_spill] sm:$0xff] %v9276_v49  ;;  %v6890_v27 = vpop.f32.mrb[86].mxu1  ;;  %2529 = vmax.xlane.f32.xlu0 %v9276_v49 }
 0x278   : > { %v2452_v40 = vpop.f32.mrb[87].mxu1  ;;  %v9302_v60 = vadd.f32 %v6890_v27, %v9289_v28 }
 0x279   : > { %v9292_v25 = vadd.f32 %v2452_v40, %v9281_v42 }
 0x27a   : > { %2531 = vmax.xlane.f32.xlu1 %v9286_v21  ;;  %10892 = vst [vmem:[#allocation25_spill] sm:$0xff] %v9302_v60 }
 0x27b   : > { %10891 = vst [vmem:[#allocation24_spill] sm:$0xff] %v9292_v25  ;;  %v6893_v23 = vpop.f32.mrb[88].mxu1  ;;  %2533 = vmax.xlane.f32.xlu0 %v9292_v25 }
 0x27c   : > { %v2462_v13 = vpop.f32.mrb[89].mxu1  ;;  %v9316_v50 = vadd.f32 %v6893_v23, %v9305_v7 }
 0x27d   : > { %v9308_v40 = vadd.f32 %v2462_v13, %v9297_v10 }
 0x27e   : > { %2535 = vmax.xlane.f32.xlu1 %v9302_v60  ;;  %10894 = vst [vmem:[#allocation27_spill] sm:$0xff] %v9316_v50 }
 0x27f   : > { %10893 = vst [vmem:[#allocation26_spill] sm:$0xff] %v9308_v40  ;;  %v6896_v21 = vpop.f32.mrb[90].mxu1  ;;  %2537 = vmax.xlane.f32.xlu0 %v9308_v40 }
 0x280   : > { %v2472_v27 = vpop.f32.mrb[91].mxu1  ;;  %v9324_v13 = vadd.f32 %v6896_v21, %v8990_v6 }
 0x281   : > { %v9319_v44 = vadd.f32 %v2472_v27, %v9312_v18 }
 0x282   : > { %2539 = vmax.xlane.f32.xlu1 %v9316_v50  ;;  %10896 = vst [vmem:[#allocation29_spill] sm:$0xff] %v9324_v13 }
 0x283   : > { %10895 = vst [vmem:[#allocation28_spill] sm:$0xff] %v9319_v44  ;;  %v7011_v25 = vpop.f32.mrb[92].mxu1  ;;  %2541 = vmax.xlane.f32.xlu0 %v9319_v44 }
 0x284   : > { %v3340_v5 = vpop.f32.mrb[93].mxu1  ;;  %v9332_v27 = vadd.f32 %v7011_v25, %v9051_v41 }
 0x285   : > { %v9327_v60 = vadd.f32 %v3340_v5, %v9061_v47 }
 0x286   : > { %2543 = vmax.xlane.f32.xlu1 %v9324_v13  ;;  %10898 = vst [vmem:[#allocation31_spill] sm:$0xff] %v9332_v27 }
 0x287   : > { %10897 = vst [vmem:[#allocation30_spill] sm:$0xff] %v9327_v60  ;;  %v7014_v23 = vpop.f32.mrb[94].mxu1  ;;  %3499 = vmax.xlane.f32.xlu0 %v9327_v60 }
 0x288   : > { %v3350_v40 = vpop.f32.mrb[95].mxu1  ;;  %v9340_v5 = vadd.f32 %v7014_v23, %v9064_v48 }
 0x289   : > { %v9335_v50 = vadd.f32 %v3350_v40, %v9078_v55 }
 0x28a   : > { %3501 = vmax.xlane.f32.xlu1 %v9332_v27  ;;  %10900 = vst [vmem:[#allocation33_spill] sm:$0xff] %v9340_v5 }
 0x28b   : > { %10899 = vst [vmem:[#allocation32_spill] sm:$0xff] %v9335_v50  ;;  %v7017_v21 = vpop.f32.mrb[96].mxu1  ;;  %3503 = vmax.xlane.f32.xlu0 %v9335_v50 }
 0x28c   : > { %v3360_v44 = vpop.f32.mrb[97].mxu1  ;;  %v9348_v40 = vadd.f32 %v7017_v21, %v9093_v2 }
 0x28d   : > { %v9343_v13 = vadd.f32 %v3360_v44, %v9084_v56 }
 0x28e   : > { %3505 = vmax.xlane.f32.xlu1 %v9340_v5  ;;  %10902 = vst [vmem:[#allocation35_spill] sm:$0xff] %v9348_v40  ;;  %v6747_v5 = vpop.f32.mrb[12].mxu0 }
 0x28f   : > { %10901 = vst [vmem:[#allocation34_spill] sm:$0xff] %v9343_v13  ;;  %v7020_v25 = vpop.f32.mrb[98].mxu1  ;;  %3507 = vmax.xlane.f32.xlu0 %v9343_v13  ;;  %v9361_v13 = vld [vmem:[%s10756_s4 + $0x2] ss:$0 sm:$0xff]  ;;  %v1553_v49 = vpop.f32.mrb[13].mxu0 }
 0x290   : > { %v3370_v60 = vpop.f32.mrb[99].mxu1  ;;  %v9356_v44 = vadd.f32 %v7020_v25, %v9111_v17 }
 0x291   : > { %v9351_v27 = vadd.f32 %v3370_v60, %v9101_v57  ;;  %v1559_v60 = vadd.f32 %v6747_v5, %v9361_v13 }
 0x292   : > { %3509 = vmax.xlane.f32.xlu1 %v9348_v40  ;;  %10904 = vst [vmem:[#allocation37_spill] sm:$0xff] %v9356_v44  ;;  %v6750_v40 = vpop.f32.mrb[14].mxu0 }
 0x293   : > { %10903 = vst [vmem:[#allocation36_spill] sm:$0xff] %v9351_v27  ;;  %v7023_v23 = vpop.f32.mrb[100].mxu1  ;;  %3511 = vmax.xlane.f32.xlu0 %v9351_v27  ;;  %v1554_v27 = vadd.f32 %v9361_v13, %v1553_v49  ;;  %v1793_v31 = vmax.f32 %v1559_v60, 0.0  ;;  %v1569_v24 = vadd.f32 %v6750_v40, %v9361_v13  ;;  %v1563_v61 = vpop.f32.mrb[15].mxu0 }
 0x294   : > { %v3380_v50 = vpop.f32.mrb[101].mxu1  ;;  %v9372_v30 = vadd.f32 %v7023_v23, %v9129_v34  ;;  %v1564_v5 = vadd.f32 %v9361_v13, %v1563_v61  ;;  %v6753_v33 = vpop.f32.mrb[16].mxu0 }
 0x295   : > { %v9364_v21 = vadd.f32 %v3380_v50, %v9119_v22  ;;  %v1792_v38 = vmax.f32 %v1554_v27, 0.0  ;;  %1841 = vst.msk [vmem:[#allocation4 + $0x8] sm:$0xff] %vm387_vm0, %v1793_v31  ;;  %v1795_v49 = vmax.f32 %v1569_v24, 0.0  ;;  %v1573_v60 = vpop.f32.mrb[17].mxu0 }
 0x296   : > { %3513 = vmax.xlane.f32.xlu1 %v9356_v44  ;;  %10906 = vst [vmem:[#allocation39_spill] sm:$0xff] %v9372_v30  ;;  %v1794_v40 = vmax.f32 %v1564_v5, 0.0  ;;  %v1574_v23 = vadd.f32 %v9361_v13, %v1573_v60  ;;  %v6756_v27 = vpop.f32.mrb[18].mxu0 }
 0x297   : > { %10905 = vst [vmem:[#allocation38_spill] sm:$0xff] %v9364_v21  ;;  %v7026_v25 = vpop.f32.mrb[102].mxu1  ;;  %3515 = vmax.xlane.f32.xlu0 %v9364_v21  ;;  %v1579_v21 = vadd.f32 %v6753_v33, %v9361_v13  ;;  %1840 = vst.msk [vmem:[#allocation4] sm:$0xff] %vm387_vm0, %v1792_v38  ;;  %v1589_v31 = vadd.f32 %v6756_v27, %v9361_v13  ;;  %v1583_v24 = vpop.f32.mrb[19].mxu0 }
 0x298   : > { %v3390_v50 = vpop.f32.mrb[103].mxu1  ;;  %1843 = vst.msk [vmem:[#allocation4 + $0x18] sm:$0xff] %vm387_vm0, %v1795_v49  ;;  %v9387_v33 = vadd.f32 %v7026_v25, %v9147_v9  ;;  %1842 = vst.msk [vmem:[#allocation4 + $0x10] sm:$0xff] %vm387_vm0, %v1794_v40  ;;  %v1796_v38 = vmax.f32 %v1574_v23, 0.0  ;;  %v1584_v5 = vadd.f32 %v9361_v13, %v1583_v24  ;;  %v6759_v60 = vpop.f32.mrb[20].mxu0 }
 0x299   : > { %v9376_v44 = vadd.f32 %v3390_v50, %v9137_v36  ;;  %v1797_v61 = vmax.f32 %v1579_v21, 0.0  ;;  %v1799_v49 = vmax.f32 %v1589_v31, 0.0  ;;  %v1599_v21 = vadd.f32 %v6759_v60, %v9361_v13  ;;  %v1593_v27 = vpop.f32.mrb[21].mxu0 }
 0x29a   : > { %3517 = vmax.xlane.f32.xlu1 %v9372_v30  ;;  %10908 = vst [vmem:[#allocation41_spill] sm:$0xff] %v9387_v33  ;;  %1844 = vst.msk [vmem:[#allocation4 + $0x20] sm:$0xff] %vm387_vm0, %v1796_v38  ;;  %v1798_v25 = vmax.f32 %v1584_v5, 0.0  ;;  %v1594_v40 = vadd.f32 %v9361_v13, %v1593_v27  ;;  %v6762_v23 = vpop.f32.mrb[22].mxu0 }
 0x29b   : > { %10907 = vst [vmem:[#allocation40_spill] sm:$0xff] %v9376_v44  ;;  %v7029_v12 = vpop.f32.mrb[104].mxu1  ;;  %3519 = vmax.xlane.f32.xlu0 %v9376_v44  ;;  %1845 = vst.msk [vmem:[#allocation4 + $0x28] sm:$0xff] %vm387_vm0, %v1797_v61  ;;  %v1801_v24 = vmax.f32 %v1599_v21, 0.0  ;;  %v1609_v61 = vadd.f32 %v6762_v23, %v9361_v13  ;;  %v1603_v31 = vpop.f32.mrb[23].mxu0 }
 0x29c   : > { %v3400_v50 = vpop.f32.mrb[105].mxu1  ;;  %1847 = vst.msk [vmem:[#allocation4 + $0x38] sm:$0xff] %vm387_vm0, %v1799_v49  ;;  %1846 = vst.msk [vmem:[#allocation4 + $0x30] sm:$0xff] %vm387_vm0, %v1798_v25  ;;  %v1800_v38 = vmax.f32 %v1594_v40, 0.0  ;;  %v1604_v5 = vadd.f32 %v9361_v13, %v1603_v31  ;;  %v6765_v27 = vpop.f32.mrb[24].mxu0  ;;  %v2065_v8 = vld [vmem:[#allocation4 + $0x8] sm:$0xff] }
 0x29d   : > { %v9392_v30 = vadd.f32 %v3400_v50, %v9155_v15  ;;  %v9403_v50 = vadd.f32 %v7029_v12, %v9165_v20  ;;  %1849 = vst.msk [vmem:[#allocation4 + $0x48] sm:$0xff] %vm387_vm0, %v1801_v24  ;;  %v1803_v49 = vmax.f32 %v1609_v61, 0.0  ;;  %v1619_v21 = vadd.f32 %v6765_v27, %v9361_v13  ;;  %v1613_v23 = vpop.f32.mrb[25].mxu0 }
 0x29e   : > { %3521 = vmax.xlane.f32.xlu1 %v9387_v33  ;;  %1848 = vst.msk [vmem:[#allocation4 + $0x40] sm:$0xff] %vm387_vm0, %v1800_v38  ;;  %v1802_v12 = vmax.f32 %v1604_v5, 0.0  ;;  %v1614_v25 = vadd.f32 %v9361_v13, %v1613_v23  ;;  %v6768_v40 = vpop.f32.mrb[26].mxu0 }
 0x29f   : > { %10909 = vst [vmem:[#allocation42_spill] sm:$0xff] %v9392_v30  ;;  %v7032_v44 = vpop.f32.mrb[106].mxu1  ;;  %3523 = vmax.xlane.f32.xlu0 %v9392_v30  ;;  %10910 = vst [vmem:[#allocation43_spill] sm:$0xff] %v9403_v50  ;;  %v1805_v31 = vmax.f32 %v1619_v21, 0.0  ;;  %v1629_v24 = vadd.f32 %v6768_v40, %v9361_v13  ;;  %v1623_v61 = vpop.f32.mrb[27].mxu0 }
 0x2a0   : > { %v3410_v60 = vpop.f32.mrb[107].mxu1  ;;  %1851 = vst.msk [vmem:[#allocation4 + $0x58] sm:$0xff] %vm387_vm0, %v1803_v49  ;;  %1850 = vst.msk [vmem:[#allocation4 + $0x50] sm:$0xff] %vm387_vm0, %v1802_v12  ;;  %v1804_v38 = vmax.f32 %v1614_v25, 0.0  ;;  %v1624_v5 = vadd.f32 %v9361_v13, %v1623_v61  ;;  %v6771_v23 = vpop.f32.mrb[28].mxu0 }
 0x2a1   : > { %v9408_v33 = vadd.f32 %v3410_v60, %v9173_v59  ;;  %v9419_v60 = vadd.f32 %v7032_v44, %v9183_v11  ;;  %1853 = vst.msk [vmem:[#allocation4 + $0x68] sm:$0xff] %vm387_vm0, %v1805_v31  ;;  %v1807_v49 = vmax.f32 %v1629_v24, 0.0  ;;  %v1639_v21 = vadd.f32 %v6771_v23, %v9361_v13  ;;  %v1633_v40 = vpop.f32.mrb[29].mxu0 }
 0x2a2   : > { %3525 = vmax.xlane.f32.xlu1 %v9403_v50  ;;  %1852 = vst.msk [vmem:[#allocation4 + $0x60] sm:$0xff] %vm387_vm0, %v1804_v38  ;;  %v1806_v44 = vmax.f32 %v1624_v5, 0.0  ;;  %v1634_v12 = vadd.f32 %v9361_v13, %v1633_v40  ;;  %v6774_v25 = vpop.f32.mrb[30].mxu0 }
 0x2a3   : > { %10911 = vst [vmem:[#allocation44_spill] sm:$0xff] %v9408_v33  ;;  %v7035_v30 = vpop.f32.mrb[108].mxu1  ;;  %3527 = vmax.xlane.f32.xlu0 %v9408_v33  ;;  %10912 = vst [vmem:[#allocation45_spill] sm:$0xff] %v9419_v60  ;;  %v1809_v61 = vmax.f32 %v1639_v21, 0.0  ;;  %v1649_v31 = vadd.f32 %v6774_v25, %v9361_v13  ;;  %v1643_v24 = vpop.f32.mrb[31].mxu0 }
 0x2a4   : > { %v3420_v27 = vpop.f32.mrb[109].mxu1  ;;  %1855 = vst.msk [vmem:[#allocation4 + $0x78] sm:$0xff] %vm387_vm0, %v1807_v49  ;;  %1854 = vst.msk [vmem:[#allocation4 + $0x70] sm:$0xff] %vm387_vm0, %v1806_v44  ;;  %v1808_v38 = vmax.f32 %v1634_v12, 0.0  ;;  %v1644_v5 = vadd.f32 %v9361_v13, %v1643_v24  ;;  %v6777_v40 = vpop.f32.mrb[32].mxu0 }
 0x2a5   : > { %v9424_v50 = vadd.f32 %v3420_v27, %v9191_v16  ;;  %v9435_v27 = vadd.f32 %v7035_v30, %v9201_v37  ;;  %1857 = vst.msk [vmem:[#allocation4 + $0x88] sm:$0xff] %vm387_vm0, %v1809_v61  ;;  %v1811_v49 = vmax.f32 %v1649_v31, 0.0  ;;  %v1659_v21 = vadd.f32 %v6777_v40, %v9361_v13  ;;  %v1653_v25 = vpop.f32.mrb[33].mxu0 }
 0x2a6   : > { %3529 = vmax.xlane.f32.xlu1 %v9419_v60  ;;  %1856 = vst.msk [vmem:[#allocation4 + $0x80] sm:$0xff] %vm387_vm0, %v1808_v38  ;;  %v1810_v30 = vmax.f32 %v1644_v5, 0.0  ;;  %v1654_v44 = vadd.f32 %v9361_v13, %v1653_v25  ;;  %v6780_v12 = vpop.f32.mrb[34].mxu0 }
 0x2a7   : > { %10913 = vst [vmem:[#allocation46_spill] sm:$0xff] %v9424_v50  ;;  %v7038_v33 = vpop.f32.mrb[110].mxu1  ;;  %3531 = vmax.xlane.f32.xlu0 %v9424_v50  ;;  %10914 = vst [vmem:[#allocation47_spill] sm:$0xff] %v9435_v27  ;;  %v1813_v24 = vmax.f32 %v1659_v21, 0.0  ;;  %v1669_v61 = vadd.f32 %v6780_v12, %v9361_v13  ;;  %v1663_v31 = vpop.f32.mrb[35].mxu0 }
 0x2a8   : > { %v3430_v23 = vpop.f32.mrb[111].mxu1  ;;  %1859 = vst.msk [vmem:[#allocation4 + $0x98] sm:$0xff] %vm387_vm0, %v1811_v49  ;;  %1858 = vst.msk [vmem:[#allocation4 + $0x90] sm:$0xff] %vm387_vm0, %v1810_v30  ;;  %v1812_v38 = vmax.f32 %v1654_v44, 0.0  ;;  %v1664_v5 = vadd.f32 %v9361_v13, %v1663_v31  ;;  %v6783_v25 = vpop.f32.mrb[36].mxu0 }
 0x2a9   : > { %v9440_v60 = vadd.f32 %v3430_v23, %v9209_v4  ;;  %v9451_v23 = vadd.f32 %v7038_v33, %v9219_v52  ;;  %1861 = vst.msk [vmem:[#allocation4 + $0xa8] sm:$0xff] %vm387_vm0, %v1813_v24  ;;  %v1815_v49 = vmax.f32 %v1669_v61, 0.0  ;;  %v1679_v21 = vadd.f32 %v6783_v25, %v9361_v13  ;;  %v1673_v12 = vpop.f32.mrb[37].mxu0 }
 0x2aa   : > { %3533 = vmax.xlane.f32.xlu1 %v9435_v27  ;;  %1860 = vst.msk [vmem:[#allocation4 + $0xa0] sm:$0xff] %vm387_vm0, %v1812_v38  ;;  %v1814_v33 = vmax.f32 %v1664_v5, 0.0  ;;  %v1674_v30 = vadd.f32 %v9361_v13, %v1673_v12  ;;  %v6786_v44 = vpop.f32.mrb[38].mxu0 }
 0x2ab   : > { %10915 = vst [vmem:[#allocation48_spill] sm:$0xff] %v9440_v60  ;;  %v7041_v50 = vpop.f32.mrb[112].mxu1  ;;  %3535 = vmax.xlane.f32.xlu0 %v9440_v60  ;;  %10916 = vst [vmem:[#allocation49_spill] sm:$0xff] %v9451_v23  ;;  %v1817_v31 = vmax.f32 %v1679_v21, 0.0  ;;  %v1689_v24 = vadd.f32 %v6786_v44, %v9361_v13  ;;  %v1683_v61 = vpop.f32.mrb[39].mxu0 }
 0x2ac   : > { %v3440_v40 = vpop.f32.mrb[113].mxu1  ;;  %1863 = vst.msk [vmem:[#allocation4 + $0xb8] sm:$0xff] %vm387_vm0, %v1815_v49  ;;  %1862 = vst.msk [vmem:[#allocation4 + $0xb0] sm:$0xff] %vm387_vm0, %v1814_v33  ;;  %v1816_v38 = vmax.f32 %v1674_v30, 0.0  ;;  %v1684_v5 = vadd.f32 %v9361_v13, %v1683_v61  ;;  %v6789_v12 = vpop.f32.mrb[40].mxu0 }
 0x2ad   : > { %v9456_v27 = vadd.f32 %v3440_v40, %v9227_v46  ;;  %v9467_v40 = vadd.f32 %v7041_v50, %v9237_v26  ;;  %1865 = vst.msk [vmem:[#allocation4 + $0xc8] sm:$0xff] %vm387_vm0, %v1817_v31  ;;  %v1819_v49 = vmax.f32 %v1689_v24, 0.0  ;;  %v1699_v21 = vadd.f32 %v6789_v12, %v9361_v13  ;;  %v1693_v44 = vpop.f32.mrb[41].mxu0 }
 0x2ae   : > { %3537 = vmax.xlane.f32.xlu1 %v9451_v23  ;;  %1864 = vst.msk [vmem:[#allocation4 + $0xc0] sm:$0xff] %vm387_vm0, %v1816_v38  ;;  %v1818_v50 = vmax.f32 %v1684_v5, 0.0  ;;  %v1694_v33 = vadd.f32 %v9361_v13, %v1693_v44  ;;  %v6792_v30 = vpop.f32.mrb[42].mxu0 }
 0x2af   : > { %10917 = vst [vmem:[#allocation50_spill] sm:$0xff] %v9456_v27  ;;  %v7044_v60 = vpop.f32.mrb[114].mxu1  ;;  %3539 = vmax.xlane.f32.xlu0 %v9456_v27  ;;  %10918 = vst [vmem:[#allocation51_spill] sm:$0xff] %v9467_v40  ;;  %v2064_v27 = vld [vmem:[#allocation4] sm:$0xff]  ;;  %v1821_v31 = vmax.f32 %v1699_v21, 0.0  ;;  %v1709_v24 = vadd.f32 %v6792_v30, %v9361_v13  ;;  %v2067_v30 = vld [vmem:[#allocation4 + $0x38] sm:$0xff] }
 0x2b0   : > { %v3450_v25 = vpop.f32.mrb[115].mxu1  ;;  %v7453_v61 = vpack.c.bf16 %v2065_v8, %v2064_v27  ;;  %1867 = vst.msk [vmem:[#allocation4 + $0xd8] sm:$0xff] %vm387_vm0, %v1819_v49  ;;  %v9483_v12 = vadd.f32 %v7044_v60, %v9255_v62  ;;  %1866 = vst.msk [vmem:[#allocation4 + $0xd0] sm:$0xff] %vm387_vm0, %v1818_v50  ;;  %v1820_v38 = vmax.f32 %v1694_v33, 0.0  ;;  %v2066_v60 = vld [vmem:[#allocation4 + $0x30] sm:$0xff] }
 0x2b1   : > { %v9472_v23 = vadd.f32 %v3450_v25, %v9245_v63  ;;  %v1703_v25 = vpop.f32.mrb[43].mxu0  ;;  %1869 = vst.msk [vmem:[#allocation4 + $0xe8] sm:$0xff] %vm387_vm0, %v1821_v31  ;;  %v1823_v49 = vmax.f32 %v1709_v24, 0.0 }
 0x2b2   : > { %3541 = vmax.xlane.f32.xlu1 %v9467_v40  ;;  %10920 = vst [vmem:[#allocation53_spill] sm:$0xff] %v9483_v12  ;;  %7454 = vmatprep.subr.bf16.mxu0 %v7453_v61  ;;  %v1704_v5 = vadd.f32 %v9361_v13, %v1703_v25  ;;  %v6795_v8 = vpop.f32.mrb[44].mxu0  ;;  %1868 = vst.msk [vmem:[#allocation4 + $0xe0] sm:$0xff] %vm387_vm0, %v1820_v38 }
 0x2b3   : > { %10919 = vst [vmem:[#allocation52_spill] sm:$0xff] %v9472_v23  ;;  %v7047_v58 = vpop.f32.mrb[116].mxu1  ;;  %3543 = vmax.xlane.f32.xlu0 %v9472_v23  ;;  %7456 = vmatpush3.bf16.msra.mxu0 %v7453_v61  ;;  %v1719_v21 = vadd.f32 %v6795_v8, %v9361_v13  ;;  %v1713_v44 = vpop.f32.mrb[45].mxu0  ;;  %v7457_v23 = vpack.c.bf16 %v2067_v30, %v2066_v60  ;;  %1871 = vst.msk [vmem:[#allocation4 + $0xf8] sm:$0xff] %vm387_vm0, %v1823_v49 }
 0x2b4   : > { %v3460_v40 = vpop.f32.mrb[117].mxu1  ;;  %v1822_v50 = vmax.f32 %v1704_v5, 0.0  ;;  %v1714_v33 = vadd.f32 %v9361_v13, %v1713_v44  ;;  %v6798_v25 = vpop.f32.mrb[46].mxu0  ;;  %v9499_v8 = vadd.f32 %v7047_v58, %v9273_v0  ;;  %v2068_v58 = vld [vmem:[#allocation4 + $0x60] sm:$0xff] }
 0x2b5   : > { %v9488_v27 = vadd.f32 %v3460_v40, %v9263_v53  ;;  %v1825_v61 = vmax.f32 %v1719_v21, 0.0  ;;  %v1729_v31 = vadd.f32 %v6798_v25, %v9361_v13  ;;  %v1723_v24 = vpop.f32.mrb[47].mxu0  ;;  %7458 = vmatprep.subr.bf16.mxu0 %v7457_v23  ;;  %v2069_v25 = vld [vmem:[#allocation4 + $0x68] sm:$0xff] }
 0x2b6   : > { %3545 = vmax.xlane.f32.xlu1 %v9483_v12  ;;  %10922 = vst [vmem:[#allocation55_spill] sm:$0xff] %v9499_v8  ;;  %1870 = vst.msk [vmem:[#allocation4 + $0xf0] sm:$0xff] %vm387_vm0, %v1822_v50  ;;  %v1824_v38 = vmax.f32 %v1714_v33, 0.0  ;;  %v1724_v5 = vadd.f32 %v9361_v13, %v1723_v24  ;;  %v6801_v44 = vpop.f32.mrb[48].mxu0 }
 0x2b7   : > { %10921 = vst [vmem:[#allocation54_spill] sm:$0xff] %v9488_v27  ;;  %v7050_v40 = vpop.f32.mrb[118].mxu1  ;;  %3547 = vmax.xlane.f32.xlu0 %v9488_v27  ;;  %1873 = vst.msk [vmem:[#allocation4 + $0x108] sm:$0xff] %vm387_vm0, %v1825_v61  ;;  %v1827_v49 = vmax.f32 %v1729_v31, 0.0  ;;  %7460 = vmatpush3.bf16.msra.mxu0 %v7457_v23  ;;  %v1739_v21 = vadd.f32 %v6801_v44, %v9361_v13  ;;  %v1733_v30 = vpop.f32.mrb[49].mxu0  ;;  %v7461_v27 = vpack.c.bf16 %v2069_v25, %v2068_v58 }
 0x2b8   : > { %v3470_v12 = vpop.f32.mrb[119].mxu1  ;;  %1872 = vst.msk [vmem:[#allocation4 + $0x100] sm:$0xff] %vm387_vm0, %v1824_v38  ;;  %v1826_v50 = vmax.f32 %v1724_v5, 0.0  ;;  %v1734_v33 = vadd.f32 %v9361_v13, %v1733_v30  ;;  %v6804_v24 = vpop.f32.mrb[50].mxu0  ;;  %v9515_v44 = vadd.f32 %v7050_v40, %v9289_v28  ;;  %v2070_v40 = vld [vmem:[#allocation4 + $0x90] sm:$0xff] }
 0x2b9   : > { %v9504_v60 = vadd.f32 %v3470_v12, %v9281_v42  ;;  %1875 = vst.msk [vmem:[#allocation4 + $0x118] sm:$0xff] %vm387_vm0, %v1827_v49  ;;  %v1829_v23 = vmax.f32 %v1739_v21, 0.0  ;;  %v1749_v61 = vadd.f32 %v6804_v24, %v9361_v13  ;;  %v1743_v31 = vpop.f32.mrb[51].mxu0  ;;  %7462 = vmatprep.subr.bf16.mxu0 %v7461_v27  ;;  %v2071_v24 = vld [vmem:[#allocation4 + $0x98] sm:$0xff] }
 0x2ba   : > { %3549 = vmax.xlane.f32.xlu1 %v9499_v8  ;;  %10924 = vst [vmem:[#allocation57_spill] sm:$0xff] %v9515_v44  ;;  %1874 = vst.msk [vmem:[#allocation4 + $0x110] sm:$0xff] %vm387_vm0, %v1826_v50  ;;  %v1828_v38 = vmax.f32 %v1734_v33, 0.0  ;;  %v1744_v5 = vadd.f32 %v9361_v13, %v1743_v31  ;;  %v6807_v30 = vpop.f32.mrb[52].mxu0  ;;  %v7465_v31 = vpack.c.bf16 %v2071_v24, %v2070_v40  ;;  %v2073_v24 = vld [vmem:[#allocation4 + $0xc8] sm:$0xff] }
 0x2bb   : > { %10923 = vst [vmem:[#allocation56_spill] sm:$0xff] %v9504_v60  ;;  %v7053_v12 = vpop.f32.mrb[120].mxu1  ;;  %3551 = vmax.xlane.f32.xlu0 %v9504_v60  ;;  %1877 = vst.msk [vmem:[#allocation4 + $0x128] sm:$0xff] %vm387_vm0, %v1829_v23  ;;  %v1831_v49 = vmax.f32 %v1749_v61, 0.0  ;;  %7464 = vmatpush3.bf16.msra.mxu0 %v7461_v27  ;;  %v1759_v21 = vadd.f32 %v6807_v30, %v9361_v13  ;;  %v1753_v25 = vpop.f32.mrb[53].mxu0  ;;  %v1336_v60 = vld [vmem:[%s8643_s11 + $0x170] sm:$0xff] }
 0x2bc   : > { %v3480_v8 = vpop.f32.mrb[121].mxu1  ;;  %1876 = vst.msk [vmem:[#allocation4 + $0x120] sm:$0xff] %vm387_vm0, %v1828_v38  ;;  %v1830_v50 = vmax.f32 %v1744_v5, 0.0  ;;  %v1754_v33 = vadd.f32 %v9361_v13, %v1753_v25  ;;  %6814 = vmatprep.mubr.msk.f32.mxu0 %vm1342_vm9, %v1336_v60  ;;  %7466 = vmatprep.subr.bf16.mxu0 %v7465_v31  ;;  %v1337_v60 = vld [vmem:[%s8643_s11 + $0x178] sm:$0xff] }
 0x2bd   : > { %v9520_v58 = vadd.f32 %v3480_v8, %v9297_v10  ;;  %v6810_v8 = vpop.f32.mrb[54].mxu0  ;;  %1879 = vst.msk [vmem:[#allocation4 + $0x138] sm:$0xff] %vm387_vm0, %v1831_v49  ;;  %v1833_v27 = vmax.f32 %v1759_v21, 0.0  ;;  %v2072_v21 = vld [vmem:[#allocation4 + $0xc0] sm:$0xff]  ;;  %6815 = vmatmul.mubr.msk.f32.gmra.mrb[58].mxu0 %vm1342_vm9, %v1337_v60 }
 0x2be   : > { %3553 = vmax.xlane.f32.xlu1 %v9515_v44  ;;  %v1769_v61 = vadd.f32 %v6810_v8, %v9361_v13  ;;  %v1763_v30 = vpop.f32.mrb[55].mxu0  ;;  %v9533_v44 = vadd.f32 %v7053_v12, %v9305_v7  ;;  %1878 = vst.msk [vmem:[#allocation4 + $0x130] sm:$0xff] %vm387_vm0, %v1830_v50  ;;  %v1832_v5 = vmax.f32 %v1754_v33, 0.0  ;;  %v7469_v50 = vpack.c.bf16 %v2073_v24, %v2072_v21 }
 0x2bf   : > { %v7056_v23 = vpop.f32.mrb[122].mxu1  ;;  %3555 = vmax.xlane.f32.xlu0 %v9520_v58  ;;  %v1764_v25 = vadd.f32 %v9361_v13, %v1763_v30  ;;  %1881 = vst.msk [vmem:[#allocation4 + $0x148] sm:$0xff] %vm387_vm0, %v1833_v27  ;;  %7468 = vmatpush3.bf16.msra.mxu0 %v7465_v31  ;;  %v2075_v30 = vld [vmem:[#allocation4 + $0xf8] sm:$0xff] }
 0x2c0   : > { %v3490_v38 = vpop.f32.mrb[123].mxu1  ;;  %v1835_v49 = vmax.f32 %v1769_v61, 0.0  ;;  %1880 = vst.msk [vmem:[#allocation4 + $0x140] sm:$0xff] %vm387_vm0, %v1832_v5  ;;  %v9548_v8 = vadd.f32 %v7056_v23, %v8990_v6  ;;  %7470 = vmatprep.subr.bf16.mxu0 %v7469_v50  ;;  %v2074_v61 = vld [vmem:[#allocation4 + $0xf0] sm:$0xff] }
 0x2c1   : > { %v9539_v40 = vadd.f32 %v3490_v38, %v9312_v18  ;;  %v1834_v12 = vmax.f32 %v1764_v25, 0.0  ;;  %v7473_v38 = vpack.c.bf16 %v2075_v30, %v2074_v61 }
 0x2c2   : > { %3557 = vmax.xlane.f32.xlu1 %v9533_v44  ;;  %1883 = vst.msk [vmem:[#allocation4 + $0x158] sm:$0xff] %vm387_vm0, %v1835_v49  ;;  %v2077_v49 = vld [vmem:[#allocation4 + $0x128] sm:$0xff] }
 0x2c3   : > { %v7171_v33 = vpop.f32.mrb[124].mxu1  ;;  %3559 = vmax.xlane.f32.xlu0 %v9539_v40  ;;  %1882 = vst.msk [vmem:[#allocation4 + $0x150] sm:$0xff] %vm387_vm0, %v1834_v12  ;;  %7472 = vmatpush3.bf16.msra.mxu0 %v7469_v50 }
 0x2c4   : > { %v4358_v27 = vpop.f32.mrb[125].mxu1  ;;  %v9557_v25 = vadd.f32 %v7171_v33, %v9051_v41  ;;  %7474 = vmatprep.subr.bf16.mxu0 %v7473_v38 }
 0x2c5   : > { %v9552_v31 = vadd.f32 %v4358_v27, %v9061_v47  ;;  %v2076_v47 = vld [vmem:[#allocation4 + $0x120] sm:$0xff] }
 0x2c6   : > { %3561 = vmax.xlane.f32.xlu1 %v9548_v8  ;;  %v7477_v21 = vpack.c.bf16 %v2077_v49, %v2076_v47 }
 0x2c7   : > { %v7174_v5 = vpop.f32.mrb[126].mxu1  ;;  %4517 = vmax.xlane.f32.xlu0 %v9552_v31  ;;  %7476 = vmatpush3.bf16.msra.mxu0 %v7473_v38 }
 0x2c8   : > { %v4368_v23 = vpop.f32.mrb[127].mxu1  ;;  %v9565_v12 = vadd.f32 %v7174_v5, %v9064_v48  ;;  %7478 = vmatprep.subr.bf16.mxu0 %v7477_v21  ;;  %v3082_v48 = vld [vmem:[#allocation4 + $0x10] sm:$0xff]  ;;  %v3083_v5 = vld [vmem:[#allocation4 + $0x18] sm:$0xff] }
 0x2c9   : > { %v9560_v60 = vadd.f32 %v4368_v23, %v9078_v55  ;;  %v2079_v33 = vld [vmem:[#allocation4 + $0x158] sm:$0xff] }
 0x2ca   : > { %4519 = vmax.xlane.f32.xlu1 %v9557_v25  ;;  %v2078_v55 = vld [vmem:[#allocation4 + $0x150] sm:$0xff] }
 0x2cb   : > { %v7177_v24 = vpop.f32.mrb[128].mxu1  ;;  %4521 = vmax.xlane.f32.xlu0 %v9560_v60  ;;  %7480 = vmatpush3.bf16.msra.mxu0 %v7477_v21  ;;  %v7481_v27 = vpack.c.bf16 %v2079_v33, %v2078_v55 }
 0x2cc   : > { %v4378_v50 = vpop.f32.mrb[129].mxu1  ;;  %v9573_v30 = vadd.f32 %v7177_v24, %v9093_v2 }
 0x2cd   : > { %v9568_v41 = vadd.f32 %v4378_v50, %v9084_v56  ;;  %7482 = vmatprep.subr.bf16.mxu0 %v7481_v27  ;;  %v9578_v56 = vpack.c.bf16 %v3083_v5, %v3082_v48 }
 0x2ce   : > { %4523 = vmax.xlane.f32.xlu1 %v9565_v12 }
 0x2cf   : > { %v7180_v61 = vpop.f32.mrb[130].mxu1  ;;  %4525 = vmax.xlane.f32.xlu0 %v9568_v41  ;;  %7484 = vmatpush3.bf16.msra.mxu0 %v7481_v27 }
 0x2d0   : > { %v4388_v38 = vpop.f32.mrb[131].mxu1  ;;  %7534 = vmatprep.subr.bf16.mxu0 %v9578_v56  ;;  %v9584_v2 = vadd.f32 %v7180_v61, %v9111_v17 }
 0x2d1   : > { %v9576_v23 = vadd.f32 %v4388_v38, %v9101_v57 }
 0x2d2   : > { %4527 = vmax.xlane.f32.xlu1 %v9573_v30 }
 0x2d3   : > { %v2484_v47 = vpop.xlane.xlu0 %2483  ;;  %v7183_v49 = vpop.f32.mrb[132].mxu1  ;;  %4529 = vmax.xlane.f32.xlu0 %v9576_v23 }
 0x2d4   : > { %v4398_v21 = vpop.f32.mrb[133].mxu1  ;;  %v2546_v57 = vsub.f32 %v9058_v45, %v2484_v47  ;;  %v9593_v33 = vadd.f32 %v7183_v49, %v9129_v34 }
 0x2d5   : > { %v9587_v24 = vadd.f32 %v4398_v21, %v9119_v22 }
 0x2d6   : > { %4531 = vmax.xlane.f32.xlu1 %v9584_v2  ;;  %v2579_v22 = vmul.f32 1.442695, %v2546_v57 }
 0x2d7   : > { %v2488_v50 = vpop.xlane.xlu1 %2487  ;;  %v7186_v55 = vpop.f32.mrb[134].mxu1  ;;  %4533 = vmax.xlane.f32.xlu0 %v9587_v24 }
 0x2d8   : > { %v2482_v27 = vpop.xlane.xlu0 %2481  ;;  %v4408_v38 = vpop.f32.mrb[135].mxu1  ;;  %v9602_v47 = vadd.f32 %v7186_v55, %v9147_v9 }
 0x2d9   : > { %v2545_v17 = vsub.f32 %v9072_v54, %v2482_v27  ;;  %v9597_v61 = vadd.f32 %v4408_v38, %v9137_v36  ;;  %v2548_v36 = vsub.f32 %v9075_v39, %v2488_v50 }
 0x2da   : > { %4535 = vmax.xlane.f32.xlu1 %v9593_v33 }
 0x2db   : > { %v2577_v48 = vmul.f32 1.442695, %v2545_v17  ;;  %v7189_v5 = vpop.f32.mrb[136].mxu1  ;;  %v2486_v45 = vpop.xlane.xlu1 %2485  ;;  %4537 = vmax.xlane.f32.xlu0 %v9597_v61 }
 0x2dc   : > { %v4418_v34 = vpop.f32.mrb[137].mxu1  ;;  %v2490_v49 = vpop.xlane.xlu0 %2489  ;;  %v2547_v21 = vsub.f32 %v9090_v51, %v2486_v45  ;;  %v9612_v9 = vadd.f32 %v7189_v5, %v9165_v20 }
 0x2dd   : > { %7693 = vpow2.f32 %v2577_v48  ;;  %v9606_v54 = vadd.f32 %v4418_v34, %v9155_v15  ;;  %v2583_v15 = vmul.f32 1.442695, %v2548_v36  ;;  %v2549_v20 = vsub.f32 %v9096_v3, %v2490_v49 }
 0x2de   : > { %4539 = vmax.xlane.f32.xlu1 %v9602_v47  ;;  %7695 = vpow2.f32 %v2579_v22  ;;  %10926 = vst [vmem:[#allocation59_spill] sm:$0xff] %v9612_v9  ;;  %v2581_v17 = vmul.f32 1.442695, %v2547_v21 }
 0x2df   : > { %10925 = vst [vmem:[#allocation58_spill] sm:$0xff] %v9606_v54  ;;  %v7192_v57 = vpop.f32.mrb[138].mxu1  ;;  %v2492_v27 = vpop.xlane.xlu1 %2491  ;;  %4541 = vmax.xlane.f32.xlu0 %v9606_v54 }
 0x2e0   : > { %v4428_v55 = vpop.f32.mrb[139].mxu1  ;;  %v2494_v38 = vpop.xlane.xlu0 %2493  ;;  %v9620_v39 = vadd.f32 %v7192_v57, %v9183_v11  ;;  %7697 = vpow2.f32 %v2581_v17  ;;  %v2585_v57 = vmul.f32 1.442695, %v2549_v20 }
 0x2e1   : > { %v9615_v51 = vadd.f32 %v4428_v55, %v9173_v59  ;;  %7699 = vpow2.f32 %v2583_v15  ;;  %v2550_v59 = vsub.f32 %v9108_v14, %v2492_v27  ;;  %v2551_v20 = vsub.f32 %v9114_v19, %v2494_v38 }
 0x2e2   : > { %4543 = vmax.xlane.f32.xlu1 %v9612_v9  ;;  %10928 = vst [vmem:[#allocation61_spill] sm:$0xff] %v9620_v39  ;;  %7701 = vpow2.f32 %v2585_v57 }
 0x2e3   : > { %10927 = vst [vmem:[#allocation60_spill] sm:$0xff] %v9615_v51  ;;  %v7195_v48 = vpop.f32.mrb[140].mxu1  ;;  %v2496_v22 = vpop.xlane.xlu1 %2495  ;;  %4545 = vmax.xlane.f32.xlu0 %v9615_v51  ;;  %v2587_v3 = vmul.f32 1.442695, %v2550_v59  ;;  %v2589_v57 = vmul.f32 1.442695, %v2551_v20 }
 0x2e4   : > { %v4438_v50 = vpop.f32.mrb[141].mxu1  ;;  %v2498_v45 = vpop.xlane.xlu0 %2497  ;;  %v9639_v14 = vadd.f32 %v7195_v48, %v9201_v37 }
 0x2e5   : > { %v9633_v17 = vadd.f32 %v4438_v50, %v9191_v16  ;;  %7703 = vpow2.f32 %v2587_v3  ;;  %v2552_v50 = vsub.f32 %v9126_v32, %v2496_v22  ;;  %v2553_v20 = vsub.f32 %v9132_v35, %v2498_v45 }
 0x2e6   : > { %4547 = vmax.xlane.f32.xlu1 %v9620_v39  ;;  %10930 = vst [vmem:[#allocation63_spill] sm:$0xff] %v9639_v14  ;;  %7705 = vpow2.f32 %v2589_v57 }
 0x2e7   : > { %v9624_v5 = vpop.eup %7693  ;;  %v7198_v34 = vpop.f32.mrb[142].mxu1  ;;  %10929 = vst [vmem:[#allocation62_spill] sm:$0xff] %v9633_v17  ;;  %v2591_v38 = vmul.f32 1.442695, %v2552_v50  ;;  %v2593_v35 = vmul.f32 1.442695, %v2553_v20 }
 0x2e8   : > { %v2500_v21 = vpop.xlane.xlu1 %2499  ;;  %2641 = vadd.xlane.f32.xlu0 %v9624_v5  ;;  %v4448_v36 = vpop.f32.mrb[143].mxu1  ;;  %v9665_v22 = vadd.f32 %v7198_v34, %v9219_v52 }
 0x2e9   : > { %v9628_v55 = vpop.xlane.xlu0 %2501  ;;  %v9630_v11 = vpop.eup %7695  ;;  %v9657_v19 = vadd.f32 %v4448_v36, %v9209_v4  ;;  %7707 = vpow2.f32 %v2591_v38  ;;  %v2554_v36 = vsub.f32 %v9144_v1, %v2500_v21 }
 0x2ea   : > { %2643 = vadd.xlane.f32.xlu1 %v9630_v11  ;;  %v9646_v16 = vpop.eup %7697  ;;  %10932 = vst [vmem:[#allocation65_spill] sm:$0xff] %v9665_v22  ;;  %7709 = vpow2.f32 %v2593_v35 }
 0x2eb   : > { %v7201_v49 = vpop.f32.mrb[144].mxu1  ;;  %10931 = vst [vmem:[#allocation64_spill] sm:$0xff] %v9657_v19  ;;  %v2595_v38 = vmul.f32 1.442695, %v2554_v36 }
 0x2ec   : > { %v9636_v15 = vpop.xlane.xlu1 %2503  ;;  %4549 = vmax.xlane.f32.xlu0 %v9633_v17  ;;  %v4458_v27 = vpop.f32.mrb[145].mxu1 }
 0x2ed   : > { %v9642_v39 = vpop.xlane.xlu0 %2505  ;;  %v9654_v17 = vpop.eup %7699  ;;  %v9687_v45 = vadd.f32 %v4458_v27, %v9227_v46  ;;  %v2555_v46 = vsub.f32 %v9150_v43, %v9628_v55  ;;  %7711 = vpow2.f32 %v2595_v38  ;;  %v2556_v20 = vsub.f32 %v9162_v29, %v9636_v15 }
 0x2ee   : > { %4551 = vmax.xlane.f32.xlu1 %v9639_v14  ;;  %v9672_v4 = vpop.eup %7701 }
 0x2ef   : > { %v7204_v59 = vpop.f32.mrb[146].mxu1  ;;  %10933 = vst [vmem:[#allocation66_spill] sm:$0xff] %v9672_v4  ;;  %v9684_v57 = vpop.eup %7703  ;;  %10935 = vst [vmem:[#allocation68_spill] sm:$0xff] %v9687_v45  ;;  %v2597_v43 = vmul.f32 1.442695, %v2555_v46 }
 0x2f0   : > { %v9649_v51 = vpop.xlane.xlu1 %2507  ;;  %2645 = vadd.xlane.f32.xlu0 %v9646_v16  ;;  %v4468_v37 = vpop.f32.mrb[147].mxu1  ;;  %10934 = vst [vmem:[#allocation67_spill] sm:$0xff] %v9684_v57  ;;  %v2599_v38 = vmul.f32 1.442695, %v2556_v20  ;;  %v9727_v15 = vadd.f32 %v7204_v59, %v9255_v62 }
 0x2f1   : > { %v9652_v48 = vpop.xlane.xlu0 %2509  ;;  %v9705_v27 = vpop.eup %7705  ;;  %v9721_v55 = vadd.f32 %v4468_v37, %v9245_v63  ;;  %7713 = vpow2.f32 %v2597_v43  ;;  %v10940_v37 = vld [vmem:[#allocation11_spill] sm:$0xff] }
 0x2f2   : > { %2647 = vadd.xlane.f32.xlu1 %v9654_v17  ;;  %10937 = vst [vmem:[#allocation70_spill] sm:$0xff] %v9705_v27  ;;  %7715 = vpow2.f32 %v2599_v38  ;;  %v2558_v46 = vsub.f32 %v10940_v37, %v9649_v51  ;;  %v10943_v37 = vld [vmem:[#allocation12_spill] sm:$0xff] }
 0x2f3   : > { %v9660_v3 = vpop.f32.mrb[148].mxu1  ;;  %10938 = vst [vmem:[#allocation71_spill] sm:$0xff] %v9721_v55 }
 0x2f4   : > { %v9662_v32 = vpop.xlane.xlu1 %2511  ;;  %4553 = vmax.xlane.f32.xlu0 %v9657_v19  ;;  %v4478_v14 = vpop.f32.mrb[149].mxu1  ;;  %v9754_v51 = vadd.f32 %v9660_v3, %v9273_v0 }
 0x2f5   : > { %v9668_v9 = vpop.xlane.xlu0 %2513 }
 0x2f6   : > { %4555 = vmax.xlane.f32.xlu1 %v9665_v22  ;;  %v9695_v22 = vadd.f32 %v7201_v49, %v9237_v26 }
 0x2f7   : > { %v9675_v50 = vpop.f32.mrb[150].mxu1 }
 0x2f8   : > { %v9677_v54 = vpop.xlane.xlu1 %2515  ;;  %2649 = vadd.xlane.f32.xlu0 %v9672_v4  ;;  %v9680_v52 = vpop.f32.mrb[151].mxu1  ;;  %10936 = vst [vmem:[#allocation69_spill] sm:$0xff] %v9695_v22 }
 0x2f9   : > { %v9682_v34 = vpop.xlane.xlu0 %2517 }
 0x2fa   : > { %2651 = vadd.xlane.f32.xlu1 %v9684_v57 }
 0x2fb   : > { %v9690_v1 = vpop.f32.mrb[152].mxu1 }
 0x2fc   : > { %v9692_v21 = vpop.xlane.xlu1 %2519  ;;  %4557 = vmax.xlane.f32.xlu0 %v9687_v45  ;;  %v9698_v19 = vpop.f32.mrb[153].mxu1 }
 0x2fd   : > { %v9700_v4 = vpop.xlane.xlu0 %2521  ;;  %v9718_v45 = vpop.eup %7707 }
 0x2fe   : > { %4559 = vmax.xlane.f32.xlu1 %v9695_v22  ;;  %v9735_v63 = vpop.eup %7709 }
 0x2ff   : > { %v9709_v26 = vpop.f32.mrb[154].mxu1  ;;  %v9744_v59 = vpop.eup %7711 }
 0x300   : > { %v9711_v49 = vpop.xlane.xlu1 %2523  ;;  %2653 = vadd.xlane.f32.xlu0 %v9705_v27  ;;  %v9714_v36 = vpop.f32.mrb[155].mxu1  ;;  %v10939_v27 = vld [vmem:[#allocation10_spill] sm:$0xff] }
 0x301   : > { %v9716_v35 = vpop.xlane.xlu0 %2525  ;;  %v2557_v57 = vsub.f32 %v10939_v27, %v9642_v39  ;;  %10941 = vst [vmem:[#allocation10_spill] sm:$0xff] %v9744_v59  ;;  %v2603_v39 = vmul.f32 1.442695, %v2558_v46 }
 0x302   : > { %2655 = vadd.xlane.f32.xlu1 %v9718_v45 }
 0x303   : > { %v2601_v43 = vmul.f32 1.442695, %v2557_v57  ;;  %v2559_v57 = vsub.f32 %v10943_v37, %v9652_v48  ;;  %v9775_v48 = vadd.f32 %v9680_v52, %v9281_v42  ;;  %v10949_v42 = vld [vmem:[#allocation14_spill] sm:$0xff] }
 0x304   : > { %v9724_v29 = vpop.xlane.xlu1 %2527  ;;  %4561 = vmax.xlane.f32.xlu0 %v9721_v55  ;;  %v9747_v55 = vadd.f32 %v4478_v14, %v9263_v53  ;;  %v9762_v53 = vpop.eup %7713  ;;  %v10945_v14 = vld [vmem:[#allocation13_spill] sm:$0xff]  ;;  %v2561_v52 = vsub.f32 %v10949_v42, %v9668_v9 }
 0x305   : > { %v9730_v22 = vpop.xlane.xlu0 %2529  ;;  %7717 = vpow2.f32 %v2601_v43  ;;  %10944 = vst [vmem:[#allocation12_spill] sm:$0xff] %v9762_v53  ;;  %v2560_v46 = vsub.f32 %v10945_v14, %v9662_v32  ;;  %v9771_v3 = vpop.eup %7715  ;;  %v2605_v43 = vmul.f32 1.442695, %v2559_v57  ;;  %10947 = vst [vmem:[#allocation72_spill] sm:$0xff] %v9775_v48  ;;  %v9783_v14 = vadd.f32 %v9675_v50, %v9289_v28  ;;  %v10950_v28 = vld [vmem:[#allocation15_spill] sm:$0xff] }
 0x306   : > { %4563 = vmax.xlane.f32.xlu1 %v9727_v15  ;;  %10942 = vst [vmem:[#allocation11_spill] sm:$0xff] %v9747_v55  ;;  %7719 = vpow2.f32 %v2603_v39  ;;  %10946 = vst [vmem:[#allocation13_spill] sm:$0xff] %v9771_v3  ;;  %v2562_v50 = vsub.f32 %v10950_v28, %v9677_v54 }
 0x307   : > { %v2607_v37 = vmul.f32 1.442695, %v2560_v46  ;;  %10948 = vst [vmem:[#allocation73_spill] sm:$0xff] %v9783_v14  ;;  %7721 = vpow2.f32 %v2605_v43 }
 0x308   : > { %v9739_v20 = vpop.xlane.xlu1 %2531  ;;  %2657 = vadd.xlane.f32.xlu0 %v9735_v63  ;;  %v2611_v54 = vmul.f32 1.442695, %v2562_v50 }
 0x309   : > { %v9742_v62 = vpop.xlane.xlu0 %2533  ;;  %7723 = vpow2.f32 %v2607_v37  ;;  %v9808_v37 = vadd.f32 %v9698_v19, %v9297_v10  ;;  %v10953_v19 = vld [vmem:[#allocation18_spill] sm:$0xff] }
 0x30a   : > { %2659 = vadd.xlane.f32.xlu1 %v9744_v59 }
 0x30c   : > { %v9750_v27 = vpop.xlane.xlu1 %2535  ;;  %4565 = vmax.xlane.f32.xlu0 %v9747_v55  ;;  %v6813_v55 = vpop.f32.mrb[56].mxu0 }
 0x30d   : > { %v9757_v38 = vpop.xlane.xlu0 %2537  ;;  %v1779_v39 = vadd.f32 %v6813_v55, %v9361_v13  ;;  %v1773_v55 = vpop.f32.mrb[57].mxu0 }
 0x30e   : > { %4567 = vmax.xlane.f32.xlu1 %v9754_v51 }
 0x30f   : > { %v1837_v57 = vmax.f32 %v1779_v39, 0.0  ;;  %v9792_v46 = vpop.eup %7717  ;;  %v2609_v39 = vmul.f32 1.442695, %v2561_v52  ;;  %v9818_v52 = vadd.f32 %v9690_v1, %v9305_v7 }
 0x310   : > { %v9766_v59 = vpop.xlane.xlu1 %2539  ;;  %2661 = vadd.xlane.f32.xlu0 %v9762_v53  ;;  %v9802_v9 = vpop.eup %7719 }
 0x311   : > { %v9769_v0 = vpop.xlane.xlu0 %2541  ;;  %1885 = vst.msk [vmem:[#allocation4 + $0x168] sm:$0xff] %vm387_vm0, %v1837_v57  ;;  %v10951_v57 = vld [vmem:[#allocation16_spill] sm:$0xff]  ;;  %7725 = vpow2.f32 %v2609_v39 }
 0x312   : > { %2663 = vadd.xlane.f32.xlu1 %v9771_v3  ;;  %v2563_v42 = vsub.f32 %v10951_v57, %v9682_v34  ;;  %7727 = vpow2.f32 %v2611_v54  ;;  %v9841_v54 = vadd.f32 %v9714_v36, %v9312_v18  ;;  %v10957_v36 = vld [vmem:[#allocation22_spill] sm:$0xff] }
 0x314   : > { %v9779_v32 = vpop.xlane.xlu1 %2543  ;;  %4569 = vmax.xlane.f32.xlu0 %v9775_v48  ;;  %v1774_v48 = vadd.f32 %v9361_v13, %v1773_v55  ;;  %v10952_v13 = vld [vmem:[#allocation17_spill] sm:$0xff]  ;;  %v2613_v10 = vmul.f32 1.442695, %v2563_v42 }
 0x315   : > { %v9786_v53 = vpop.xlane.xlu0 %3499  ;;  %v2564_v55 = vsub.f32 %v10952_v13, %v9692_v21  ;;  %v9826_v21 = vpop.eup %7721 }
 0x316   : > { %4571 = vmax.xlane.f32.xlu1 %v9783_v14  ;;  %v1836_v14 = vmax.f32 %v1774_v48, 0.0  ;;  %v2565_v48 = vsub.f32 %v10953_v19, %v9700_v4  ;;  %v9835_v39 = vpop.eup %7723  ;;  %7729 = vpow2.f32 %v2613_v10  ;;  %v10955_v4 = vld [vmem:[#allocation20_spill] sm:$0xff]  ;;  %v9850_v10 = vadd.f32 %v9709_v26, %v8990_v6 }
 0x317   : > { %v2615_v50 = vmul.f32 1.442695, %v2564_v55  ;;  %v2567_v13 = vsub.f32 %v10955_v4, %v9716_v35  ;;  %v10956_v55 = vld [vmem:[#allocation21_spill] sm:$0xff] }
 0x318   : > { %v9796_v3 = vpop.xlane.xlu1 %3501  ;;  %2665 = vadd.xlane.f32.xlu0 %v9792_v46  ;;  %1884 = vst.msk [vmem:[#allocation4 + $0x160] sm:$0xff] %vm387_vm0, %v1836_v14  ;;  %v10954_v14 = vld [vmem:[#allocation19_spill] sm:$0xff]  ;;  %v2617_v42 = vmul.f32 1.442695, %v2565_v48  ;;  %v2568_v19 = vsub.f32 %v10956_v55, %v9724_v29  ;;  %v2569_v48 = vsub.f32 %v10957_v36, %v9730_v22  ;;  %v10961_v22 = vld [vmem:[#allocation24_spill] sm:$0xff] }
 0x319   : > { %v9800_v43 = vpop.xlane.xlu0 %3503  ;;  %v2566_v57 = vsub.f32 %v10954_v14, %v9711_v49  ;;  %7731 = vpow2.f32 %v2615_v50  ;;  %v2621_v18 = vmul.f32 1.442695, %v2567_v13  ;;  %v2571_v55 = vsub.f32 %v10961_v22, %v9742_v62  ;;  %v10965_v62 = vld [vmem:[#allocation26_spill] sm:$0xff] }
 0x31a   : > { %2667 = vadd.xlane.f32.xlu1 %v9802_v9  ;;  %7733 = vpow2.f32 %v2617_v42  ;;  %v2623_v29 = vmul.f32 1.442695, %v2568_v19  ;;  %v2625_v13 = vmul.f32 1.442695, %v2569_v48  ;;  %v2573_v22 = vsub.f32 %v10965_v62, %v9757_v38  ;;  %v10969_v38 = vld [vmem:[#allocation28_spill] sm:$0xff] }
 0x31b   : > { %v2619_v49 = vmul.f32 1.442695, %v2566_v57  ;;  %v9858_v50 = vpop.eup %7725  ;;  %v10959_v57 = vld [vmem:[#allocation23_spill] sm:$0xff]  ;;  %v2629_v48 = vmul.f32 1.442695, %v2571_v55  ;;  %v2575_v62 = vsub.f32 %v10969_v38, %v9769_v0  ;;  %v10973_v0 = vld [vmem:[#allocation30_spill] sm:$0xff] }
 0x31c   : > { %v9813_v28 = vpop.xlane.xlu1 %3505  ;;  %4573 = vmax.xlane.f32.xlu0 %v9808_v37  ;;  %10958 = vst [vmem:[#allocation14_spill] sm:$0xff] %v9858_v50  ;;  %v2570_v4 = vsub.f32 %v10959_v57, %v9739_v20  ;;  %v9867_v42 = vpop.eup %7727  ;;  %v10963_v20 = vld [vmem:[#allocation25_spill] sm:$0xff]  ;;  %v2633_v55 = vmul.f32 1.442695, %v2573_v22  ;;  %v3563_v38 = vsub.f32 %v10973_v0, %v9786_v53  ;;  %v10977_v53 = vld [vmem:[#allocation32_spill] sm:$0xff] }
 0x31d   : > { %v9821_v34 = vpop.xlane.xlu0 %3507  ;;  %7735 = vpow2.f32 %v2619_v49  ;;  %10960 = vst [vmem:[#allocation15_spill] sm:$0xff] %v9867_v42  ;;  %v2572_v36 = vsub.f32 %v10963_v20, %v9750_v27  ;;  %v10967_v27 = vld [vmem:[#allocation27_spill] sm:$0xff]  ;;  %v2637_v22 = vmul.f32 1.442695, %v2575_v62  ;;  %v3565_v0 = vsub.f32 %v10977_v53, %v9800_v43  ;;  %v10981_v43 = vld [vmem:[#allocation34_spill] sm:$0xff] }
 0x31e   : > { %4575 = vmax.xlane.f32.xlu1 %v9818_v52  ;;  %7737 = vpow2.f32 %v2621_v18  ;;  %v2627_v19 = vmul.f32 1.442695, %v2570_v4  ;;  %v2574_v20 = vsub.f32 %v10967_v27, %v9766_v59  ;;  %v10971_v59 = vld [vmem:[#allocation29_spill] sm:$0xff]  ;;  %v3595_v62 = vmul.f32 1.442695, %v3563_v38 }
 0x31f   : > { %7739 = vpow2.f32 %v2623_v29  ;;  %v2631_v4 = vmul.f32 1.442695, %v2572_v36  ;;  %v2576_v27 = vsub.f32 %v10971_v59, %v9779_v32  ;;  %v10975_v32 = vld [vmem:[#allocation31_spill] sm:$0xff]  ;;  %v3599_v38 = vmul.f32 1.442695, %v3565_v0 }
 0x320   : > { %v9830_v7 = vpop.xlane.xlu1 %3509  ;;  %2669 = vadd.xlane.f32.xlu0 %v9826_v21  ;;  %v9872_v49 = vpop.eup %7729  ;;  %7741 = vpow2.f32 %v2625_v13  ;;  %v2635_v36 = vmul.f32 1.442695, %v2574_v20  ;;  %v3564_v59 = vsub.f32 %v10975_v32, %v9796_v3  ;;  %v10979_v3 = vld [vmem:[#allocation33_spill] sm:$0xff]  ;;  %v3567_v53 = vsub.f32 %v10981_v43, %v9821_v34  ;;  %v10985_v34 = vld [vmem:[#allocation36_spill] sm:$0xff] }
 0x321   : > { %v9833_v1 = vpop.xlane.xlu0 %3511  ;;  %10962 = vst [vmem:[#allocation16_spill] sm:$0xff] %v9872_v49  ;;  %7743 = vpow2.f32 %v2627_v19  ;;  %v2639_v20 = vmul.f32 1.442695, %v2576_v27  ;;  %v3566_v32 = vsub.f32 %v10979_v3, %v9813_v28  ;;  %v10983_v28 = vld [vmem:[#allocation35_spill] sm:$0xff] }
 0x322   : > { %2671 = vadd.xlane.f32.xlu1 %v9835_v39  ;;  %7745 = vpow2.f32 %v2629_v48  ;;  %v3597_v27 = vmul.f32 1.442695, %v3564_v59  ;;  %v3568_v3 = vsub.f32 %v10983_v28, %v9830_v7  ;;  %v3603_v0 = vmul.f32 1.442695, %v3567_v53  ;;  %v10987_v7 = vld [vmem:[#allocation37_spill] sm:$0xff] }
 0x323   : > { %v9881_v18 = vpop.eup %7731  ;;  %7747 = vpow2.f32 %v2631_v4  ;;  %v3601_v59 = vmul.f32 1.442695, %v3566_v32  ;;  %v3569_v43 = vsub.f32 %v10985_v34, %v9833_v1  ;;  %v10989_v1 = vld [vmem:[#allocation38_spill] sm:$0xff] }
 0x324   : > { %v9846_v14 = vpop.xlane.xlu1 %3513  ;;  %4577 = vmax.xlane.f32.xlu0 %v9841_v54  ;;  %10964 = vst [vmem:[#allocation17_spill] sm:$0xff] %v9881_v18  ;;  %v9886_v29 = vpop.eup %7733  ;;  %7749 = vpow2.f32 %v2633_v55  ;;  %v3605_v32 = vmul.f32 1.442695, %v3568_v3 }
 0x325   : > { %v9853_v35 = vpop.xlane.xlu0 %3515  ;;  %10966 = vst [vmem:[#allocation18_spill] sm:$0xff] %v9886_v29  ;;  %7751 = vpow2.f32 %v2635_v36  ;;  %v3570_v28 = vsub.f32 %v10987_v7, %v9846_v14  ;;  %v3607_v53 = vmul.f32 1.442695, %v3569_v43  ;;  %v10991_v14 = vld [vmem:[#allocation39_spill] sm:$0xff] }
 0x326   : > { %4579 = vmax.xlane.f32.xlu1 %v9850_v10  ;;  %7753 = vpow2.f32 %v2637_v22  ;;  %v3571_v34 = vsub.f32 %v10989_v1, %v9853_v35  ;;  %v10993_v35 = vld [vmem:[#allocation40_spill] sm:$0xff] }
 0x327   : > { %v9895_v13 = vpop.eup %7735  ;;  %7755 = vpow2.f32 %v2639_v20  ;;  %v3609_v3 = vmul.f32 1.442695, %v3570_v28 }
 0x328   : > { %v9862_v6 = vpop.xlane.xlu1 %3517  ;;  %2673 = vadd.xlane.f32.xlu0 %v9858_v50  ;;  %10968 = vst [vmem:[#allocation19_spill] sm:$0xff] %v9895_v13  ;;  %v9900_v19 = vpop.eup %7737  ;;  %7757 = vpow2.f32 %v3595_v62  ;;  %v3611_v43 = vmul.f32 1.442695, %v3571_v34 }
 0x329   : > { %v9865_v26 = vpop.xlane.xlu0 %3519  ;;  %10970 = vst [vmem:[#allocation20_spill] sm:$0xff] %v9900_v19  ;;  %v9909_v48 = vpop.eup %7739  ;;  %7759 = vpow2.f32 %v3597_v27  ;;  %v3572_v7 = vsub.f32 %v10991_v14, %v9862_v6  ;;  %v10995_v6 = vld [vmem:[#allocation41_spill] sm:$0xff] }
 0x32a   : > { %2675 = vadd.xlane.f32.xlu1 %v9867_v42  ;;  %10972 = vst [vmem:[#allocation21_spill] sm:$0xff] %v9909_v48  ;;  %v9914_v4 = vpop.eup %7741  ;;  %7761 = vpow2.f32 %v3599_v38  ;;  %v3573_v1 = vsub.f32 %v10993_v35, %v9865_v26  ;;  %v10997_v26 = vld [vmem:[#allocation42_spill] sm:$0xff] }
 0x32b   : > { %10974 = vst [vmem:[#allocation22_spill] sm:$0xff] %v9914_v4  ;;  %v9923_v55 = vpop.eup %7743  ;;  %7763 = vpow2.f32 %v3601_v59  ;;  %v3613_v28 = vmul.f32 1.442695, %v3572_v7 }
 0x32c   : > { %v9876_v57 = vpop.xlane.xlu1 %3521  ;;  %2677 = vadd.xlane.f32.xlu0 %v9872_v49  ;;  %10976 = vst [vmem:[#allocation23_spill] sm:$0xff] %v9923_v55  ;;  %v9928_v36 = vpop.eup %7745  ;;  %7765 = vpow2.f32 %v3603_v0  ;;  %v3615_v34 = vmul.f32 1.442695, %v3573_v1 }
 0x32d   : > { %v9879_v50 = vpop.xlane.xlu0 %3523  ;;  %10978 = vst [vmem:[#allocation24_spill] sm:$0xff] %v9928_v36  ;;  %v9937_v22 = vpop.eup %7747  ;;  %7767 = vpow2.f32 %v3605_v32  ;;  %v3574_v14 = vsub.f32 %v10995_v6, %v9876_v57  ;;  %v10999_v57 = vld [vmem:[#allocation43_spill] sm:$0xff] }
 0x32e   : > { %2679 = vadd.xlane.f32.xlu1 %v9881_v18  ;;  %10980 = vst [vmem:[#allocation25_spill] sm:$0xff] %v9937_v22  ;;  %v9942_v20 = vpop.eup %7749  ;;  %7769 = vpow2.f32 %v3607_v53  ;;  %v3575_v35 = vsub.f32 %v10997_v26, %v9879_v50  ;;  %v11001_v50 = vld [vmem:[#allocation44_spill] sm:$0xff] }
 0x32f   : > { %10982 = vst [vmem:[#allocation26_spill] sm:$0xff] %v9942_v20  ;;  %v9951_v62 = vpop.eup %7751  ;;  %7771 = vpow2.f32 %v3609_v3  ;;  %v3617_v7 = vmul.f32 1.442695, %v3574_v14 }
 0x330   : > { %v9890_v42 = vpop.xlane.xlu1 %3525  ;;  %2681 = vadd.xlane.f32.xlu0 %v9886_v29  ;;  %10984 = vst [vmem:[#allocation27_spill] sm:$0xff] %v9951_v62  ;;  %v9956_v27 = vpop.eup %7753  ;;  %7773 = vpow2.f32 %v3611_v43  ;;  %v3619_v1 = vmul.f32 1.442695, %v3575_v35 }
 0x331   : > { %v9893_v49 = vpop.xlane.xlu0 %3527  ;;  %10986 = vst [vmem:[#allocation28_spill] sm:$0xff] %v9956_v27  ;;  %v9965_v38 = vpop.eup %7755  ;;  %7775 = vpow2.f32 %v3613_v28  ;;  %v3576_v6 = vsub.f32 %v10999_v57, %v9890_v42  ;;  %v11003_v42 = vld [vmem:[#allocation45_spill] sm:$0xff] }
 0x332   : > { %2683 = vadd.xlane.f32.xlu1 %v9895_v13  ;;  %10988 = vst [vmem:[#allocation29_spill] sm:$0xff] %v9965_v38  ;;  %v9970_v59 = vpop.eup %7757  ;;  %7777 = vpow2.f32 %v3615_v34  ;;  %v3577_v26 = vsub.f32 %v11001_v50, %v9893_v49  ;;  %v11005_v49 = vld [vmem:[#allocation46_spill] sm:$0xff] }
 0x333   : > { %10990 = vst [vmem:[#allocation30_spill] sm:$0xff] %v9970_v59  ;;  %v9979_v0 = vpop.eup %7759  ;;  %7779 = vpow2.f32 %v3617_v7  ;;  %v3621_v14 = vmul.f32 1.442695, %v3576_v6 }
 0x334   : > { %v9904_v18 = vpop.xlane.xlu1 %3529  ;;  %2685 = vadd.xlane.f32.xlu0 %v9900_v19  ;;  %10992 = vst [vmem:[#allocation31_spill] sm:$0xff] %v9979_v0  ;;  %v9984_v32 = vpop.eup %7761  ;;  %7781 = vpow2.f32 %v3619_v1  ;;  %v3623_v35 = vmul.f32 1.442695, %v3577_v26 }
 0x335   : > { %v9907_v29 = vpop.xlane.xlu0 %3531  ;;  %10994 = vst [vmem:[#allocation32_spill] sm:$0xff] %v9984_v32  ;;  %v9993_v53 = vpop.eup %7763  ;;  %v3578_v57 = vsub.f32 %v11003_v42, %v9904_v18  ;;  %7783 = vpow2.f32 %v3621_v14  ;;  %v11007_v18 = vld [vmem:[#allocation47_spill] sm:$0xff] }
 0x336   : > { %2687 = vadd.xlane.f32.xlu1 %v9909_v48  ;;  %10996 = vst [vmem:[#allocation33_spill] sm:$0xff] %v9993_v53  ;;  %v9998_v3 = vpop.eup %7765  ;;  %v3579_v50 = vsub.f32 %v11005_v49, %v9907_v29  ;;  %7785 = vpow2.f32 %v3623_v35  ;;  %v11009_v29 = vld [vmem:[#allocation48_spill] sm:$0xff] }
 0x337   : > { %10998 = vst [vmem:[#allocation34_spill] sm:$0xff] %v9998_v3  ;;  %v10007_v43 = vpop.eup %7767  ;;  %v3625_v6 = vmul.f32 1.442695, %v3578_v57 }
 0x338   : > { %v9918_v13 = vpop.xlane.xlu1 %3533  ;;  %2689 = vadd.xlane.f32.xlu0 %v9914_v4  ;;  %11000 = vst [vmem:[#allocation35_spill] sm:$0xff] %v10007_v43  ;;  %v10012_v28 = vpop.eup %7769  ;;  %v3627_v26 = vmul.f32 1.442695, %v3579_v50 }
 0x339   : > { %v9921_v19 = vpop.xlane.xlu0 %3535  ;;  %11002 = vst [vmem:[#allocation36_spill] sm:$0xff] %v10012_v28  ;;  %v10021_v34 = vpop.eup %7771  ;;  %v3580_v42 = vsub.f32 %v11007_v18, %v9918_v13  ;;  %7787 = vpow2.f32 %v3625_v6  ;;  %v11011_v13 = vld [vmem:[#allocation49_spill] sm:$0xff] }
 0x33a   : > { %2691 = vadd.xlane.f32.xlu1 %v9923_v55  ;;  %11004 = vst [vmem:[#allocation37_spill] sm:$0xff] %v10021_v34  ;;  %v10026_v7 = vpop.eup %7773  ;;  %v3581_v49 = vsub.f32 %v11009_v29, %v9921_v19  ;;  %7789 = vpow2.f32 %v3627_v26  ;;  %v11013_v19 = vld [vmem:[#allocation50_spill] sm:$0xff] }
 0x33b   : > { %11006 = vst [vmem:[#allocation38_spill] sm:$0xff] %v10026_v7  ;;  %v10035_v1 = vpop.eup %7775  ;;  %v3629_v57 = vmul.f32 1.442695, %v3580_v42 }
 0x33c   : > { %v9932_v48 = vpop.xlane.xlu1 %3537  ;;  %2693 = vadd.xlane.f32.xlu0 %v9928_v36  ;;  %11008 = vst [vmem:[#allocation39_spill] sm:$0xff] %v10035_v1  ;;  %v10040_v14 = vpop.eup %7777  ;;  %v3631_v50 = vmul.f32 1.442695, %v3581_v49 }
 0x33d   : > { %v9935_v4 = vpop.xlane.xlu0 %3539  ;;  %11010 = vst [vmem:[#allocation40_spill] sm:$0xff] %v10040_v14  ;;  %v3582_v18 = vsub.f32 %v11011_v13, %v9932_v48  ;;  %v10049_v35 = vpop.eup %7779  ;;  %7791 = vpow2.f32 %v3629_v57  ;;  %v11015_v48 = vld [vmem:[#allocation51_spill] sm:$0xff] }
 0x33e   : > { %2695 = vadd.xlane.f32.xlu1 %v9937_v22  ;;  %11012 = vst [vmem:[#allocation41_spill] sm:$0xff] %v10049_v35  ;;  %v3583_v29 = vsub.f32 %v11013_v19, %v9935_v4  ;;  %v10054_v6 = vpop.eup %7781  ;;  %7793 = vpow2.f32 %v3631_v50  ;;  %v11017_v4 = vld [vmem:[#allocation52_spill] sm:$0xff] }
 0x33f   : > { %11014 = vst [vmem:[#allocation42_spill] sm:$0xff] %v10054_v6  ;;  %v3633_v42 = vmul.f32 1.442695, %v3582_v18  ;;  %v10063_v26 = vpop.eup %7783 }
 0x340   : > { %v9946_v55 = vpop.xlane.xlu1 %3541  ;;  %2697 = vadd.xlane.f32.xlu0 %v9942_v20  ;;  %11016 = vst [vmem:[#allocation43_spill] sm:$0xff] %v10063_v26  ;;  %v3635_v49 = vmul.f32 1.442695, %v3583_v29  ;;  %v10068_v57 = vpop.eup %7785 }
 0x341   : > { %v9949_v36 = vpop.xlane.xlu0 %3543  ;;  %v3584_v13 = vsub.f32 %v11015_v48, %v9946_v55  ;;  %11018 = vst [vmem:[#allocation44_spill] sm:$0xff] %v10068_v57  ;;  %7795 = vpow2.f32 %v3633_v42  ;;  %v11019_v55 = vld [vmem:[#allocation53_spill] sm:$0xff] }
 0x342   : > { %2699 = vadd.xlane.f32.xlu1 %v9951_v62  ;;  %v3585_v19 = vsub.f32 %v11017_v4, %v9949_v36  ;;  %7797 = vpow2.f32 %v3635_v49  ;;  %v11021_v36 = vld [vmem:[#allocation54_spill] sm:$0xff] }
 0x343   : > { %v3637_v18 = vmul.f32 1.442695, %v3584_v13  ;;  %v10077_v50 = vpop.eup %7787 }
 0x344   : > { %v9960_v22 = vpop.xlane.xlu1 %3545  ;;  %2701 = vadd.xlane.f32.xlu0 %v9956_v27  ;;  %11020 = vst [vmem:[#allocation45_spill] sm:$0xff] %v10077_v50  ;;  %v3639_v29 = vmul.f32 1.442695, %v3585_v19  ;;  %v10082_v42 = vpop.eup %7789 }
 0x345   : > { %v9963_v20 = vpop.xlane.xlu0 %3547  ;;  %v3586_v48 = vsub.f32 %v11019_v55, %v9960_v22  ;;  %11022 = vst [vmem:[#allocation46_spill] sm:$0xff] %v10082_v42  ;;  %7799 = vpow2.f32 %v3637_v18  ;;  %v11023_v22 = vld [vmem:[#allocation55_spill] sm:$0xff] }
 0x346   : > { %2703 = vadd.xlane.f32.xlu1 %v9965_v38  ;;  %v3587_v4 = vsub.f32 %v11021_v36, %v9963_v20  ;;  %7801 = vpow2.f32 %v3639_v29  ;;  %v11024_v20 = vld [vmem:[#allocation56_spill] sm:$0xff] }
 0x347   : > { %v3641_v13 = vmul.f32 1.442695, %v3586_v48  ;;  %v10091_v49 = vpop.eup %7791 }
 0x348   : > { %v9974_v62 = vpop.xlane.xlu1 %3549  ;;  %3659 = vadd.xlane.f32.xlu0 %v9970_v59  ;;  %v3643_v19 = vmul.f32 1.442695, %v3587_v4  ;;  %v10096_v18 = vpop.eup %7793 }
 0x349   : > { %v9977_v27 = vpop.xlane.xlu0 %3551  ;;  %v3588_v55 = vsub.f32 %v11023_v22, %v9974_v62  ;;  %7803 = vpow2.f32 %v3641_v13  ;;  %v11025_v62 = vld [vmem:[#allocation57_spill] sm:$0xff] }
 0x34a   : > { %3661 = vadd.xlane.f32.xlu1 %v9979_v0  ;;  %v3589_v36 = vsub.f32 %v11024_v20, %v9977_v27  ;;  %7805 = vpow2.f32 %v3643_v19 }
 0x34b   : > { %v3645_v48 = vmul.f32 1.442695, %v3588_v55  ;;  %v10105_v29 = vpop.eup %7795 }
 0x34c   : > { %v9988_v38 = vpop.xlane.xlu1 %3553  ;;  %3663 = vadd.xlane.f32.xlu0 %v9984_v32  ;;  %v3647_v4 = vmul.f32 1.442695, %v3589_v36  ;;  %v10110_v13 = vpop.eup %7797 }
 0x34d   : > { %v9991_v59 = vpop.xlane.xlu0 %3555  ;;  %v3590_v22 = vsub.f32 %v11025_v62, %v9988_v38  ;;  %7807 = vpow2.f32 %v3645_v48 }
 0x34e   : > { %3665 = vadd.xlane.f32.xlu1 %v9993_v53  ;;  %v3591_v27 = vsub.f32 %v9520_v58, %v9991_v59  ;;  %7809 = vpow2.f32 %v3647_v4 }
 0x34f   : > { %v3649_v55 = vmul.f32 1.442695, %v3590_v22  ;;  %v10121_v36 = vpop.eup %7799 }
 0x350   : > { %v10002_v0 = vpop.xlane.xlu1 %3557  ;;  %3667 = vadd.xlane.f32.xlu0 %v9998_v3  ;;  %v3651_v58 = vmul.f32 1.442695, %v3591_v27  ;;  %v10124_v59 = vpop.eup %7801 }
 0x351   : > { %v10005_v32 = vpop.xlane.xlu0 %3559  ;;  %v3592_v38 = vsub.f32 %v9533_v44, %v10002_v0  ;;  %7811 = vpow2.f32 %v3649_v55 }
 0x352   : > { %3669 = vadd.xlane.f32.xlu1 %v10007_v43  ;;  %v3593_v62 = vsub.f32 %v9539_v40, %v10005_v32  ;;  %7813 = vpow2.f32 %v3651_v58 }
 0x353   : > { %v3653_v48 = vmul.f32 1.442695, %v3592_v38  ;;  %v10131_v32 = vpop.eup %7803 }
 0x354   : > { %v10016_v53 = vpop.xlane.xlu1 %3561  ;;  %3671 = vadd.xlane.f32.xlu0 %v10012_v28  ;;  %v3655_v40 = vmul.f32 1.442695, %v3593_v62  ;;  %v10138_v55 = vpop.eup %7805 }
 0x355   : > { %v10019_v3 = vpop.xlane.xlu0 %4517  ;;  %v3594_v44 = vsub.f32 %v9548_v8, %v10016_v53 }
 0x356   : > { %3673 = vadd.xlane.f32.xlu1 %v10021_v34  ;;  %v4581_v22 = vsub.f32 %v9552_v31, %v10019_v3 }
 0x357   : > { %v3657_v8 = vmul.f32 1.442695, %v3594_v44  ;;  %v10141_v38 = vpop.eup %7807 }
 0x358   : > { %v10030_v43 = vpop.xlane.xlu1 %4519  ;;  %3675 = vadd.xlane.f32.xlu0 %v10026_v7  ;;  %v4613_v62 = vmul.f32 1.442695, %v4581_v22 }
 0x359   : > { %v10033_v28 = vpop.xlane.xlu0 %4521  ;;  %v4582_v27 = vsub.f32 %v9557_v25, %v10030_v43  ;;  %v10148_v43 = vpop.eup %7809 }
 0x35a   : > { %3677 = vadd.xlane.f32.xlu1 %v10035_v1  ;;  %v4583_v25 = vsub.f32 %v9560_v60, %v10033_v28 }
 0x35b   : > { %v4615_v3 = vmul.f32 1.442695, %v4582_v27  ;;  %v10155_v44 = vpop.eup %7811 }
 0x35c   : > { %v10044_v34 = vpop.xlane.xlu1 %4523  ;;  %3679 = vadd.xlane.f32.xlu0 %v10040_v14  ;;  %v4617_v60 = vmul.f32 1.442695, %v4583_v25 }
 0x35d   : > { %v10047_v7 = vpop.xlane.xlu0 %4525  ;;  %v4584_v58 = vsub.f32 %v9565_v12, %v10044_v34 }
 0x35e   : > { %3681 = vadd.xlane.f32.xlu1 %v10049_v35 }
 0x35f   : > { %v4619_v12 = vmul.f32 1.442695, %v4584_v58 }
 0x360   : > { %v10058_v1 = vpop.xlane.xlu1 %4527  ;;  %3683 = vadd.xlane.f32.xlu0 %v10054_v6 }
 0x361   : > { %v10061_v14 = vpop.xlane.xlu0 %4529  ;;  %v4586_v28 = vsub.f32 %v9573_v30, %v10058_v1 }
 0x362   : > { %3685 = vadd.xlane.f32.xlu1 %v10063_v26  ;;  %v4587_v1 = vsub.f32 %v9576_v23, %v10061_v14 }
 0x363   : > { %v4623_v30 = vmul.f32 1.442695, %v4586_v28 }
 0x364   : > { %v10072_v35 = vpop.xlane.xlu1 %4531  ;;  %3687 = vadd.xlane.f32.xlu0 %v10068_v57  ;;  %v4625_v28 = vmul.f32 1.442695, %v4587_v1 }
 0x365   : > { %v10075_v6 = vpop.xlane.xlu0 %4533  ;;  %v4588_v25 = vsub.f32 %v9584_v2, %v10072_v35 }
 0x366   : > { %3689 = vadd.xlane.f32.xlu1 %v10077_v50  ;;  %v4589_v23 = vsub.f32 %v9587_v24, %v10075_v6 }
 0x368   : > { %v10086_v26 = vpop.xlane.xlu1 %4535  ;;  %3691 = vadd.xlane.f32.xlu0 %v10082_v42 }
 0x369   : > { %v10089_v57 = vpop.xlane.xlu0 %4537  ;;  %v4590_v2 = vsub.f32 %v9593_v33, %v10086_v26  ;;  %v4629_v33 = vmul.f32 1.442695, %v4589_v23 }
 0x36a   : > { %3693 = vadd.xlane.f32.xlu1 %v10091_v49  ;;  %v4591_v1 = vsub.f32 %v9597_v61, %v10089_v57 }
 0x36c   : > { %v10100_v50 = vpop.xlane.xlu1 %4539  ;;  %3695 = vadd.xlane.f32.xlu0 %v10096_v18 }
 0x36d   : > { %v10103_v42 = vpop.xlane.xlu0 %4541 }
 0x36e   : > { %3697 = vadd.xlane.f32.xlu1 %v10105_v29 }
 0x370   : > { %v10114_v20 = vpop.xlane.xlu1 %4543  ;;  %3699 = vadd.xlane.f32.xlu0 %v10110_v13 }
 0x371   : > { %v10119_v19 = vpop.xlane.xlu0 %4545 }
 0x372   : > { %3701 = vadd.xlane.f32.xlu1 %v10121_v36 }
 0x374   : > { %v10128_v0 = vpop.xlane.xlu1 %4547  ;;  %3703 = vadd.xlane.f32.xlu0 %v10124_v59 }
 0x375   : > { %v2642_v4 = vpop.xlane.xlu0 %2641 }
 0x376   : > { %7815 = vrcp.f32 %v2642_v4  ;;  %3705 = vadd.xlane.f32.xlu1 %v10131_v32  ;;  %v10162_v4 = vpop.eup %7813 }
 0x377   : > { %7817 = vpow2.f32 %v3653_v48 }
 0x378   : > { %v2644_v53 = vpop.xlane.xlu1 %2643  ;;  %7819 = vpow2.f32 %v3655_v40  ;;  %3707 = vadd.xlane.f32.xlu0 %v10138_v55  ;;  %v4585_v40 = vsub.f32 %v9568_v41, %v10047_v7 }
 0x379   : > { %7821 = vrcp.f32 %v2644_v53  ;;  %v10143_v31 = vpop.xlane.xlu0 %4549 }
 0x37a   : > { %3709 = vadd.xlane.f32.xlu1 %v10141_v38  ;;  %7823 = vpow2.f32 %v3657_v8  ;;  %v4621_v53 = vmul.f32 1.442695, %v4585_v40  ;;  %v3084_v40 = vld [vmem:[#allocation4 + $0x40] sm:$0xff] }
 0x37b   : > { %7825 = vpow2.f32 %v4613_v62 }
 0x37c   : > { %v10152_v48 = vpop.xlane.xlu1 %4551  ;;  %3711 = vadd.xlane.f32.xlu0 %v10148_v43  ;;  %7827 = vpow2.f32 %v4615_v3 }
 0x37d   : > { %v2646_v22 = vpop.xlane.xlu0 %2645 }
 0x37e   : > { %3713 = vadd.xlane.f32.xlu1 %v10155_v44  ;;  %7829 = vrcp.f32 %v2646_v22  ;;  %v3085_v22 = vld [vmem:[#allocation4 + $0x48] sm:$0xff] }
 0x37f   : > { %v7537_v35 = vpack.c.bf16 %v3085_v22, %v3084_v40  ;;  %v3088_v22 = vld [vmem:[#allocation4 + $0xa0] sm:$0xff] }
 0x380   : > { %v2648_v34 = vpop.xlane.xlu1 %2647  ;;  %v7816_v27 = vpop.eup %7815  ;;  %3715 = vadd.xlane.f32.xlu0 %v10162_v4 }
 0x381   : > { %v10165_v8 = vpop.eup %7817  ;;  %7831 = vrcp.f32 %v2648_v34  ;;  %v10167_v41 = vpop.xlane.xlu0 %4553  ;;  %v2737_v7 = vmul.f32 %v7816_v27, %v9624_v5  ;;  %v3087_v34 = vld [vmem:[#allocation4 + $0x78] sm:$0xff] }
 0x382   : > { %v10170_v62 = vpop.eup %7819  ;;  %7833 = vpow2.f32 %v4617_v60  ;;  %3717 = vadd.xlane.f32.xlu1 %v10165_v8 }
 0x383   : > { %v7822_v3 = vpop.eup %7821  ;;  %7835 = vpow2.f32 %v4619_v12  ;;  %6929 = vmatprep.mubr.f32.mxu0 %v2737_v7  ;;  %v3086_v12 = vld [vmem:[#allocation4 + $0x70] sm:$0xff] }
 0x384   : > { %v10177_v58 = vpop.xlane.xlu1 %4555  ;;  %3719 = vadd.xlane.f32.xlu0 %v10170_v62  ;;  %v2738_v5 = vmul.f32 %v7822_v3, %v9630_v11  ;;  %v10181_v60 = vpop.eup %7823  ;;  %7837 = vpow2.f32 %v4621_v53  ;;  %v4627_v11 = vmul.f32 1.442695, %v4588_v25  ;;  %v7541_v7 = vpack.c.bf16 %v3087_v34, %v3086_v12  ;;  %v3090_v12 = vld [vmem:[#allocation4 + $0xd0] sm:$0xff] }
 0x385   : > { %v2650_v14 = vpop.xlane.xlu0 %2649  ;;  %7839 = vpow2.f32 %v4623_v30  ;;  %v10188_v27 = vpop.eup %7825  ;;  %v4631_v30 = vmul.f32 1.442695, %v4590_v2  ;;  %v4592_v25 = vsub.f32 %v9602_v47, %v10100_v50  ;;  %v4633_v50 = vmul.f32 1.442695, %v4591_v1 }
 0x386   : > { %6930 = vmatmul.mubr.f32.vlgmr.msra.gmra.mrb[60].mxu0 %v2738_v5  ;;  %3721 = vadd.xlane.f32.xlu1 %v10181_v60  ;;  %7841 = vrcp.f32 %v2650_v14  ;;  %v10191_v24 = vpop.eup %7827  ;;  %v3089_v5 = vld [vmem:[#allocation4 + $0xa8] sm:$0xff] }
 0x387   : > { %7536 = vmatpush3.bf16.msra.mxu0 %v9578_v56 }
 0x388   : > { %v2652_v53 = vpop.xlane.xlu1 %2651  ;;  %7538 = vmatprep.subr.bf16.mxu0 %v7537_v35  ;;  %4677 = vadd.xlane.f32.xlu0 %v10188_v27  ;;  %v7830_v6 = vpop.eup %7829 }
 0x389   : > { %7843 = vrcp.f32 %v2652_v53  ;;  %v10194_v26 = vpop.xlane.xlu0 %4557  ;;  %v2739_v56 = vmul.f32 %v7830_v6, %v9646_v16  ;;  %v11026_v16 = vld [vmem:[#allocation58_spill] sm:$0xff] }
 0x38a   : > { %7845 = vpow2.f32 %v4625_v28  ;;  %4679 = vadd.xlane.f32.xlu1 %v10191_v24  ;;  %v4593_v14 = vsub.f32 %v11026_v16, %v10103_v42  ;;  %v11027_v28 = vld [vmem:[#allocation59_spill] sm:$0xff]  ;;  %v11030_v16 = vld [vmem:[#allocation61_spill] sm:$0xff] }
 0x38b   : > { %v7832_v3 = vpop.eup %7831  ;;  %7847 = vpow2.f32 %v4627_v11  ;;  %7540 = vmatpush3.bf16.msra.mxu0 %v7537_v35  ;;  %6932 = vmatprep.mubr.f32.mxu0 %v2739_v56  ;;  %v4594_v2 = vsub.f32 %v11027_v28, %v10114_v20  ;;  %v7545_v35 = vpack.c.bf16 %v3089_v5, %v3088_v22  ;;  %v4635_v11 = vmul.f32 1.442695, %v4592_v25  ;;  %v11028_v56 = vld [vmem:[#allocation60_spill] sm:$0xff]  ;;  %v3092_v22 = vld [vmem:[#allocation4 + $0x100] sm:$0xff]  ;;  %v3093_v5 = vld [vmem:[#allocation4 + $0x108] sm:$0xff] }
 0x38c   : > { %v10202_v40 = vpop.xlane.xlu1 %4559  ;;  %v10204_v23 = vpop.eup %7833  ;;  %7542 = vmatprep.subr.bf16.mxu0 %v7541_v7  ;;  %v2740_v61 = vmul.f32 %v7832_v3, %v9654_v17  ;;  %7849 = vpow2.f32 %v4629_v33  ;;  %v3091_v17 = vld [vmem:[#allocation4 + $0xd8] sm:$0xff]  ;;  %v4637_v33 = vmul.f32 1.442695, %v4593_v14  ;;  %v4595_v3 = vsub.f32 %v11028_v56, %v10119_v19 }
 0x38d   : > { %v10207_v57 = vpop.eup %7835  ;;  %4681 = vadd.xlane.f32.xlu0 %v10204_v23  ;;  %v2654_v47 = vpop.xlane.xlu0 %2653  ;;  %7851 = vpow2.f32 %v4631_v30  ;;  %v7549_v30 = vpack.c.bf16 %v3091_v17, %v3090_v12  ;;  %v4639_v1 = vmul.f32 1.442695, %v4594_v2  ;;  %v4596_v14 = vsub.f32 %v11030_v16, %v10128_v0  ;;  %v11034_v12 = vld [vmem:[#allocation62_spill] sm:$0xff] }
 0x38e   : > { %6933 = vmatmul.mubr.f32.gmra.mrb[62].mxu0 %v2740_v61  ;;  %4683 = vadd.xlane.f32.xlu1 %v10207_v57  ;;  %v10215_v34 = vpop.eup %7837  ;;  %7853 = vrcp.f32 %v2654_v47  ;;  %v4597_v17 = vsub.f32 %v11034_v12, %v10143_v31 }
 0x38f   : > { %7544 = vmatpush3.bf16.msra.mxu0 %v7541_v7  ;;  %v10217_v53 = vpop.eup %7839  ;;  %v11029_v7 = vld [vmem:[#allocation66_spill] sm:$0xff] }
 0x390   : > { %v2656_v42 = vpop.xlane.xlu1 %2655  ;;  %7546 = vmatprep.subr.bf16.mxu0 %v7545_v35  ;;  %v7842_v6 = vpop.eup %7841 }
 0x391   : > { %7855 = vrcp.f32 %v2656_v42  ;;  %4685 = vadd.xlane.f32.xlu0 %v10215_v34  ;;  %v10220_v20 = vpop.xlane.xlu0 %4561  ;;  %v2741_v25 = vmul.f32 %v7842_v6, %v11029_v7  ;;  %v7553_v42 = vpack.c.bf16 %v3093_v5, %v3092_v22  ;;  %v6816_v0 = vpop.f32.mrb[58].mxu0  ;;  %v11035_v6 = vld [vmem:[#allocation63_spill] sm:$0xff]  ;;  %v3094_v7 = vld [vmem:[#allocation4 + $0x130] sm:$0xff]  ;;  %v4643_v22 = vmul.f32 1.442695, %v4596_v14 }
 0x392   : > { %7857 = vpow2.f32 %v4633_v50  ;;  %4687 = vadd.xlane.f32.xlu1 %v10217_v53  ;;  %v11032_v50 = vld [vmem:[#allocation67_spill] sm:$0xff]  ;;  %v4598_v56 = vsub.f32 %v11035_v6, %v10152_v48  ;;  %v3096_v6 = vld [vmem:[#allocation4 + $0x160] sm:$0xff] }
 0x393   : > { %v7844_v61 = vpop.eup %7843  ;;  %7859 = vpow2.f32 %v4635_v11  ;;  %7548 = vmatpush3.bf16.msra.mxu0 %v7545_v35  ;;  %6935 = vmatprep.mubr.f32.mxu0 %v2741_v25  ;;  %v4641_v35 = vmul.f32 1.442695, %v4595_v3  ;;  %v3095_v25 = vld [vmem:[#allocation4 + $0x138] sm:$0xff] }
 0x394   : > { %v10228_v47 = vpop.xlane.xlu1 %4563  ;;  %v10230_v28 = vpop.eup %7845  ;;  %7550 = vmatprep.subr.bf16.mxu0 %v7549_v30  ;;  %v2742_v19 = vmul.f32 %v7844_v61, %v11032_v50  ;;  %7861 = vpow2.f32 %v4637_v33  ;;  %v8077_v33 = vld [vmem:[%s10756_s4 + $0x2] ss:$0 sm:$0xff]  ;;  %v4647_v14 = vmul.f32 1.442695, %v4598_v56 }
 0x395   : > { %11031 = vst [vmem:[#allocation47_spill] sm:$0xff] %v10230_v28  ;;  %v10233_v2 = vpop.eup %7847  ;;  %4689 = vadd.xlane.f32.xlu0 %v10230_v28  ;;  %v2658_v11 = vpop.xlane.xlu0 %2657  ;;  %7863 = vpow2.f32 %v4639_v1  ;;  %v1789_v31 = vadd.f32 %v8077_v33, %v6816_v0  ;;  %v7557_v0 = vpack.c.bf16 %v3095_v25, %v3094_v7 }
 0x396   : > { %11033 = vst [vmem:[#allocation48_spill] sm:$0xff] %v10233_v2  ;;  %6936 = vmatmul.mubr.f32.gmra.mrb[64].mxu0 %v2742_v19  ;;  %4691 = vadd.xlane.f32.xlu1 %v10233_v2  ;;  %v1783_v61 = vpop.f32.mrb[59].mxu0  ;;  %v10244_v16 = vpop.eup %7849  ;;  %7865 = vrcp.f32 %v2658_v11  ;;  %v4645_v19 = vmul.f32 1.442695, %v4597_v17  ;;  %v3097_v2 = vld [vmem:[#allocation4 + $0x168] sm:$0xff] }
 0x397   : > { %7552 = vmatpush3.bf16.msra.mxu0 %v7549_v30  ;;  %v1784_v3 = vadd.f32 %v8077_v33, %v1783_v61  ;;  %v10246_v5 = vpop.eup %7851  ;;  %v1839_v48 = vmax.f32 %v1789_v31, 0.0  ;;  %v11036_v30 = vld [vmem:[#allocation64_spill] sm:$0xff]  ;;  %v11037_v33 = vld [vmem:[#allocation70_spill] sm:$0xff]  ;;  %v11038_v61 = vld [vmem:[#allocation65_spill] sm:$0xff]  ;;  %v7561_v56 = vpack.c.bf16 %v3097_v2, %v3096_v6 }
 0x398   : > { %v2660_v1 = vpop.xlane.xlu1 %2659  ;;  %7554 = vmatprep.subr.bf16.mxu0 %v7553_v42  ;;  %v7854_v50 = vpop.eup %7853  ;;  %v4599_v11 = vsub.f32 %v11036_v30, %v10167_v41 }
 0x399   : > { %7867 = vrcp.f32 %v2660_v1  ;;  %4693 = vadd.xlane.f32.xlu0 %v10244_v16  ;;  %v10249_v12 = vpop.xlane.xlu0 %4565  ;;  %v1838_v28 = vmax.f32 %v1784_v3, 0.0  ;;  %v2743_v31 = vmul.f32 %v7854_v50, %v11037_v33  ;;  %1887 = vst.msk [vmem:[#allocation4 + $0x178] sm:$0xff] %vm387_vm0, %v1839_v48  ;;  %v4600_v1 = vsub.f32 %v11038_v61, %v10177_v58  ;;  %v4100_v50 = vld [vmem:[#allocation4 + $0x20] sm:$0xff] }
 0x39a   : > { %7869 = vpow2.f32 %v4641_v35  ;;  %4695 = vadd.xlane.f32.xlu1 %v10246_v5 }
 0x39b   : > { %v7856_v17 = vpop.eup %7855  ;;  %7871 = vpow2.f32 %v4643_v22  ;;  %7556 = vmatpush3.bf16.msra.mxu0 %v7553_v42  ;;  %1886 = vst.msk [vmem:[#allocation4 + $0x170] sm:$0xff] %vm387_vm0, %v1838_v28  ;;  %6938 = vmatprep.mubr.f32.mxu0 %v2743_v31  ;;  %v11039_v22 = vld [vmem:[#allocation68_spill] sm:$0xff]  ;;  %v4649_v42 = vmul.f32 1.442695, %v4599_v11  ;;  %v11040_v28 = vld [vmem:[#allocation69_spill] sm:$0xff]  ;;  %v11041_v31 = vld [vmem:[#allocation71_spill] sm:$0xff] }
 0x39c   : > { %v10258_v7 = vpop.xlane.xlu1 %4567  ;;  %v10261_v35 = vpop.eup %7857  ;;  %7558 = vmatprep.subr.bf16.mxu0 %v7557_v0  ;;  %v2744_v41 = vmul.f32 %v7856_v17, %v9718_v45  ;;  %7873 = vpow2.f32 %v4645_v19  ;;  %v4601_v3 = vsub.f32 %v11039_v22, %v10194_v26  ;;  %v4602_v48 = vsub.f32 %v11040_v28, %v10202_v40  ;;  %v4101_v45 = vld [vmem:[#allocation4 + $0x28] sm:$0xff] }
 0x39d   : > { %v10264_v25 = vpop.eup %7859  ;;  %4697 = vadd.xlane.f32.xlu0 %v10261_v35  ;;  %v2662_v58 = vpop.xlane.xlu0 %2661  ;;  %7875 = vpow2.f32 %v4647_v14  ;;  %v4651_v6 = vmul.f32 1.442695, %v4600_v1  ;;  %v10277_v11 = vpack.c.bf16 %v4101_v45, %v4100_v50  ;;  %v4603_v17 = vsub.f32 %v11041_v31, %v10220_v20  ;;  %v11043_v20 = vld [vmem:[#allocation11_spill] sm:$0xff] }
 0x39e   : > { %6939 = vmatmul.mubr.f32.gmra.mrb[66].mxu0 %v2744_v41  ;;  %4699 = vadd.xlane.f32.xlu1 %v10264_v25  ;;  %v10272_v2 = vpop.eup %7861  ;;  %7877 = vrcp.f32 %v2662_v58  ;;  %v4653_v14 = vmul.f32 1.442695, %v4601_v3  ;;  %v4655_v33 = vmul.f32 1.442695, %v4602_v48  ;;  %v4604_v1 = vsub.f32 %v9727_v15, %v10228_v47  ;;  %v11042_v3 = vld [vmem:[#allocation10_spill] sm:$0xff] }
 0x39f   : > { %7560 = vmatpush3.bf16.msra.mxu0 %v7557_v0  ;;  %v10274_v26 = vpop.eup %7863  ;;  %v4657_v15 = vmul.f32 1.442695, %v4603_v17  ;;  %v4606_v47 = vsub.f32 %v9754_v51, %v10258_v7  ;;  %v11045_v7 = vld [vmem:[#allocation12_spill] sm:$0xff]  ;;  %v11046_v17 = vld [vmem:[#allocation73_spill] sm:$0xff] }
 0x3a0   : > { %v2664_v19 = vpop.xlane.xlu1 %2663  ;;  %7562 = vmatprep.subr.bf16.mxu0 %v7561_v56  ;;  %v7866_v30 = vpop.eup %7865  ;;  %v4659_v48 = vmul.f32 1.442695, %v4604_v1 }
 0x3a1   : > { %7879 = vrcp.f32 %v2664_v19  ;;  %4701 = vadd.xlane.f32.xlu0 %v10272_v2  ;;  %v4570_v40 = vpop.xlane.xlu0 %4569  ;;  %v2745_v0 = vmul.f32 %v7866_v30, %v9735_v63  ;;  %v4605_v63 = vsub.f32 %v11043_v20, %v10249_v12  ;;  %v4663_v30 = vmul.f32 1.442695, %v4606_v47 }
 0x3a2   : > { %7881 = vpow2.f32 %v4649_v42  ;;  %4703 = vadd.xlane.f32.xlu1 %v10274_v26 }
 0x3a3   : > { %v7868_v61 = vpop.eup %7867  ;;  %7883 = vpow2.f32 %v4651_v6  ;;  %7564 = vmatpush3.bf16.msra.mxu0 %v7561_v56  ;;  %6941 = vmatprep.mubr.f32.mxu0 %v2745_v0  ;;  %v4661_v12 = vmul.f32 1.442695, %v4605_v63 }
 0x3a4   : > { %v4572_v41 = vpop.xlane.xlu1 %4571  ;;  %v10285_v22 = vpop.eup %7869  ;;  %7614 = vmatprep.subr.bf16.mxu0 %v10277_v11  ;;  %v2746_v58 = vmul.f32 %v7868_v61, %v11042_v3  ;;  %7885 = vpow2.f32 %v4653_v14  ;;  %v11044_v14 = vld [vmem:[#allocation72_spill] sm:$0xff]  ;;  %v11047_v3 = vld [vmem:[#allocation13_spill] sm:$0xff] }
 0x3a5   : > { %v10289_v42 = vpop.eup %7871  ;;  %4705 = vadd.xlane.f32.xlu0 %v10285_v22  ;;  %v2666_v28 = vpop.xlane.xlu0 %2665  ;;  %7887 = vpow2.f32 %v4655_v33  ;;  %v4607_v51 = vsub.f32 %v11044_v14, %v4570_v40  ;;  %v4608_v0 = vsub.f32 %v11046_v17, %v4572_v41 }
 0x3a6   : > { %6942 = vmatmul.mubr.f32.gmra.mrb[68].mxu0 %v2746_v58  ;;  %4707 = vadd.xlane.f32.xlu1 %v10289_v42  ;;  %v10297_v56 = vpop.eup %7873  ;;  %7889 = vrcp.f32 %v2666_v28 }
 0x3a7   : > { %v10299_v45 = vpop.eup %7875  ;;  %v4665_v28 = vmul.f32 1.442695, %v4607_v51  ;;  %v4667_v47 = vmul.f32 1.442695, %v4608_v0 }
 0x3a8   : > { %v2668_v50 = vpop.xlane.xlu1 %2667  ;;  %v7878_v6 = vpop.eup %7877 }
 0x3a9   : > { %7891 = vrcp.f32 %v2668_v50  ;;  %4709 = vadd.xlane.f32.xlu0 %v10297_v56  ;;  %v4574_v19 = vpop.xlane.xlu0 %4573  ;;  %v2747_v33 = vmul.f32 %v7878_v6, %v11045_v7 }
 0x3aa   : > { %7893 = vpow2.f32 %v4657_v15  ;;  %4711 = vadd.xlane.f32.xlu1 %v10299_v45  ;;  %v4609_v63 = vsub.f32 %v9808_v37, %v4574_v19 }
 0x3ab   : > { %v7880_v31 = vpop.eup %7879  ;;  %7895 = vpow2.f32 %v4659_v48  ;;  %6944 = vmatprep.mubr.f32.mxu0 %v2747_v33 }
 0x3ac   : > { %v4576_v61 = vpop.xlane.xlu1 %4575  ;;  %v10306_v1 = vpop.eup %7881  ;;  %v2748_v58 = vmul.f32 %v7880_v31, %v11047_v3  ;;  %7897 = vpow2.f32 %v4661_v12  ;;  %v4669_v12 = vmul.f32 1.442695, %v4609_v63 }
 0x3ad   : > { %v10309_v20 = vpop.eup %7883  ;;  %4713 = vadd.xlane.f32.xlu0 %v10306_v1  ;;  %v2670_v40 = vpop.xlane.xlu0 %2669  ;;  %7899 = vpow2.f32 %v4663_v30  ;;  %v4610_v15 = vsub.f32 %v9818_v52, %v4576_v61 }
 0x3ae   : > { %6945 = vmatmul.mubr.f32.gmra.mrb[70].mxu0 %v2748_v58  ;;  %4715 = vadd.xlane.f32.xlu1 %v10309_v20  ;;  %v10315_v41 = vpop.eup %7885  ;;  %7901 = vrcp.f32 %v2670_v40 }
 0x3af   : > { %v10317_v50 = vpop.eup %7887  ;;  %v4671_v19 = vmul.f32 1.442695, %v4610_v15 }
 0x3b0   : > { %v2672_v48 = vpop.xlane.xlu1 %2671  ;;  %v7890_v6 = vpop.eup %7889 }
 0x3b1   : > { %7903 = vrcp.f32 %v2672_v48  ;;  %4717 = vadd.xlane.f32.xlu0 %v10315_v41  ;;  %v4578_v37 = vpop.xlane.xlu0 %4577  ;;  %v2749_v30 = vmul.f32 %v7890_v6, %v9792_v46 }
 0x3b2   : > { %7905 = vpow2.f32 %v4665_v28  ;;  %v4611_v52 = vsub.f32 %v9841_v54, %v4578_v37  ;;  %4719 = vadd.xlane.f32.xlu1 %v10317_v50 }
 0x3b3   : > { %v7892_v14 = vpop.eup %7891  ;;  %7907 = vpow2.f32 %v4667_v47  ;;  %6947 = vmatprep.mubr.f32.mxu0 %v2749_v30  ;;  %v11049_v30 = vld [vmem:[#allocation14_spill] sm:$0xff] }
 0x3b4   : > { %v4580_v51 = vpop.xlane.xlu1 %4579  ;;  %v10323_v7 = vpop.eup %7893  ;;  %v4673_v33 = vmul.f32 1.442695, %v4611_v52  ;;  %v2750_v17 = vmul.f32 %v7892_v14, %v9802_v9  ;;  %7909 = vpow2.f32 %v4669_v12 }
 0x3b5   : > { %v4612_v31 = vsub.f32 %v9850_v10, %v4580_v51  ;;  %v10327_v0 = vpop.eup %7895  ;;  %4721 = vadd.xlane.f32.xlu0 %v10323_v7  ;;  %v2674_v54 = vpop.xlane.xlu0 %2673  ;;  %7911 = vpow2.f32 %v4671_v19 }
 0x3b6   : > { %6948 = vmatmul.mubr.f32.gmra.mrb[72].mxu0 %v2750_v17  ;;  %4723 = vadd.xlane.f32.xlu1 %v10327_v0  ;;  %v10331_v46 = vpop.eup %7897  ;;  %7913 = vrcp.f32 %v2674_v54  ;;  %v11050_v17 = vld [vmem:[#allocation15_spill] sm:$0xff] }
 0x3b7   : > { %v4675_v61 = vmul.f32 1.442695, %v4612_v31  ;;  %v10333_v58 = vpop.eup %7899  ;;  %7915 = vpow2.f32 %v4673_v33 }
 0x3b8   : > { %v2676_v3 = vpop.xlane.xlu1 %2675  ;;  %v7902_v10 = vpop.eup %7901 }
 0x3b9   : > { %7917 = vrcp.f32 %v2676_v3  ;;  %4725 = vadd.xlane.f32.xlu0 %v10331_v46  ;;  %v2678_v9 = vpop.xlane.xlu0 %2677  ;;  %v2751_v63 = vmul.f32 %v7902_v10, %v9826_v21  ;;  %v11052_v10 = vld [vmem:[#allocation16_spill] sm:$0xff] }
 0x3ba   : > { %7919 = vrcp.f32 %v2678_v9  ;;  %4727 = vadd.xlane.f32.xlu1 %v10333_v58 }
 0x3bb   : > { %v7904_v40 = vpop.eup %7903  ;;  %7921 = vpow2.f32 %v4675_v61  ;;  %6950 = vmatprep.mubr.f32.mxu0 %v2751_v63 }
 0x3bc   : > { %v2680_v28 = vpop.xlane.xlu1 %2679  ;;  %v10338_v15 = vpop.eup %7905  ;;  %v2752_v47 = vmul.f32 %v7904_v40, %v9835_v39 }
 0x3bd   : > { %7923 = vrcp.f32 %v2680_v28  ;;  %v10341_v48 = vpop.eup %7907  ;;  %4729 = vadd.xlane.f32.xlu0 %v10338_v15  ;;  %v2682_v6 = vpop.xlane.xlu0 %2681  ;;  %v11053_v28 = vld [vmem:[#allocation17_spill] sm:$0xff] }
 0x3be   : > { %7925 = vrcp.f32 %v2682_v6  ;;  %6951 = vmatmul.mubr.f32.gmra.mrb[74].mxu0 %v2752_v47  ;;  %4731 = vadd.xlane.f32.xlu1 %v10341_v48  ;;  %v10345_v12 = vpop.eup %7909 }
 0x3bf   : > { %v10347_v37 = vpop.eup %7911 }
 0x3c0   : > { %v2684_v21 = vpop.xlane.xlu1 %2683  ;;  %v7914_v19 = vpop.eup %7913 }
 0x3c1   : > { %7927 = vrcp.f32 %v2684_v21  ;;  %4733 = vadd.xlane.f32.xlu0 %v10345_v12  ;;  %v2686_v52 = vpop.xlane.xlu0 %2685  ;;  %v10350_v39 = vpop.eup %7915  ;;  %v2753_v14 = vmul.f32 %v7914_v19, %v11049_v30  ;;  %v11054_v19 = vld [vmem:[#allocation18_spill] sm:$0xff] }
 0x3c2   : > { %11048 = vst [vmem:[#allocation49_spill] sm:$0xff] %v10350_v39  ;;  %7929 = vrcp.f32 %v2686_v52  ;;  %4735 = vadd.xlane.f32.xlu1 %v10347_v37 }
 0x3c3   : > { %v7918_v51 = vpop.eup %7917  ;;  %6953 = vmatprep.mubr.f32.mxu0 %v2753_v14 }
 0x3c4   : > { %v2688_v33 = vpop.xlane.xlu1 %2687  ;;  %v7920_v31 = vpop.eup %7919  ;;  %v2754_v54 = vmul.f32 %v7918_v51, %v11050_v17  ;;  %v11055_v51 = vld [vmem:[#allocation19_spill] sm:$0xff] }
 0x3c5   : > { %7931 = vrcp.f32 %v2688_v33  ;;  %v10355_v61 = vpop.eup %7921  ;;  %4737 = vadd.xlane.f32.xlu0 %v10350_v39  ;;  %v2690_v3 = vpop.xlane.xlu0 %2689  ;;  %v2755_v9 = vmul.f32 %v7920_v31, %v11052_v10  ;;  %v4115_v39 = vld [vmem:[#allocation4 + $0x178] sm:$0xff] }
 0x3c6   : > { %11051 = vst [vmem:[#allocation50_spill] sm:$0xff] %v10355_v61  ;;  %7933 = vrcp.f32 %v2690_v3  ;;  %6954 = vmatmul.mubr.f32.gmra.mrb[76].mxu0 %v2754_v54  ;;  %4739 = vadd.xlane.f32.xlu1 %v10355_v61  ;;  %v11056_v54 = vld [vmem:[#allocation20_spill] sm:$0xff] }
 0x3c7   : > { %v7924_v63 = vpop.eup %7923  ;;  %6956 = vmatprep.mubr.f32.mxu0 %v2755_v9 }
 0x3c8   : > { %v2692_v40 = vpop.xlane.xlu1 %2691  ;;  %v2756_v47 = vmul.f32 %v7924_v63, %v11053_v28  ;;  %v7926_v6 = vpop.eup %7925  ;;  %v11057_v63 = vld [vmem:[#allocation21_spill] sm:$0xff] }
 0x3c9   : > { %7935 = vrcp.f32 %v2692_v40  ;;  %v2694_v21 = vpop.xlane.xlu0 %2693  ;;  %v2757_v52 = vmul.f32 %v7926_v6, %v11054_v19 }
 0x3ca   : > { %7937 = vrcp.f32 %v2694_v21  ;;  %6957 = vmatmul.mubr.f32.gmra.mrb[78].mxu0 %v2756_v47  ;;  %v11058_v47 = vld [vmem:[#allocation22_spill] sm:$0xff] }
 0x3cb   : > { %v7928_v30 = vpop.eup %7927  ;;  %6959 = vmatprep.mubr.f32.mxu0 %v2757_v52 }
 0x3cc   : > { %v2696_v14 = vpop.xlane.xlu1 %2695  ;;  %v2758_v33 = vmul.f32 %v7928_v30, %v11055_v51  ;;  %v7930_v31 = vpop.eup %7929  ;;  %v11059_v30 = vld [vmem:[#allocation23_spill] sm:$0xff] }
 0x3cd   : > { %7939 = vrcp.f32 %v2696_v14  ;;  %v2698_v17 = vpop.xlane.xlu0 %2697  ;;  %v2759_v3 = vmul.f32 %v7930_v31, %v11056_v54 }
 0x3ce   : > { %7941 = vrcp.f32 %v2698_v17  ;;  %6960 = vmatmul.mubr.f32.gmra.mrb[80].mxu0 %v2758_v33  ;;  %v11060_v33 = vld [vmem:[#allocation24_spill] sm:$0xff] }
 0x3cf   : > { %v7932_v10 = vpop.eup %7931  ;;  %6962 = vmatprep.mubr.f32.mxu0 %v2759_v3 }
 0x3d0   : > { %v2700_v9 = vpop.xlane.xlu1 %2699  ;;  %v2760_v40 = vmul.f32 %v7932_v10, %v11057_v63  ;;  %v7934_v28 = vpop.eup %7933  ;;  %v11061_v10 = vld [vmem:[#allocation25_spill] sm:$0xff] }
 0x3d1   : > { %7943 = vrcp.f32 %v2700_v9  ;;  %v2702_v6 = vpop.xlane.xlu0 %2701  ;;  %v2761_v21 = vmul.f32 %v7934_v28, %v11058_v47 }
 0x3d2   : > { %7945 = vrcp.f32 %v2702_v6  ;;  %6963 = vmatmul.mubr.f32.gmra.mrb[82].mxu0 %v2760_v40  ;;  %v11062_v40 = vld [vmem:[#allocation26_spill] sm:$0xff] }
 0x3d3   : > { %v7936_v19 = vpop.eup %7935  ;;  %6965 = vmatprep.mubr.f32.mxu0 %v2761_v21 }
 0x3d4   : > { %v2704_v52 = vpop.xlane.xlu1 %2703  ;;  %v2762_v14 = vmul.f32 %v7936_v19, %v11059_v30  ;;  %v7938_v51 = vpop.eup %7937  ;;  %v11063_v19 = vld [vmem:[#allocation27_spill] sm:$0xff] }
 0x3d5   : > { %7947 = vrcp.f32 %v2704_v52  ;;  %v3660_v31 = vpop.xlane.xlu0 %3659  ;;  %v2763_v17 = vmul.f32 %v7938_v51, %v11060_v33 }
 0x3d6   : > { %7949 = vrcp.f32 %v3660_v31  ;;  %6966 = vmatmul.mubr.f32.gmra.mrb[84].mxu0 %v2762_v14  ;;  %v11064_v14 = vld [vmem:[#allocation28_spill] sm:$0xff] }
 0x3d7   : > { %v7940_v54 = vpop.eup %7939  ;;  %6968 = vmatprep.mubr.f32.mxu0 %v2763_v17 }
 0x3d8   : > { %v3662_v3 = vpop.xlane.xlu1 %3661  ;;  %v2764_v9 = vmul.f32 %v7940_v54, %v11061_v10  ;;  %v7942_v63 = vpop.eup %7941  ;;  %v11065_v54 = vld [vmem:[#allocation29_spill] sm:$0xff] }
 0x3d9   : > { %7951 = vrcp.f32 %v3662_v3  ;;  %v3664_v28 = vpop.xlane.xlu0 %3663  ;;  %v2765_v6 = vmul.f32 %v7942_v63, %v11062_v40 }
 0x3da   : > { %7953 = vrcp.f32 %v3664_v28  ;;  %6969 = vmatmul.mubr.f32.gmra.mrb[86].mxu0 %v2764_v9  ;;  %v11066_v9 = vld [vmem:[#allocation30_spill] sm:$0xff] }
 0x3db   : > { %v7944_v47 = vpop.eup %7943  ;;  %6971 = vmatprep.mubr.f32.mxu0 %v2765_v6  ;;  %v11067_v6 = vld [vmem:[#allocation31_spill] sm:$0xff] }
 0x3dc   : > { %v3666_v21 = vpop.xlane.xlu1 %3665  ;;  %v2766_v52 = vmul.f32 %v7944_v47, %v11063_v19  ;;  %v7946_v30 = vpop.eup %7945  ;;  %v4102_v19 = vld [vmem:[#allocation4 + $0x50] sm:$0xff] }
 0x3dd   : > { %7955 = vrcp.f32 %v3666_v21  ;;  %v3668_v51 = vpop.xlane.xlu0 %3667  ;;  %v2767_v31 = vmul.f32 %v7946_v30, %v11064_v14  ;;  %v4103_v30 = vld [vmem:[#allocation4 + $0x58] sm:$0xff]  ;;  %v11068_v14 = vld [vmem:[#allocation32_spill] sm:$0xff] }
 0x3de   : > { %7957 = vrcp.f32 %v3668_v51  ;;  %6972 = vmatmul.mubr.f32.gmra.mrb[88].mxu0 %v2766_v52 }
 0x3df   : > { %v7948_v33 = vpop.eup %7947  ;;  %6974 = vmatprep.mubr.f32.mxu0 %v2767_v31 }
 0x3e0   : > { %v3670_v17 = vpop.xlane.xlu1 %3669  ;;  %v2768_v3 = vmul.f32 %v7948_v33, %v11065_v54  ;;  %v7950_v10 = vpop.eup %7949 }
 0x3e1   : > { %7959 = vrcp.f32 %v3670_v17  ;;  %v3672_v63 = vpop.xlane.xlu0 %3671  ;;  %v3755_v28 = vmul.f32 %v7950_v10, %v11066_v9  ;;  %v7617_v17 = vpack.c.bf16 %v4103_v30, %v4102_v19  ;;  %v4105_v9 = vld [vmem:[#allocation4 + $0x88] sm:$0xff]  ;;  %v4106_v30 = vld [vmem:[#allocation4 + $0xb0] sm:$0xff] }
 0x3e2   : > { %7961 = vrcp.f32 %v3672_v63  ;;  %6975 = vmatmul.mubr.f32.gmra.mrb[90].mxu0 %v2768_v3  ;;  %v11069_v3 = vld [vmem:[#allocation33_spill] sm:$0xff]  ;;  %v4104_v63 = vld [vmem:[#allocation4 + $0x80] sm:$0xff] }
 0x3e3   : > { %v7952_v40 = vpop.eup %7951  ;;  %7089 = vmatprep.mubr.f32.mxu0 %v3755_v28 }
 0x3e4   : > { %v3756_v47 = vmul.f32 %v7952_v40, %v11067_v6  ;;  %v3674_v21 = vpop.xlane.xlu1 %3673  ;;  %v7954_v51 = vpop.eup %7953  ;;  %v11070_v6 = vld [vmem:[#allocation34_spill] sm:$0xff] }
 0x3e5   : > { %7963 = vrcp.f32 %v3674_v21  ;;  %v3676_v52 = vpop.xlane.xlu0 %3675  ;;  %v3757_v31 = vmul.f32 %v7954_v51, %v11068_v14  ;;  %v7621_v51 = vpack.c.bf16 %v4105_v9, %v4104_v63  ;;  %v4108_v9 = vld [vmem:[#allocation4 + $0xe0] sm:$0xff] }
 0x3e6   : > { %7965 = vrcp.f32 %v3676_v52  ;;  %7090 = vmatmul.mubr.f32.vlgmr.msra.gmra.mrb[92].mxu0 %v3756_v47  ;;  %v4107_v52 = vld [vmem:[#allocation4 + $0xb8] sm:$0xff] }
 0x3e7   : > { %v7956_v33 = vpop.eup %7955  ;;  %7616 = vmatpush3.bf16.msra.mxu0 %v10277_v11  ;;  %7092 = vmatprep.mubr.f32.mxu0 %v3757_v31  ;;  %v11071_v11 = vld [vmem:[#allocation35_spill] sm:$0xff] }
 0x3e8   : > { %v3678_v54 = vpop.xlane.xlu1 %3677  ;;  %v3758_v10 = vmul.f32 %v7956_v33, %v11069_v3  ;;  %v7958_v28 = vpop.eup %7957  ;;  %7618 = vmatprep.subr.bf16.mxu0 %v7617_v17  ;;  %v11072_v33 = vld [vmem:[#allocation36_spill] sm:$0xff] }
 0x3e9   : > { %7967 = vrcp.f32 %v3678_v54  ;;  %v3680_v40 = vpop.xlane.xlu0 %3679  ;;  %v3759_v21 = vmul.f32 %v7958_v28, %v11070_v6  ;;  %v7625_v28 = vpack.c.bf16 %v4107_v52, %v4106_v30  ;;  %v4110_v52 = vld [vmem:[#allocation4 + $0x110] sm:$0xff] }
 0x3ea   : > { %7969 = vrcp.f32 %v3680_v40  ;;  %7093 = vmatmul.mubr.f32.gmra.mrb[94].mxu0 %v3758_v10  ;;  %v4109_v40 = vld [vmem:[#allocation4 + $0xe8] sm:$0xff] }
 0x3eb   : > { %v7960_v61 = vpop.eup %7959  ;;  %7620 = vmatpush3.bf16.msra.mxu0 %v7617_v17  ;;  %7095 = vmatprep.mubr.f32.mxu0 %v3759_v21  ;;  %v11073_v17 = vld [vmem:[#allocation37_spill] sm:$0xff]  ;;  %v11074_v21 = vld [vmem:[#allocation38_spill] sm:$0xff] }
 0x3ec   : > { %v3682_v47 = vpop.xlane.xlu1 %3681  ;;  %v3760_v19 = vmul.f32 %v7960_v61, %v11071_v11  ;;  %v7962_v14 = vpop.eup %7961  ;;  %7622 = vmatprep.subr.bf16.mxu0 %v7621_v51 }
 0x3ed   : > { %7971 = vrcp.f32 %v3682_v47  ;;  %v3684_v31 = vpop.xlane.xlu0 %3683  ;;  %v3761_v54 = vmul.f32 %v7962_v14, %v11072_v33  ;;  %v7629_v14 = vpack.c.bf16 %v4109_v40, %v4108_v9  ;;  %v4112_v40 = vld [vmem:[#allocation4 + $0x140] sm:$0xff] }
 0x3ee   : > { %7973 = vrcp.f32 %v3684_v31  ;;  %7096 = vmatmul.mubr.f32.gmra.mrb[96].mxu0 %v3760_v19  ;;  %v4111_v31 = vld [vmem:[#allocation4 + $0x118] sm:$0xff] }
 0x3ef   : > { %v7964_v3 = vpop.eup %7963  ;;  %7624 = vmatpush3.bf16.msra.mxu0 %v7621_v51  ;;  %7098 = vmatprep.mubr.f32.mxu0 %v3761_v54  ;;  %v11075_v51 = vld [vmem:[#allocation39_spill] sm:$0xff] }
 0x3f0   : > { %v3686_v10 = vpop.xlane.xlu1 %3685  ;;  %v3762_v63 = vmul.f32 %v7964_v3, %v11073_v17  ;;  %v7966_v61 = vpop.eup %7965  ;;  %7626 = vmatprep.subr.bf16.mxu0 %v7625_v28  ;;  %v11076_v3 = vld [vmem:[#allocation40_spill] sm:$0xff] }
 0x3f1   : > { %7975 = vrcp.f32 %v3686_v10  ;;  %v3688_v6 = vpop.xlane.xlu0 %3687  ;;  %v3763_v47 = vmul.f32 %v7966_v61, %v11074_v21  ;;  %v7633_v61 = vpack.c.bf16 %v4111_v31, %v4110_v52  ;;  %v11079_v52 = vld [vmem:[#allocation43_spill] sm:$0xff] }
 0x3f2   : > { %7977 = vrcp.f32 %v3688_v6  ;;  %7099 = vmatmul.mubr.f32.gmra.mrb[98].mxu0 %v3762_v63  ;;  %v4113_v6 = vld [vmem:[#allocation4 + $0x148] sm:$0xff] }
 0x3f3   : > { %v7968_v11 = vpop.eup %7967  ;;  %7628 = vmatpush3.bf16.msra.mxu0 %v7625_v28  ;;  %7101 = vmatprep.mubr.f32.mxu0 %v3763_v47  ;;  %v11077_v28 = vld [vmem:[#allocation41_spill] sm:$0xff] }
 0x3f4   : > { %v3690_v19 = vpop.xlane.xlu1 %3689  ;;  %v3764_v30 = vmul.f32 %v7968_v11, %v11075_v51  ;;  %v7970_v33 = vpop.eup %7969  ;;  %7630 = vmatprep.subr.bf16.mxu0 %v7629_v14  ;;  %v11078_v11 = vld [vmem:[#allocation42_spill] sm:$0xff]  ;;  %v4114_v51 = vld [vmem:[#allocation4 + $0x170] sm:$0xff] }
 0x3f5   : > { %7979 = vrcp.f32 %v3690_v19  ;;  %v3692_v54 = vpop.xlane.xlu0 %3691  ;;  %v3765_v10 = vmul.f32 %v7970_v33, %v11076_v3  ;;  %v7641_v3 = vpack.c.bf16 %v4115_v39, %v4114_v51 }
 0x3f6   : > { %7981 = vrcp.f32 %v3692_v54  ;;  %7102 = vmatmul.mubr.f32.gmra.mrb[100].mxu0 %v3764_v30  ;;  %v7637_v30 = vpack.c.bf16 %v4113_v6, %v4112_v40 }
 0x3f7   : > { %v7972_v17 = vpop.eup %7971  ;;  %7632 = vmatpush3.bf16.msra.mxu0 %v7629_v14  ;;  %7104 = vmatprep.mubr.f32.mxu0 %v3765_v10 }
 0x3f8   : > { %v3694_v63 = vpop.xlane.xlu1 %3693  ;;  %v3766_v9 = vmul.f32 %v7972_v17, %v11077_v28  ;;  %v7974_v21 = vpop.eup %7973  ;;  %7634 = vmatprep.subr.bf16.mxu0 %v7633_v61  ;;  %v11080_v17 = vld [vmem:[#allocation44_spill] sm:$0xff] }
 0x3f9   : > { %7983 = vrcp.f32 %v3694_v63  ;;  %v3696_v47 = vpop.xlane.xlu0 %3695  ;;  %v3767_v19 = vmul.f32 %v7974_v21, %v11078_v11 }
 0x3fa   : > { %7985 = vrcp.f32 %v3696_v47  ;;  %7105 = vmatmul.mubr.f32.gmra.mrb[102].mxu0 %v3766_v9  ;;  %v11081_v9 = vld [vmem:[#allocation45_spill] sm:$0xff]  ;;  %v11082_v47 = vld [vmem:[#allocation46_spill] sm:$0xff] }
 0x3fb   : > { %v7976_v33 = vpop.eup %7975  ;;  %7636 = vmatpush3.bf16.msra.mxu0 %v7633_v61  ;;  %7107 = vmatprep.mubr.f32.mxu0 %v3767_v19 }
 0x3fc   : > { %v3698_v14 = vpop.xlane.xlu1 %3697  ;;  %v3768_v31 = vmul.f32 %v7976_v33, %v11079_v52  ;;  %v7978_v54 = vpop.eup %7977  ;;  %7638 = vmatprep.subr.bf16.mxu0 %v7637_v30 }
 0x3fd   : > { %7987 = vrcp.f32 %v3698_v14  ;;  %v3700_v10 = vpop.xlane.xlu0 %3699  ;;  %v3769_v63 = vmul.f32 %v7978_v54, %v11080_v17 }
 0x3fe   : > { %7989 = vrcp.f32 %v3700_v10  ;;  %7108 = vmatmul.mubr.f32.gmra.mrb[104].mxu0 %v3768_v31 }
 0x3ff   : > { %v7980_v28 = vpop.eup %7979  ;;  %7640 = vmatpush3.bf16.msra.mxu0 %v7637_v30  ;;  %7110 = vmatprep.mubr.f32.mxu0 %v3769_v63 }
 0x400   : > { %v3702_v21 = vpop.xlane.xlu1 %3701  ;;  %v3770_v40 = vmul.f32 %v7980_v28, %v11081_v9  ;;  %v7982_v61 = vpop.eup %7981  ;;  %7642 = vmatprep.subr.bf16.mxu0 %v7641_v3 }
 0x401   : > { %7991 = vrcp.f32 %v3702_v21  ;;  %v3704_v6 = vpop.xlane.xlu0 %3703  ;;  %v3771_v11 = vmul.f32 %v7982_v61, %v11082_v47 }
 0x402   : > { %7993 = vrcp.f32 %v3704_v6  ;;  %7111 = vmatmul.mubr.f32.gmra.mrb[106].mxu0 %v3770_v40 }
 0x403   : > { %v7984_v19 = vpop.eup %7983  ;;  %7113 = vmatprep.mubr.f32.mxu0 %v3771_v11  ;;  %7644 = vmatpush3.bf16.msra.mxu0 %v7641_v3 }
 0x404   : > { %v3706_v39 = vpop.xlane.xlu1 %3705  ;;  %v3772_v51 = vmul.f32 %v7984_v19, %v10091_v49  ;;  %v7986_v33 = vpop.eup %7985 }
 0x405   : > { %7995 = vrcp.f32 %v3706_v39  ;;  %v3708_v30 = vpop.xlane.xlu0 %3707  ;;  %v3773_v14 = vmul.f32 %v7986_v33, %v10096_v18 }
 0x406   : > { %7997 = vrcp.f32 %v3708_v30  ;;  %7114 = vmatmul.mubr.f32.gmra.mrb[108].mxu0 %v3772_v51 }
 0x407   : > { %v7988_v52 = vpop.eup %7987  ;;  %7116 = vmatprep.mubr.f32.mxu0 %v3773_v14 }
 0x408   : > { %v3710_v31 = vpop.xlane.xlu1 %3709  ;;  %v3774_v54 = vmul.f32 %v7988_v52, %v10105_v29  ;;  %v7990_v10 = vpop.eup %7989 }
 0x409   : > { %7999 = vrcp.f32 %v3710_v31  ;;  %v3712_v17 = vpop.xlane.xlu0 %3711  ;;  %v3775_v63 = vmul.f32 %v7990_v10, %v10110_v13 }
 0x40a   : > { %8001 = vrcp.f32 %v3712_v17  ;;  %7117 = vmatmul.mubr.f32.gmra.mrb[110].mxu0 %v3774_v54 }
 0x40b   : > { %v7992_v28 = vpop.eup %7991  ;;  %7119 = vmatprep.mubr.f32.mxu0 %v3775_v63 }
 0x40c   : > { %v3714_v49 = vpop.xlane.xlu1 %3713  ;;  %v3776_v3 = vmul.f32 %v7992_v28, %v10121_v36  ;;  %v7994_v18 = vpop.eup %7993 }
 0x40d   : > { %8003 = vrcp.f32 %v3714_v49  ;;  %v3716_v21 = vpop.xlane.xlu0 %3715  ;;  %v3777_v9 = vmul.f32 %v7994_v18, %v10124_v59 }
 0x40e   : > { %8005 = vrcp.f32 %v3716_v21  ;;  %7120 = vmatmul.mubr.f32.gmra.mrb[112].mxu0 %v3776_v3 }
 0x40f   : > { %v7996_v40 = vpop.eup %7995  ;;  %7122 = vmatprep.mubr.f32.mxu0 %v3777_v9 }
 0x410   : > { %v3718_v29 = vpop.xlane.xlu1 %3717  ;;  %v3778_v61 = vmul.f32 %v7996_v40, %v10131_v32  ;;  %v7998_v13 = vpop.eup %7997 }
 0x411   : > { %8007 = vrcp.f32 %v3718_v29  ;;  %v3720_v6 = vpop.xlane.xlu0 %3719  ;;  %v3779_v47 = vmul.f32 %v7998_v13, %v10138_v55 }
 0x412   : > { %8009 = vrcp.f32 %v3720_v6  ;;  %7123 = vmatmul.mubr.f32.gmra.mrb[114].mxu0 %v3778_v61 }
 0x413   : > { %v8000_v11 = vpop.eup %7999  ;;  %7125 = vmatprep.mubr.f32.mxu0 %v3779_v47 }
 0x414   : > { %v3722_v36 = vpop.xlane.xlu1 %3721  ;;  %v3780_v19 = vmul.f32 %v8000_v11, %v10141_v38  ;;  %v8002_v59 = vpop.eup %8001 }
 0x415   : > { %8011 = vrcp.f32 %v3722_v36  ;;  %v4678_v39 = vpop.xlane.xlu0 %4677  ;;  %v3781_v51 = vmul.f32 %v8002_v59, %v10148_v43  ;;  %v11083_v59 = vld [vmem:[#allocation47_spill] sm:$0xff] }
 0x416   : > { %8013 = vrcp.f32 %v4678_v39  ;;  %7126 = vmatmul.mubr.f32.gmra.mrb[116].mxu0 %v3780_v19 }
 0x417   : > { %v8004_v33 = vpop.eup %8003  ;;  %7128 = vmatprep.mubr.f32.mxu0 %v3781_v51  ;;  %v11084_v51 = vld [vmem:[#allocation48_spill] sm:$0xff] }
 0x418   : > { %v4680_v32 = vpop.xlane.xlu1 %4679  ;;  %v3782_v30 = vmul.f32 %v8004_v33, %v10155_v44  ;;  %v8006_v55 = vpop.eup %8005 }
 0x419   : > { %8015 = vrcp.f32 %v4680_v32  ;;  %v3783_v14 = vmul.f32 %v8006_v55, %v10162_v4 }
 0x41a   : > { %v4682_v31 = vpop.xlane.xlu0 %4681  ;;  %7129 = vmatmul.mubr.f32.gmra.mrb[118].mxu0 %v3782_v30 }
 0x41b   : > { %v8008_v52 = vpop.eup %8007  ;;  %8017 = vrcp.f32 %v4682_v31  ;;  %7131 = vmatprep.mubr.f32.mxu0 %v3783_v14  ;;  %v347_v31 = vld [vmem:[%s10755_s3 + $0x58] sm:$0xff] }
 0x41c   : > { %v4684_v38 = vpop.xlane.xlu1 %4683  ;;  %v3784_v54 = vmul.f32 %v8008_v52, %v10165_v8  ;;  %v8010_v43 = vpop.eup %8009  ;;  %v346_v52 = vld [vmem:[%s10755_s3 + $0x50] sm:$0xff] }
 0x41d   : > { %8019 = vrcp.f32 %v4684_v38  ;;  %v3785_v10 = vmul.f32 %v8010_v43, %v10170_v62  ;;  %v7645_v38 = vpack.c.bf16 %v347_v31, %v346_v52 }
 0x41e   : > { %v4686_v63 = vpop.xlane.xlu0 %4685  ;;  %7132 = vmatmul.mubr.f32.gmra.mrb[120].mxu0 %v3784_v54 }
 0x41f   : > { %v8012_v17 = vpop.eup %8011  ;;  %8021 = vrcp.f32 %v4686_v63  ;;  %7134 = vmatprep.mubr.f32.mxu0 %v3785_v10  ;;  %7646 = vmatprep.subr.bf16.mxu1 %v7645_v38  ;;  %v348_v63 = vld [vmem:[%s10755_s3 + $0x60] sm:$0xff] }
 0x420   : > { %v4688_v44 = vpop.xlane.xlu1 %4687  ;;  %v3786_v4 = vmul.f32 %v8012_v17, %v10181_v60  ;;  %v8014_v28 = vpop.eup %8013  ;;  %7648 = vmatpush3.bf16.msra.mxu1 %v7645_v38 }
 0x421   : > { %8023 = vrcp.f32 %v4688_v44  ;;  %v4773_v49 = vmul.f32 %v8014_v28, %v10188_v27  ;;  %v349_v44 = vld [vmem:[%s10755_s3 + $0x68] sm:$0xff] }
 0x422   : > { %v4690_v18 = vpop.xlane.xlu0 %4689  ;;  %7135 = vmatmul.mubr.f32.gmra.mrb[122].mxu0 %v3786_v4  ;;  %v7649_v4 = vpack.c.bf16 %v349_v44, %v348_v63 }
 0x423   : > { %v8016_v3 = vpop.eup %8015  ;;  %8025 = vrcp.f32 %v4690_v18  ;;  %7249 = vmatprep.mubr.f32.mxu0 %v4773_v49 }
 0x424   : > { %v4774_v8 = vmul.f32 %v8016_v3, %v10191_v24  ;;  %v4692_v62 = vpop.xlane.xlu1 %4691  ;;  %7650 = vmatprep.subr.bf16.mxu1 %v7649_v4 }
 0x425   : > { %8027 = vrcp.f32 %v4692_v62  ;;  %v8018_v21 = vpop.eup %8017  ;;  %7652 = vmatpush3.bf16.msra.mxu1 %v7649_v4 }
 0x426   : > { %v4694_v40 = vpop.xlane.xlu0 %4693  ;;  %7250 = vmatmul.mubr.f32.vlgmr.msra.gmra.mrb[124].mxu0 %v4774_v8  ;;  %v4775_v29 = vmul.f32 %v8018_v21, %v10204_v23 }
 0x427   : > { %v8020_v9 = vpop.eup %8019  ;;  %8029 = vrcp.f32 %v4694_v40 }
 0x428   : > { %v4696_v60 = vpop.xlane.xlu1 %4695  ;;  %v4776_v61 = vmul.f32 %v8020_v9, %v10207_v57  ;;  %7252 = vmatprep.mubr.f32.mxu0 %v4775_v29 }
 0x429   : > { %8031 = vrcp.f32 %v4696_v60  ;;  %v8022_v27 = vpop.eup %8021 }
 0x42a   : > { %v4698_v6 = vpop.xlane.xlu0 %4697  ;;  %7253 = vmatmul.mubr.f32.gmra.mrb[126].mxu0 %v4776_v61  ;;  %v4777_v24 = vmul.f32 %v8022_v27, %v10215_v34 }
 0x42b   : > { %v8024_v13 = vpop.eup %8023  ;;  %8033 = vrcp.f32 %v4698_v6 }
 0x42c   : > { %v4700_v47 = vpop.xlane.xlu1 %4699  ;;  %v4778_v11 = vmul.f32 %v8024_v13, %v10217_v53  ;;  %7255 = vmatprep.mubr.f32.mxu0 %v4777_v24 }
 0x42d   : > { %8035 = vrcp.f32 %v4700_v47  ;;  %v8026_v36 = vpop.eup %8025 }
 0x42e   : > { %v4702_v19 = vpop.xlane.xlu0 %4701  ;;  %7256 = vmatmul.mubr.f32.gmra.mrb[128].mxu0 %v4778_v11  ;;  %v4779_v57 = vmul.f32 %v8026_v36, %v11083_v59 }
 0x42f   : > { %v8028_v23 = vpop.eup %8027  ;;  %8037 = vrcp.f32 %v4702_v19 }
 0x430   : > { %v4704_v39 = vpop.xlane.xlu1 %4703  ;;  %v4780_v33 = vmul.f32 %v8028_v23, %v11084_v51  ;;  %7258 = vmatprep.mubr.f32.mxu0 %v4779_v57 }
 0x431   : > { %8039 = vrcp.f32 %v4704_v39  ;;  %v8030_v32 = vpop.eup %8029 }
 0x432   : > { %v4706_v30 = vpop.xlane.xlu0 %4705  ;;  %7259 = vmatmul.mubr.f32.gmra.mrb[130].mxu0 %v4780_v33  ;;  %v4781_v53 = vmul.f32 %v8030_v32, %v10244_v16 }
 0x433   : > { %v8032_v34 = vpop.eup %8031  ;;  %8041 = vrcp.f32 %v4706_v30 }
 0x434   : > { %v4708_v55 = vpop.xlane.xlu1 %4707  ;;  %v4782_v14 = vmul.f32 %v8032_v34, %v10246_v5  ;;  %7261 = vmatprep.mubr.f32.mxu0 %v4781_v53 }
 0x435   : > { %8043 = vrcp.f32 %v4708_v55  ;;  %v8034_v54 = vpop.eup %8033 }
 0x436   : > { %v4710_v10 = vpop.xlane.xlu0 %4709  ;;  %7262 = vmatmul.mubr.f32.gmra.mrb[132].mxu0 %v4782_v14  ;;  %v4783_v16 = vmul.f32 %v8034_v54, %v10261_v35 }
 0x437   : > { %v8036_v43 = vpop.eup %8035  ;;  %8045 = vrcp.f32 %v4710_v10 }
 0x438   : > { %v4712_v5 = vpop.xlane.xlu1 %4711  ;;  %v4784_v17 = vmul.f32 %v8036_v43, %v10264_v25  ;;  %7264 = vmatprep.mubr.f32.mxu0 %v4783_v16  ;;  %v11085_v16 = vld [vmem:[#allocation49_spill] sm:$0xff] }
 0x439   : > { %8047 = vrcp.f32 %v4712_v5  ;;  %v8038_v28 = vpop.eup %8037 }
 0x43a   : > { %v4714_v35 = vpop.xlane.xlu0 %4713  ;;  %7265 = vmatmul.mubr.f32.gmra.mrb[134].mxu0 %v4784_v17  ;;  %v4785_v3 = vmul.f32 %v8038_v28, %v10272_v2  ;;  %v11086_v17 = vld [vmem:[#allocation50_spill] sm:$0xff] }
 0x43b   : > { %v8040_v49 = vpop.eup %8039  ;;  %8049 = vrcp.f32 %v4714_v35 }
 0x43c   : > { %v4716_v25 = vpop.xlane.xlu1 %4715  ;;  %v4786_v18 = vmul.f32 %v8040_v49, %v10274_v26  ;;  %7267 = vmatprep.mubr.f32.mxu0 %v4785_v3 }
 0x43d   : > { %8051 = vrcp.f32 %v4716_v25  ;;  %v8042_v8 = vpop.eup %8041 }
 0x43e   : > { %v4718_v21 = vpop.xlane.xlu0 %4717  ;;  %7268 = vmatmul.mubr.f32.gmra.mrb[136].mxu0 %v4786_v18  ;;  %v4787_v9 = vmul.f32 %v8042_v8, %v10285_v22 }
 0x43f   : > { %v8044_v62 = vpop.eup %8043  ;;  %8053 = vrcp.f32 %v4718_v21 }
 0x440   : > { %v4720_v40 = vpop.xlane.xlu1 %4719  ;;  %v4788_v29 = vmul.f32 %v8044_v62, %v10289_v42  ;;  %7270 = vmatprep.mubr.f32.mxu0 %v4787_v9 }
 0x441   : > { %8055 = vrcp.f32 %v4720_v40  ;;  %v8046_v2 = vpop.eup %8045 }
 0x442   : > { %v4722_v61 = vpop.xlane.xlu0 %4721  ;;  %7271 = vmatmul.mubr.f32.gmra.mrb[138].mxu0 %v4788_v29  ;;  %v4789_v26 = vmul.f32 %v8046_v2, %v10297_v56 }
 0x443   : > { %v8048_v60 = vpop.eup %8047  ;;  %8057 = vrcp.f32 %v4722_v61 }
 0x444   : > { %v4724_v27 = vpop.xlane.xlu1 %4723  ;;  %v4790_v13 = vmul.f32 %v8048_v60, %v10299_v45  ;;  %7273 = vmatprep.mubr.f32.mxu0 %v4789_v26 }
 0x445   : > { %8059 = vrcp.f32 %v4724_v27  ;;  %v8050_v6 = vpop.eup %8049 }
 0x446   : > { %v4726_v24 = vpop.xlane.xlu0 %4725  ;;  %7274 = vmatmul.mubr.f32.gmra.mrb[140].mxu0 %v4790_v13  ;;  %v4791_v42 = vmul.f32 %v8050_v6, %v10306_v1 }
 0x447   : > { %v8052_v22 = vpop.eup %8051  ;;  %8061 = vrcp.f32 %v4726_v24 }
 0x448   : > { %v4728_v47 = vpop.xlane.xlu1 %4727  ;;  %v4792_v11 = vmul.f32 %v8052_v22, %v10309_v20  ;;  %7276 = vmatprep.mubr.f32.mxu0 %v4791_v42 }
 0x449   : > { %8063 = vrcp.f32 %v4728_v47  ;;  %v8054_v36 = vpop.eup %8053 }
 0x44a   : > { %v4730_v23 = vpop.xlane.xlu0 %4729  ;;  %7277 = vmatmul.mubr.f32.gmra.mrb[142].mxu0 %v4792_v11  ;;  %v4793_v45 = vmul.f32 %v8054_v36, %v10315_v41 }
 0x44b   : > { %v8056_v56 = vpop.eup %8055  ;;  %8065 = vrcp.f32 %v4730_v23 }
 0x44c   : > { %v4732_v19 = vpop.xlane.xlu1 %4731  ;;  %v4794_v59 = vmul.f32 %v8056_v56, %v10317_v50  ;;  %7279 = vmatprep.mubr.f32.mxu0 %v4793_v45 }
 0x44d   : > { %8067 = vrcp.f32 %v4732_v19  ;;  %v8058_v57 = vpop.eup %8057 }
 0x44e   : > { %v4734_v39 = vpop.xlane.xlu0 %4733  ;;  %7280 = vmatmul.mubr.f32.gmra.mrb[144].mxu0 %v4794_v59  ;;  %v4795_v20 = vmul.f32 %v8058_v57, %v10323_v7 }
 0x44f   : > { %v8060_v1 = vpop.eup %8059  ;;  %8069 = vrcp.f32 %v4734_v39 }
 0x450   : > { %v4736_v51 = vpop.xlane.xlu1 %4735  ;;  %v4796_v33 = vmul.f32 %v8060_v1, %v10327_v0  ;;  %7282 = vmatprep.mubr.f32.mxu0 %v4795_v20 }
 0x451   : > { %8071 = vrcp.f32 %v4736_v51  ;;  %v8062_v32 = vpop.eup %8061 }
 0x452   : > { %v4738_v34 = vpop.xlane.xlu0 %4737  ;;  %7283 = vmatmul.mubr.f32.gmra.mrb[146].mxu0 %v4796_v33  ;;  %v4797_v50 = vmul.f32 %v8062_v32, %v10331_v46  ;;  %v11089_v33 = vld [vmem:[#allocation8_spill] sm:$0xff] }
 0x453   : > { %v8064_v41 = vpop.eup %8063  ;;  %8073 = vrcp.f32 %v4738_v34 }
 0x454   : > { %v4740_v30 = vpop.xlane.xlu1 %4739  ;;  %v4798_v53 = vmul.f32 %v8064_v41, %v10333_v58  ;;  %7285 = vmatprep.mubr.f32.mxu0 %v4797_v50 }
 0x455   : > { %8075 = vrcp.f32 %v4740_v30  ;;  %v8066_v55 = vpop.eup %8065 }
 0x456   : > { %7286 = vmatmul.mubr.f32.gmra.mrb[148].mxu0 %v4798_v53  ;;  %v4799_v14 = vmul.f32 %v8066_v55, %v10338_v15 }
 0x457   : > { %v8068_v7 = vpop.eup %8067 }
 0x458   : > { %v4800_v0 = vmul.f32 %v8068_v7, %v10341_v48  ;;  %7288 = vmatprep.mubr.f32.mxu0 %v4799_v14 }
 0x459   : > { %v8070_v52 = vpop.eup %8069  ;;  %v6931_v31 = vpop.f32.mrb[60].mxu0 }
 0x45a   : > { %v2835_v54 = vpop.f32.mrb[61].mxu0  ;;  %7289 = vmatmul.mubr.f32.gmra.mrb[150].mxu0 %v4800_v0  ;;  %v4801_v46 = vmul.f32 %v8070_v52, %v10345_v12  ;;  %v11087_v12 = vld [vmem:[#allocation6_spill] sm:$0xff] }
 0x45b   : > { %v8072_v38 = vpop.eup %8071  ;;  %v2995_v3 = vmul.f32 %v6931_v31, %v11087_v12  ;;  %v2994_v8 = vmul.f32 %v11087_v12, %v2835_v54 }
 0x45c   : > { %v4802_v43 = vmul.f32 %v8072_v38, %v10347_v37  ;;  %7291 = vmatprep.mubr.f32.mxu0 %v4801_v46  ;;  %v11088_v37 = vld [vmem:[#allocation7_spill] sm:$0xff] }
 0x45d   : > { %v8074_v58 = vpop.eup %8073 }
 0x45e   : > { %7292 = vmatmul.mubr.f32.gmra.mrb[152].mxu0 %v4802_v43  ;;  %v4803_v5 = vmul.f32 %v8074_v58, %v11085_v16 }
 0x45f   : > { %v8076_v10 = vpop.eup %8075 }
 0x460   : > { %v4804_v15 = vmul.f32 %v8076_v10, %v11086_v17  ;;  %7294 = vmatprep.mubr.f32.mxu0 %v4803_v5 }
 0x461   : > { %v6934_v48 = vpop.f32.mrb[62].mxu0 }
 0x462   : > { %v2845_v63 = vpop.f32.mrb[63].mxu0  ;;  %7295 = vmatmul.mubr.f32.gmra.mrb[154].mxu0 %v4804_v15  ;;  %v2997_v29 = vmul.f32 %v6934_v48, %v11087_v12 }
 0x463   : > { %v2996_v61 = vmul.f32 %v11087_v12, %v2845_v63 }
 0x469   : > { %v6937_v44 = vpop.f32.mrb[64].mxu0 }
 0x46a   : > { %v2855_v4 = vpop.f32.mrb[65].mxu0  ;;  %v2999_v22 = vmul.f32 %v6937_v44, %v11087_v12  ;;  %v11090_v44 = vld [vmem:[#allocation9_spill] sm:$0xff] }
 0x46b   : > { %v2998_v47 = vmul.f32 %v11087_v12, %v2855_v4 }
 0x471   : > { %v6940_v28 = vpop.f32.mrb[66].mxu0 }
 0x472   : > { %v2865_v49 = vpop.f32.mrb[67].mxu0  ;;  %v3001_v45 = vmul.f32 %v6940_v28, %v11087_v12 }
 0x473   : > { %v3000_v57 = vmul.f32 %v11087_v12, %v2865_v49 }
 0x479   : > { %v6943_v35 = vpop.f32.mrb[68].mxu0 }
 0x47a   : > { %v3003_v25 = vmul.f32 %v6943_v35, %v11088_v37  ;;  %v2875_v18 = vpop.f32.mrb[69].mxu0 }
 0x47b   : > { %v3002_v62 = vmul.f32 %v11088_v37, %v2875_v18 }
 0x47c   : > { %v3027_v21 = vadd.f32 %v3003_v25, %v2995_v3 }
 0x47d   : > { %v3026_v9 = vadd.f32 %v3002_v62, %v2994_v8 }
 0x481   : > { %v6946_v40 = vpop.f32.mrb[70].mxu0 }
 0x482   : > { %v3005_v2 = vmul.f32 %v6946_v40, %v11088_v37  ;;  %v2885_v60 = vpop.f32.mrb[71].mxu0 }
 0x483   : > { %v3004_v26 = vmul.f32 %v11088_v37, %v2885_v60 }
 0x484   : > { %v3029_v27 = vadd.f32 %v3005_v2, %v2997_v29 }
 0x485   : > { %v3028_v13 = vadd.f32 %v3004_v26, %v2996_v61 }
 0x489   : > { %v6949_v6 = vpop.f32.mrb[72].mxu0 }
 0x48a   : > { %v3007_v24 = vmul.f32 %v6949_v6, %v11088_v37  ;;  %v2895_v42 = vpop.f32.mrb[73].mxu0 }
 0x48b   : > { %v3006_v11 = vmul.f32 %v11088_v37, %v2895_v42 }
 0x48c   : > { %v3031_v36 = vadd.f32 %v3007_v24, %v2999_v22 }
 0x48d   : > { %v3030_v56 = vadd.f32 %v3006_v11, %v2998_v47 }
 0x491   : > { %v6952_v23 = vpop.f32.mrb[74].mxu0 }
 0x492   : > { %v3009_v19 = vmul.f32 %v6952_v23, %v11088_v37  ;;  %v2905_v59 = vpop.f32.mrb[75].mxu0 }
 0x493   : > { %v3008_v1 = vmul.f32 %v11088_v37, %v2905_v59 }
 0x494   : > { %v3033_v39 = vadd.f32 %v3009_v19, %v3001_v45 }
 0x495   : > { %v3032_v20 = vadd.f32 %v3008_v1, %v3000_v57 }
 0x499   : > { %v6955_v51 = vpop.f32.mrb[76].mxu0 }
 0x49a   : > { %v3011_v32 = vmul.f32 %v6955_v51, %v11089_v33  ;;  %v2915_v41 = vpop.f32.mrb[77].mxu0 }
 0x49b   : > { %v3010_v34 = vmul.f32 %v11089_v33, %v2915_v41 }
 0x49c   : > { %v3035_v50 = vadd.f32 %v3027_v21, %v3011_v32 }
 0x49d   : > { %v3034_v30 = vadd.f32 %v3026_v9, %v3010_v34  ;;  %v6958_v53 = vpop.f32.mrb[78].mxu0 }
 0x49e   : > { %v3013_v55 = vmul.f32 %v6958_v53, %v11089_v33  ;;  %v2925_v7 = vpop.f32.mrb[79].mxu0 }
 0x49f   : > { %v3012_v14 = vmul.f32 %v11089_v33, %v2925_v7 }
 0x4a0   : > { %v3037_v0 = vadd.f32 %v3029_v27, %v3013_v55 }
 0x4a1   : > { %v3036_v52 = vadd.f32 %v3028_v13, %v3012_v14  ;;  %v6961_v31 = vpop.f32.mrb[80].mxu0 }
 0x4a2   : > { %v3015_v38 = vmul.f32 %v6961_v31, %v11089_v33  ;;  %v2935_v54 = vpop.f32.mrb[81].mxu0 }
 0x4a3   : > { %v3014_v46 = vmul.f32 %v11089_v33, %v2935_v54 }
 0x4a4   : > { %v3039_v43 = vadd.f32 %v3031_v36, %v3015_v38 }
 0x4a5   : > { %v3038_v58 = vadd.f32 %v3030_v56, %v3014_v46  ;;  %v6964_v10 = vpop.f32.mrb[82].mxu0 }
 0x4a6   : > { %v3017_v16 = vmul.f32 %v6964_v10, %v11089_v33  ;;  %v2945_v5 = vpop.f32.mrb[83].mxu0 }
 0x4a7   : > { %v3016_v17 = vmul.f32 %v11089_v33, %v2945_v5 }
 0x4a8   : > { %v3041_v15 = vadd.f32 %v3033_v39, %v3017_v16 }
 0x4a9   : > { %v3040_v48 = vadd.f32 %v3032_v20, %v3016_v17  ;;  %v6967_v63 = vpop.f32.mrb[84].mxu0 }
 0x4aa   : > { %v3019_v4 = vmul.f32 %v6967_v63, %v11090_v44  ;;  %v2955_v28 = vpop.f32.mrb[85].mxu0 }
 0x4ab   : > { %v3018_v49 = vmul.f32 %v11090_v44, %v2955_v28 }
 0x4ac   : > { %v3043_v35 = vadd.f32 %v3035_v50, %v3019_v4 }
 0x4ad   : > { %v3042_v3 = vadd.f32 %v3034_v30, %v3018_v49  ;;  %v6970_v25 = vpop.f32.mrb[86].mxu0 }
 0x4ae   : > { %3051 = vst.msk [vmem:[#allocation5 + $0x8] sm:$0xff] %vm387_vm0, %v3043_v35  ;;  %v3021_v18 = vmul.f32 %v6970_v25, %v11090_v44  ;;  %v2965_v8 = vpop.f32.mrb[87].mxu0 }
 0x4af   : > { %3050 = vst.msk [vmem:[#allocation5] sm:$0xff] %vm387_vm0, %v3042_v3  ;;  %v3020_v62 = vmul.f32 %v11090_v44, %v2965_v8 }
 0x4b0   : > { %v3045_v21 = vadd.f32 %v3037_v0, %v3021_v18 }
 0x4b1   : > { %v3044_v9 = vadd.f32 %v3036_v52, %v3020_v62  ;;  %v6973_v40 = vpop.f32.mrb[88].mxu0 }
 0x4b2   : > { %3053 = vst.msk [vmem:[#allocation5 + $0x38] sm:$0xff] %vm387_vm0, %v3045_v21  ;;  %v3023_v29 = vmul.f32 %v6973_v40, %v11090_v44  ;;  %v2975_v2 = vpop.f32.mrb[89].mxu0  ;;  %v351_v40 = vld [vmem:[%s10755_s3 + $0x78] sm:$0xff] }
 0x4b3   : > { %3052 = vst.msk [vmem:[#allocation5 + $0x30] sm:$0xff] %vm387_vm0, %v3044_v9  ;;  %v3022_v60 = vmul.f32 %v11090_v44, %v2975_v2  ;;  %v350_v9 = vld [vmem:[%s10755_s3 + $0x70] sm:$0xff] }
 0x4b4   : > { %v3047_v61 = vadd.f32 %v3039_v43, %v3023_v29 }
 0x4b5   : > { %v3046_v26 = vadd.f32 %v3038_v58, %v3022_v60  ;;  %v6976_v27 = vpop.f32.mrb[90].mxu0  ;;  %v5095_v42 = vld [vmem:[#allocation5 + $0x8] sm:$0xff]  ;;  %v7653_v60 = vpack.c.bf16 %v351_v40, %v350_v9 }
 0x4b6   : > { %3055 = vst.msk [vmem:[#allocation5 + $0x68] sm:$0xff] %vm387_vm0, %v3047_v61  ;;  %v3025_v13 = vmul.f32 %v6976_v27, %v11090_v44  ;;  %v2985_v6 = vpop.f32.mrb[91].mxu0  ;;  %v5094_v22 = vld [vmem:[#allocation5] sm:$0xff] }
 0x4b7   : > { %3054 = vst.msk [vmem:[#allocation5 + $0x60] sm:$0xff] %vm387_vm0, %v3046_v26  ;;  %v3024_v24 = vmul.f32 %v11090_v44, %v2985_v6  ;;  %7305 = vmatprep.mubr.msk.f32.mxu1 %vm387_vm0, %v5094_v22  ;;  %7654 = vmatprep.subr.bf16.mxu0 %v7653_v60 }
 0x4b8   : > { %v3049_v47 = vadd.f32 %v3041_v15, %v3025_v13  ;;  %7306 = vmatmul.mubr.msk.f32.vlgmr.msra.gmra.mrb[156].mxu1 %vm387_vm0, %v5095_v42  ;;  %7656 = vmatpush3.bf16.msra.mxu0 %v7653_v60 }
 0x4b9   : > { %v3048_v11 = vadd.f32 %v3040_v48, %v3024_v24  ;;  %v7091_v36 = vpop.f32.mrb[92].mxu0 }
 0x4ba   : > { %3057 = vst.msk [vmem:[#allocation5 + $0x98] sm:$0xff] %vm387_vm0, %v3049_v47  ;;  %v3853_v56 = vpop.f32.mrb[93].mxu0  ;;  %v4013_v20 = vmul.f32 %v7091_v36, %v11087_v12 }
 0x4bb   : > { %3056 = vst.msk [vmem:[#allocation5 + $0x90] sm:$0xff] %vm387_vm0, %v3048_v11  ;;  %v4012_v41 = vmul.f32 %v11087_v12, %v3853_v56 }
 0x4bd   : > { %v7094_v23 = vpop.f32.mrb[94].mxu0 }
 0x4be   : > { %v3863_v45 = vpop.f32.mrb[95].mxu0  ;;  %v4015_v55 = vmul.f32 %v7094_v23, %v11087_v12 }
 0x4bf   : > { %v4014_v0 = vmul.f32 %v11087_v12, %v3863_v45 }
 0x4c1   : > { %v7097_v19 = vpop.f32.mrb[96].mxu0 }
 0x4c2   : > { %v3873_v59 = vpop.f32.mrb[97].mxu0  ;;  %v4017_v46 = vmul.f32 %v7097_v19, %v11087_v12 }
 0x4c3   : > { %v4016_v10 = vmul.f32 %v11087_v12, %v3873_v59 }
 0x4c5   : > { %v7100_v57 = vpop.f32.mrb[98].mxu0 }
 0x4c6   : > { %v3883_v1 = vpop.f32.mrb[99].mxu0  ;;  %v4019_v48 = vmul.f32 %v7100_v57, %v11087_v12 }
 0x4c7   : > { %v4018_v28 = vmul.f32 %v11087_v12, %v3883_v1 }
 0x4c9   : > { %v7103_v39 = vpop.f32.mrb[100].mxu0 }
 0x4ca   : > { %v4021_v51 = vmul.f32 %v7103_v39, %v11088_v37  ;;  %v3893_v32 = vpop.f32.mrb[101].mxu0 }
 0x4cb   : > { %v4020_v34 = vmul.f32 %v11088_v37, %v3893_v32 }
 0x4cc   : > { %v4045_v50 = vadd.f32 %v4021_v51, %v4013_v20 }
 0x4cd   : > { %v4044_v30 = vadd.f32 %v4020_v34, %v4012_v41  ;;  %v7106_v53 = vpop.f32.mrb[102].mxu0 }
 0x4ce   : > { %v4023_v7 = vmul.f32 %v7106_v53, %v11088_v37  ;;  %v3903_v14 = vpop.f32.mrb[103].mxu0 }
 0x4cf   : > { %v4022_v52 = vmul.f32 %v11088_v37, %v3903_v14 }
 0x4d0   : > { %v4047_v31 = vadd.f32 %v4023_v7, %v4015_v55 }
 0x4d1   : > { %v4046_v38 = vadd.f32 %v4022_v52, %v4014_v0  ;;  %v7109_v54 = vpop.f32.mrb[104].mxu0 }
 0x4d2   : > { %v4025_v43 = vmul.f32 %v7109_v54, %v11088_v37  ;;  %v3913_v58 = vpop.f32.mrb[105].mxu0 }
 0x4d3   : > { %v4024_v16 = vmul.f32 %v11088_v37, %v3913_v58 }
 0x4d4   : > { %v4049_v5 = vadd.f32 %v4025_v43, %v4017_v46 }
 0x4d5   : > { %v4048_v17 = vadd.f32 %v4024_v16, %v4016_v10  ;;  %v7112_v15 = vpop.f32.mrb[106].mxu0 }
 0x4d6   : > { %v4027_v63 = vmul.f32 %v7112_v15, %v11088_v37  ;;  %v3923_v4 = vpop.f32.mrb[107].mxu0 }
 0x4d7   : > { %v4026_v49 = vmul.f32 %v11088_v37, %v3923_v4 }
 0x4d8   : > { %v4051_v35 = vadd.f32 %v4027_v63, %v4019_v48 }
 0x4d9   : > { %v4050_v3 = vadd.f32 %v4026_v49, %v4018_v28  ;;  %v7115_v25 = vpop.f32.mrb[108].mxu0 }
 0x4da   : > { %v4029_v18 = vmul.f32 %v7115_v25, %v11089_v33  ;;  %v3933_v8 = vpop.f32.mrb[109].mxu0 }
 0x4db   : > { %v4028_v62 = vmul.f32 %v11089_v33, %v3933_v8 }
 0x4dc   : > { %v4053_v21 = vadd.f32 %v4045_v50, %v4029_v18 }
 0x4dd   : > { %v4052_v29 = vadd.f32 %v4044_v30, %v4028_v62  ;;  %v7118_v2 = vpop.f32.mrb[110].mxu0 }
 0x4de   : > { %v4031_v61 = vmul.f32 %v7118_v2, %v11089_v33  ;;  %v3943_v26 = vpop.f32.mrb[111].mxu0 }
 0x4df   : > { %v4030_v27 = vmul.f32 %v11089_v33, %v3943_v26 }
 0x4e0   : > { %v4055_v13 = vadd.f32 %v4047_v31, %v4031_v61 }
 0x4e1   : > { %v4054_v6 = vadd.f32 %v4046_v38, %v4030_v27  ;;  %v7121_v22 = vpop.f32.mrb[112].mxu0 }
 0x4e2   : > { %v4033_v24 = vmul.f32 %v7121_v22, %v11089_v33  ;;  %v3953_v42 = vpop.f32.mrb[113].mxu0  ;;  %v352_v22 = vld [vmem:[%s10755_s3 + $0x80] sm:$0xff] }
 0x4e3   : > { %v4032_v47 = vmul.f32 %v11089_v33, %v3953_v42 }
 0x4e4   : > { %v4057_v11 = vadd.f32 %v4049_v5, %v4033_v24  ;;  %v353_v24 = vld [vmem:[%s10755_s3 + $0x88] sm:$0xff] }
 0x4e5   : > { %v4056_v36 = vadd.f32 %v4048_v17, %v4032_v47  ;;  %v7124_v56 = vpop.f32.mrb[114].mxu0  ;;  %v7657_v47 = vpack.c.bf16 %v353_v24, %v352_v22 }
 0x4e6   : > { %v4035_v23 = vmul.f32 %v7124_v56, %v11089_v33  ;;  %v3963_v45 = vpop.f32.mrb[115].mxu0 }
 0x4e7   : > { %v4034_v19 = vmul.f32 %v11089_v33, %v3963_v45  ;;  %7658 = vmatprep.subr.bf16.mxu0 %v7657_v47 }
 0x4e8   : > { %v4059_v59 = vadd.f32 %v4051_v35, %v4035_v23  ;;  %7660 = vmatpush3.bf16.msra.mxu0 %v7657_v47 }
 0x4e9   : > { %v4058_v57 = vadd.f32 %v4050_v3, %v4034_v19  ;;  %v7127_v1 = vpop.f32.mrb[116].mxu0 }
 0x4ea   : > { %v4037_v39 = vmul.f32 %v7127_v1, %v11090_v44  ;;  %v3973_v20 = vpop.f32.mrb[117].mxu0 }
 0x4eb   : > { %v4036_v51 = vmul.f32 %v11090_v44, %v3973_v20 }
 0x4ec   : > { %v4061_v32 = vadd.f32 %v4053_v21, %v4037_v39 }
 0x4ed   : > { %v4060_v41 = vadd.f32 %v4052_v29, %v4036_v51  ;;  %v7130_v34 = vpop.f32.mrb[118].mxu0 }
 0x4ee   : > { %4069 = vst.msk [vmem:[#allocation5 + $0x18] sm:$0xff] %vm387_vm0, %v4061_v32  ;;  %v4039_v50 = vmul.f32 %v7130_v34, %v11090_v44  ;;  %v3983_v30 = vpop.f32.mrb[119].mxu0 }
 0x4ef   : > { %4068 = vst.msk [vmem:[#allocation5 + $0x10] sm:$0xff] %vm387_vm0, %v4060_v41  ;;  %v4038_v53 = vmul.f32 %v11090_v44, %v3983_v30 }
 0x4f0   : > { %v4063_v55 = vadd.f32 %v4055_v13, %v4039_v50 }
 0x4f1   : > { %v4062_v7 = vadd.f32 %v4054_v6, %v4038_v53  ;;  %v7133_v14 = vpop.f32.mrb[120].mxu0 }
 0x4f2   : > { %4071 = vst.msk [vmem:[#allocation5 + $0x48] sm:$0xff] %vm387_vm0, %v4063_v55  ;;  %v4041_v0 = vmul.f32 %v7133_v14, %v11090_v44  ;;  %v3993_v52 = vpop.f32.mrb[121].mxu0 }
 0x4f3   : > { %4070 = vst.msk [vmem:[#allocation5 + $0x40] sm:$0xff] %vm387_vm0, %v4062_v7  ;;  %v4040_v31 = vmul.f32 %v11090_v44, %v3993_v52 }
 0x4f4   : > { %v4065_v38 = vadd.f32 %v4057_v11, %v4041_v0 }
 0x4f5   : > { %v4064_v54 = vadd.f32 %v4056_v36, %v4040_v31  ;;  %v7136_v46 = vpop.f32.mrb[122].mxu0  ;;  %v5097_v5 = vld [vmem:[#allocation5 + $0x18] sm:$0xff] }
 0x4f6   : > { %4073 = vst.msk [vmem:[#allocation5 + $0x78] sm:$0xff] %vm387_vm0, %v4065_v38  ;;  %v4043_v43 = vmul.f32 %v7136_v46, %v11090_v44  ;;  %v4003_v58 = vpop.f32.mrb[123].mxu0  ;;  %v5096_v10 = vld [vmem:[#allocation5 + $0x10] sm:$0xff] }
 0x4f7   : > { %4072 = vst.msk [vmem:[#allocation5 + $0x70] sm:$0xff] %vm387_vm0, %v4064_v54  ;;  %v4042_v16 = vmul.f32 %v11090_v44, %v4003_v58  ;;  %7308 = vmatprep.mubr.msk.f32.mxu1 %vm387_vm0, %v5096_v10 }
 0x4f8   : > { %v4067_v17 = vadd.f32 %v4059_v59, %v4043_v43  ;;  %7309 = vmatmul.mubr.msk.f32.gmra.mrb[158].mxu1 %vm387_vm0, %v5097_v5 }
 0x4f9   : > { %v4066_v15 = vadd.f32 %v4058_v57, %v4042_v16  ;;  %v7251_v48 = vpop.f32.mrb[124].mxu0 }
 0x4fa   : > { %4075 = vst.msk [vmem:[#allocation5 + $0xa8] sm:$0xff] %vm387_vm0, %v4067_v17  ;;  %v4871_v63 = vpop.f32.mrb[125].mxu0  ;;  %v5031_v8 = vmul.f32 %v7251_v48, %v11087_v12 }
 0x4fb   : > { %4074 = vst.msk [vmem:[#allocation5 + $0xa0] sm:$0xff] %vm387_vm0, %v4066_v15  ;;  %v5030_v9 = vmul.f32 %v11087_v12, %v4871_v63 }
 0x4fd   : > { %v7254_v4 = vpop.f32.mrb[126].mxu0 }
 0x4fe   : > { %v4881_v28 = vpop.f32.mrb[127].mxu0  ;;  %v5033_v61 = vmul.f32 %v7254_v4, %v11087_v12 }
 0x4ff   : > { %v5032_v13 = vmul.f32 %v11087_v12, %v4881_v28 }
 0x501   : > { %v7257_v49 = vpop.f32.mrb[128].mxu0 }
 0x502   : > { %v4891_v35 = vpop.f32.mrb[129].mxu0  ;;  %v5035_v56 = vmul.f32 %v7257_v49, %v11087_v12 }
 0x503   : > { %v5034_v19 = vmul.f32 %v11087_v12, %v4891_v35 }
 0x505   : > { %v7260_v3 = vpop.f32.mrb[130].mxu0 }
 0x506   : > { %v4901_v25 = vpop.f32.mrb[131].mxu0  ;;  %v5037_v20 = vmul.f32 %v7260_v3, %v11087_v12 }
 0x507   : > { %v5036_v41 = vmul.f32 %v11087_v12, %v4901_v25 }
 0x509   : > { %v7263_v18 = vpop.f32.mrb[132].mxu0 }
 0x50a   : > { %v5039_v62 = vmul.f32 %v7263_v18, %v11088_v37  ;;  %v4911_v21 = vpop.f32.mrb[133].mxu0 }
 0x50b   : > { %v5038_v40 = vmul.f32 %v11088_v37, %v4911_v21 }
 0x50c   : > { %v5063_v29 = vadd.f32 %v5039_v62, %v5031_v8 }
 0x50d   : > { %v5062_v2 = vadd.f32 %v5038_v40, %v5030_v9  ;;  %v7266_v60 = vpop.f32.mrb[134].mxu0 }
 0x50e   : > { %v5041_v26 = vmul.f32 %v7266_v60, %v11088_v37  ;;  %v4921_v27 = vpop.f32.mrb[135].mxu0 }
 0x50f   : > { %v5040_v6 = vmul.f32 %v11088_v37, %v4921_v27 }
 0x510   : > { %v5065_v42 = vadd.f32 %v5041_v26, %v5033_v61 }
 0x511   : > { %v5064_v11 = vadd.f32 %v5040_v6, %v5032_v13  ;;  %v7269_v36 = vpop.f32.mrb[136].mxu0 }
 0x512   : > { %v5043_v23 = vmul.f32 %v7269_v36, %v11088_v37  ;;  %v4931_v45 = vpop.f32.mrb[137].mxu0 }
 0x513   : > { %v5042_v59 = vmul.f32 %v11088_v37, %v4931_v45 }
 0x514   : > { %v5067_v57 = vadd.f32 %v5043_v23, %v5035_v56  ;;  %v5100_v23 = vld [vmem:[#allocation5 + $0x30] sm:$0xff] }
 0x515   : > { %v5066_v1 = vadd.f32 %v5042_v59, %v5034_v19  ;;  %v7272_v39 = vpop.f32.mrb[138].mxu0  ;;  %v5101_v19 = vld [vmem:[#allocation5 + $0x38] sm:$0xff]  ;;  %v5102_v59 = vld [vmem:[#allocation5 + $0x40] sm:$0xff] }
 0x516   : > { %v5045_v51 = vmul.f32 %v7272_v39, %v11088_v37  ;;  %v4941_v32 = vpop.f32.mrb[139].mxu0  ;;  %v5106_v39 = vld [vmem:[#allocation5 + $0x60] sm:$0xff] }
 0x517   : > { %v5044_v34 = vmul.f32 %v11088_v37, %v4941_v32  ;;  %v5109_v32 = vld [vmem:[#allocation5 + $0x78] sm:$0xff] }
 0x518   : > { %v5069_v50 = vadd.f32 %v5045_v51, %v5037_v20  ;;  %v5107_v20 = vld [vmem:[#allocation5 + $0x68] sm:$0xff]  ;;  %v5108_v51 = vld [vmem:[#allocation5 + $0x70] sm:$0xff] }
 0x519   : > { %v5068_v30 = vadd.f32 %v5044_v34, %v5036_v41  ;;  %v7275_v53 = vpop.f32.mrb[140].mxu0 }
 0x51a   : > { %v5047_v55 = vmul.f32 %v7275_v53, %v11089_v33  ;;  %v4951_v7 = vpop.f32.mrb[141].mxu0  ;;  %v5114_v53 = vld [vmem:[#allocation5 + $0xa0] sm:$0xff] }
 0x51b   : > { %v5046_v14 = vmul.f32 %v11089_v33, %v4951_v7 }
 0x51c   : > { %v5071_v0 = vadd.f32 %v5063_v29, %v5047_v55  ;;  %v5115_v55 = vld [vmem:[#allocation5 + $0xa8] sm:$0xff] }
 0x51d   : > { %v5070_v52 = vadd.f32 %v5062_v2, %v5046_v14  ;;  %v7278_v31 = vpop.f32.mrb[142].mxu0 }
 0x51e   : > { %v5049_v38 = vmul.f32 %v7278_v31, %v11089_v33  ;;  %v4961_v54 = vpop.f32.mrb[143].mxu0 }
 0x51f   : > { %v5048_v46 = vmul.f32 %v11089_v33, %v4961_v54 }
 0x520   : > { %v5073_v43 = vadd.f32 %v5065_v42, %v5049_v38 }
 0x521   : > { %v5072_v12 = vadd.f32 %v5064_v11, %v5048_v46  ;;  %v7281_v58 = vpop.f32.mrb[144].mxu0 }
 0x522   : > { %v5051_v37 = vmul.f32 %v7281_v58, %v11089_v33  ;;  %v4971_v10 = vpop.f32.mrb[145].mxu0 }
 0x523   : > { %v5050_v16 = vmul.f32 %v11089_v33, %v4971_v10 }
 0x524   : > { %v5075_v5 = vadd.f32 %v5067_v57, %v5051_v37 }
 0x525   : > { %v5074_v17 = vadd.f32 %v5066_v1, %v5050_v16  ;;  %v7284_v15 = vpop.f32.mrb[146].mxu0 }
 0x526   : > { %v5053_v48 = vmul.f32 %v7284_v15, %v11089_v33  ;;  %v4981_v63 = vpop.f32.mrb[147].mxu0 }
 0x527   : > { %v5052_v4 = vmul.f32 %v11089_v33, %v4981_v63 }
 0x528   : > { %v5077_v28 = vadd.f32 %v5069_v50, %v5053_v48  ;;  %v5112_v50 = vld [vmem:[#allocation5 + $0x90] sm:$0xff] }
 0x529   : > { %v5076_v49 = vadd.f32 %v5068_v30, %v5052_v4  ;;  %v7287_v35 = vpop.f32.mrb[148].mxu0  ;;  %v5113_v30 = vld [vmem:[#allocation5 + $0x98] sm:$0xff] }
 0x52a   : > { %v5055_v3 = vmul.f32 %v7287_v35, %v11090_v44  ;;  %v4991_v25 = vpop.f32.mrb[149].mxu0 }
 0x52b   : > { %v5054_v18 = vmul.f32 %v11090_v44, %v4991_v25 }
 0x52c   : > { %v5079_v8 = vadd.f32 %v5071_v0, %v5055_v3  ;;  %v10609_v0 = vld [vmem:[%s10756_s4 + $0x3] ss:$0 sm:$0xff] }
 0x52d   : > { %v5078_v62 = vadd.f32 %v5070_v52, %v5054_v18  ;;  %v7290_v21 = vpop.f32.mrb[150].mxu0 }
 0x52e   : > { %5087 = vst.msk [vmem:[#allocation5 + $0x28] sm:$0xff] %vm387_vm0, %v5079_v8  ;;  %v5057_v9 = vmul.f32 %v7290_v21, %v11090_v44  ;;  %v5001_v40 = vpop.f32.mrb[151].mxu0 }
 0x52f   : > { %5086 = vst.msk [vmem:[#allocation5 + $0x20] sm:$0xff] %vm387_vm0, %v5078_v62  ;;  %v5056_v33 = vmul.f32 %v11090_v44, %v5001_v40 }
 0x530   : > { %v5081_v29 = vadd.f32 %v5073_v43, %v5057_v9 }
 0x531   : > { %v5080_v2 = vadd.f32 %v5072_v12, %v5056_v33  ;;  %v7293_v60 = vpop.f32.mrb[152].mxu0 }
 0x532   : > { %5089 = vst.msk [vmem:[#allocation5 + $0x58] sm:$0xff] %vm387_vm0, %v5081_v29  ;;  %v5059_v61 = vmul.f32 %v7293_v60, %v11090_v44  ;;  %v5011_v26 = vpop.f32.mrb[153].mxu0 }
 0x533   : > { %5088 = vst.msk [vmem:[#allocation5 + $0x50] sm:$0xff] %vm387_vm0, %v5080_v2  ;;  %v5058_v27 = vmul.f32 %v11090_v44, %v5011_v26 }
 0x534   : > { %v5083_v13 = vadd.f32 %v5075_v5, %v5059_v61 }
 0x535   : > { %v5082_v6 = vadd.f32 %v5074_v17, %v5058_v27  ;;  %v7296_v22 = vpop.f32.mrb[154].mxu0  ;;  %v5099_v36 = vld [vmem:[#allocation5 + $0x28] sm:$0xff] }
 0x536   : > { %5091 = vst.msk [vmem:[#allocation5 + $0x88] sm:$0xff] %vm387_vm0, %v5083_v13  ;;  %v5061_v24 = vmul.f32 %v7296_v22, %v11090_v44  ;;  %v5021_v42 = vpop.f32.mrb[155].mxu0  ;;  %v5098_v47 = vld [vmem:[#allocation5 + $0x20] sm:$0xff] }
 0x537   : > { %5090 = vst.msk [vmem:[#allocation5 + $0x80] sm:$0xff] %vm387_vm0, %v5082_v6  ;;  %v5060_v11 = vmul.f32 %v11090_v44, %v5021_v42  ;;  %7311 = vmatprep.mubr.msk.f32.mxu1 %vm387_vm0, %v5098_v47  ;;  %v5103_v44 = vld [vmem:[#allocation5 + $0x48] sm:$0xff] }
 0x538   : > { %v5085_v56 = vadd.f32 %v5077_v28, %v5061_v24  ;;  %7312 = vmatmul.mubr.msk.f32.gmra.mrb[160].mxu1 %vm387_vm0, %v5099_v36 }
 0x539   : > { %v5084_v45 = vadd.f32 %v5076_v49, %v5060_v11  ;;  %7314 = vmatprep.mubr.msk.f32.mxu1 %vm387_vm0, %v5100_v23  ;;  %v5105_v1 = vld [vmem:[#allocation5 + $0x58] sm:$0xff] }
 0x53a   : > { %5093 = vst.msk [vmem:[#allocation5 + $0xb8] sm:$0xff] %vm387_vm0, %v5085_v56  ;;  %v5104_v57 = vld [vmem:[#allocation5 + $0x50] sm:$0xff] }
 0x53b   : > { %5092 = vst.msk [vmem:[#allocation5 + $0xb0] sm:$0xff] %vm387_vm0, %v5084_v45 }
 0x53c   : > { %7315 = vmatmul.mubr.msk.f32.gmra.mrb[162].mxu1 %vm387_vm0, %v5101_v19 }
 0x53d   : > { %7317 = vmatprep.mubr.msk.f32.mxu1 %vm387_vm0, %v5102_v59  ;;  %v5111_v34 = vld [vmem:[#allocation5 + $0x88] sm:$0xff] }
 0x53e   : > { %v5110_v41 = vld [vmem:[#allocation5 + $0x80] sm:$0xff] }
 0x540   : > { %7318 = vmatmul.mubr.msk.f32.gmra.mrb[164].mxu1 %vm387_vm0, %v5103_v44 }
 0x541   : > { %7320 = vmatprep.mubr.msk.f32.mxu1 %vm387_vm0, %v5104_v57  ;;  %v5117_v14 = vld [vmem:[#allocation5 + $0xb8] sm:$0xff] }
 0x542   : > { %v5116_v7 = vld [vmem:[#allocation5 + $0xb0] sm:$0xff] }
 0x544   : > { %7321 = vmatmul.mubr.msk.f32.gmra.mrb[166].mxu1 %vm387_vm0, %v5105_v1 }
 0x545   : > { %7323 = vmatprep.mubr.msk.f32.mxu1 %vm387_vm0, %v5106_v39 }
 0x548   : > { %7324 = vmatmul.mubr.msk.f32.gmra.mrb[168].mxu1 %vm387_vm0, %v5107_v20 }
 0x549   : > { %7326 = vmatprep.mubr.msk.f32.mxu1 %vm387_vm0, %v5108_v51 }
 0x54c   : > { %7327 = vmatmul.mubr.msk.f32.gmra.mrb[170].mxu1 %vm387_vm0, %v5109_v32 }
 0x54d   : > { %7329 = vmatprep.mubr.msk.f32.mxu1 %vm387_vm0, %v5110_v41 }
 0x550   : > { %7330 = vmatmul.mubr.msk.f32.gmra.mrb[172].mxu1 %vm387_vm0, %v5111_v34 }
 0x551   : > { %7332 = vmatprep.mubr.msk.f32.mxu1 %vm387_vm0, %v5112_v50 }
 0x554   : > { %7333 = vmatmul.mubr.msk.f32.gmra.mrb[174].mxu1 %vm387_vm0, %v5113_v30 }
 0x555   : > { %7335 = vmatprep.mubr.msk.f32.mxu1 %vm387_vm0, %v5114_v53 }
 0x558   : > { %7336 = vmatmul.mubr.msk.f32.gmra.mrb[176].mxu1 %vm387_vm0, %v5115_v55 }
 0x559   : > { %7338 = vmatprep.mubr.msk.f32.mxu1 %vm387_vm0, %v5116_v7 }
 0x55c   : > { %7339 = vmatmul.mubr.msk.f32.gmra.mrb[178].mxu1 %vm387_vm0, %v5117_v14 }
 0x58b   : > { %v7307_v52 = vpop.f32.mrb[156].mxu1 }
 0x58c   : > { %v5266_v31 = vadd.f32 %v7307_v52, %v10609_v0  ;;  %v5260_v38 = vpop.f32.mrb[157].mxu1 }
 0x58d   : > { %v5261_v54 = vadd.f32 %v10609_v0, %v5260_v38 }
 0x58e   : > { %v5380_v43 = vmax.f32 %v5266_v31, 0.0 }
 0x58f   : > { %v5379_v46 = vmax.f32 %v5261_v54, 0.0 }
 0x591   : > { %7349 = vmatprep.mubr.msk.f32.mxu0 %vm387_vm0, %v5379_v46 }
 0x592   : > { %7350 = vmatmul.mubr.msk.f32.vlgmr.msra.gmra.mrb[156].mxu0 %vm387_vm0, %v5380_v43 }
 0x5cb   : > { %v7310_v12 = vpop.f32.mrb[158].mxu1 }
 0x5cc   : > { %v5276_v58 = vadd.f32 %v7310_v12, %v10609_v0  ;;  %v5270_v37 = vpop.f32.mrb[159].mxu1 }
 0x5cd   : > { %v5271_v10 = vadd.f32 %v10609_v0, %v5270_v37 }
 0x5ce   : > { %v5382_v5 = vmax.f32 %v5276_v58, 0.0 }
 0x5cf   : > { %v5381_v16 = vmax.f32 %v5271_v10, 0.0  ;;  %v10662_v10 = vld [vmem:[%s10756_s4 + $0x4] ss:$0 sm:$0xff] }
 0x5d1   : > { %7352 = vmatprep.mubr.msk.f32.mxu0 %vm387_vm0, %v5381_v16 }
 0x5d2   : > { %7353 = vmatmul.mubr.msk.f32.gmra.mrb[158].mxu0 %vm387_vm0, %v5382_v5 }
 0x60b   : > { %v7313_v17 = vpop.f32.mrb[160].mxu1 }
 0x60c   : > { %v5286_v15 = vadd.f32 %v7313_v17, %v10609_v0  ;;  %v5280_v48 = vpop.f32.mrb[161].mxu1 }
 0x60d   : > { %v5281_v63 = vadd.f32 %v10609_v0, %v5280_v48 }
 0x60e   : > { %v5384_v49 = vmax.f32 %v5286_v15, 0.0 }
 0x60f   : > { %v5383_v4 = vmax.f32 %v5281_v63, 0.0  ;;  %v7316_v28 = vpop.f32.mrb[162].mxu1 }
 0x610   : > { %v5296_v35 = vadd.f32 %v7316_v28, %v10609_v0  ;;  %v5290_v3 = vpop.f32.mrb[163].mxu1 }
 0x611   : > { %v5291_v25 = vadd.f32 %v10609_v0, %v5290_v3  ;;  %7355 = vmatprep.mubr.msk.f32.mxu0 %vm387_vm0, %v5383_v4 }
 0x612   : > { %7356 = vmatmul.mubr.msk.f32.gmra.mrb[160].mxu0 %vm387_vm0, %v5384_v49  ;;  %v5386_v62 = vmax.f32 %v5296_v35, 0.0 }
 0x613   : > { %v5385_v18 = vmax.f32 %v5291_v25, 0.0  ;;  %v7319_v8 = vpop.f32.mrb[164].mxu1 }
 0x614   : > { %v5306_v21 = vadd.f32 %v7319_v8, %v10609_v0  ;;  %v5300_v9 = vpop.f32.mrb[165].mxu1 }
 0x615   : > { %v5301_v40 = vadd.f32 %v10609_v0, %v5300_v9  ;;  %7358 = vmatprep.mubr.msk.f32.mxu0 %vm387_vm0, %v5385_v18 }
 0x616   : > { %7359 = vmatmul.mubr.msk.f32.gmra.mrb[162].mxu0 %vm387_vm0, %v5386_v62  ;;  %v5388_v2 = vmax.f32 %v5306_v21, 0.0 }
 0x617   : > { %v5387_v33 = vmax.f32 %v5301_v40, 0.0  ;;  %v7322_v29 = vpop.f32.mrb[166].mxu1 }
 0x618   : > { %v5316_v60 = vadd.f32 %v7322_v29, %v10609_v0  ;;  %v5310_v61 = vpop.f32.mrb[167].mxu1 }
 0x619   : > { %v5311_v26 = vadd.f32 %v10609_v0, %v5310_v61  ;;  %7361 = vmatprep.mubr.msk.f32.mxu0 %vm387_vm0, %v5387_v33 }
 0x61a   : > { %7362 = vmatmul.mubr.msk.f32.gmra.mrb[164].mxu0 %vm387_vm0, %v5388_v2  ;;  %v5390_v6 = vmax.f32 %v5316_v60, 0.0 }
 0x61b   : > { %v5389_v27 = vmax.f32 %v5311_v26, 0.0  ;;  %v7325_v13 = vpop.f32.mrb[168].mxu1 }
 0x61c   : > { %v5326_v22 = vadd.f32 %v7325_v13, %v10609_v0  ;;  %v5320_v24 = vpop.f32.mrb[169].mxu1 }
 0x61d   : > { %v5321_v42 = vadd.f32 %v10609_v0, %v5320_v24  ;;  %7364 = vmatprep.mubr.msk.f32.mxu0 %vm387_vm0, %v5389_v27 }
 0x61e   : > { %7365 = vmatmul.mubr.msk.f32.gmra.mrb[166].mxu0 %vm387_vm0, %v5390_v6  ;;  %v5392_v36 = vmax.f32 %v5326_v22, 0.0 }
 0x61f   : > { %v5391_v47 = vmax.f32 %v5321_v42, 0.0  ;;  %v7328_v11 = vpop.f32.mrb[170].mxu1 }
 0x620   : > { %v5336_v56 = vadd.f32 %v7328_v11, %v10609_v0  ;;  %v5330_v23 = vpop.f32.mrb[171].mxu1 }
 0x621   : > { %v5331_v45 = vadd.f32 %v10609_v0, %v5330_v23  ;;  %7367 = vmatprep.mubr.msk.f32.mxu0 %vm387_vm0, %v5391_v47 }
 0x622   : > { %7368 = vmatmul.mubr.msk.f32.gmra.mrb[168].mxu0 %vm387_vm0, %v5392_v36  ;;  %v5394_v44 = vmax.f32 %v5336_v56, 0.0 }
 0x623   : > { %v5393_v19 = vmax.f32 %v5331_v45, 0.0  ;;  %v7331_v59 = vpop.f32.mrb[172].mxu1 }
 0x624   : > { %v5346_v57 = vadd.f32 %v7331_v59, %v10609_v0  ;;  %v5340_v1 = vpop.f32.mrb[173].mxu1 }
 0x625   : > { %v5341_v39 = vadd.f32 %v10609_v0, %v5340_v1  ;;  %7370 = vmatprep.mubr.msk.f32.mxu0 %vm387_vm0, %v5393_v19 }
 0x626   : > { %7371 = vmatmul.mubr.msk.f32.gmra.mrb[170].mxu0 %vm387_vm0, %v5394_v44  ;;  %v5396_v32 = vmax.f32 %v5346_v57, 0.0 }
 0x627   : > { %v5395_v20 = vmax.f32 %v5341_v39, 0.0  ;;  %v7334_v51 = vpop.f32.mrb[174].mxu1 }
 0x628   : > { %v5356_v41 = vadd.f32 %v7334_v51, %v10609_v0  ;;  %v5350_v34 = vpop.f32.mrb[175].mxu1 }
 0x629   : > { %v5351_v50 = vadd.f32 %v10609_v0, %v5350_v34  ;;  %7373 = vmatprep.mubr.msk.f32.mxu0 %vm387_vm0, %v5395_v20 }
 0x62a   : > { %7374 = vmatmul.mubr.msk.f32.gmra.mrb[172].mxu0 %vm387_vm0, %v5396_v32  ;;  %v5398_v55 = vmax.f32 %v5356_v41, 0.0 }
 0x62b   : > { %v5397_v30 = vmax.f32 %v5351_v50, 0.0  ;;  %v7337_v53 = vpop.f32.mrb[176].mxu1 }
 0x62c   : > { %v5366_v7 = vadd.f32 %v7337_v53, %v10609_v0  ;;  %v5360_v14 = vpop.f32.mrb[177].mxu1 }
 0x62d   : > { %v5361_v52 = vadd.f32 %v10609_v0, %v5360_v14  ;;  %7376 = vmatprep.mubr.msk.f32.mxu0 %vm387_vm0, %v5397_v30 }
 0x62e   : > { %7377 = vmatmul.mubr.msk.f32.gmra.mrb[174].mxu0 %vm387_vm0, %v5398_v55  ;;  %v5400_v54 = vmax.f32 %v5366_v7, 0.0 }
 0x62f   : > { %v5399_v31 = vmax.f32 %v5361_v52, 0.0  ;;  %v7340_v38 = vpop.f32.mrb[178].mxu1 }
 0x630   : > { %v5376_v46 = vadd.f32 %v7340_v38, %v10609_v0  ;;  %v5370_v43 = vpop.f32.mrb[179].mxu1 }
 0x631   : > { %v5371_v12 = vadd.f32 %v10609_v0, %v5370_v43  ;;  %7379 = vmatprep.mubr.msk.f32.mxu0 %vm387_vm0, %v5399_v31 }
 0x632   : > { %7380 = vmatmul.mubr.msk.f32.gmra.mrb[176].mxu0 %vm387_vm0, %v5400_v54  ;;  %v5402_v37 = vmax.f32 %v5376_v46, 0.0 }
 0x633   : > { %v5401_v58 = vmax.f32 %v5371_v12, 0.0 }
 0x635   : > { %7382 = vmatprep.mubr.msk.f32.mxu0 %vm387_vm0, %v5401_v58 }
 0x636   : > { %7383 = vmatmul.mubr.msk.f32.gmra.mrb[178].mxu0 %vm387_vm0, %v5402_v37 }
 0x665   : > { %v7351_v0 = vpop.f32.mrb[156].mxu0 }
 0x666   : > { %v5551_v16 = vadd.f32 %v7351_v0, %v10662_v10  ;;  %v5545_v5 = vpop.f32.mrb[157].mxu0 }
 0x667   : > { %v5546_v17 = vadd.f32 %v10662_v10, %v5545_v5 }
 0x668   : > { %5665 = vst.msk [vmem:[%s10669_s22 + $0x8] sm:$0xff] %vm387_vm0, %v5551_v16 }
 0x669   : > { %5664 = vst.msk [vmem:[%s10669_s22] sm:$0xff] %vm387_vm0, %v5546_v17 }
 0x6a5   : > { %v7354_v15 = vpop.f32.mrb[158].mxu0 }
 0x6a6   : > { %v5561_v48 = vadd.f32 %v7354_v15, %v10662_v10  ;;  %v5555_v63 = vpop.f32.mrb[159].mxu0 }
 0x6a7   : > { %v5556_v4 = vadd.f32 %v10662_v10, %v5555_v63 }
 0x6a8   : > { %5667 = vst.msk [vmem:[%s10669_s22 + $0x18] sm:$0xff] %vm387_vm0, %v5561_v48 }
 0x6a9   : > { %5666 = vst.msk [vmem:[%s10669_s22 + $0x10] sm:$0xff] %vm387_vm0, %v5556_v4 }
 0x6e5   : > { %v7357_v28 = vpop.f32.mrb[160].mxu0 }
 0x6e6   : > { %v5571_v49 = vadd.f32 %v7357_v28, %v10662_v10  ;;  %v5565_v35 = vpop.f32.mrb[161].mxu0 }
 0x6e7   : > { %v5566_v3 = vadd.f32 %v10662_v10, %v5565_v35 }
 0x6e8   : > { %5669 = vst.msk [vmem:[%s10669_s22 + $0x28] sm:$0xff] %vm387_vm0, %v5571_v49 }
 0x6e9   : > { %5668 = vst.msk [vmem:[%s10669_s22 + $0x20] sm:$0xff] %vm387_vm0, %v5566_v3  ;;  %v7360_v25 = vpop.f32.mrb[162].mxu0 }
 0x6ea   : > { %v5581_v18 = vadd.f32 %v7360_v25, %v10662_v10  ;;  %v5575_v8 = vpop.f32.mrb[163].mxu0 }
 0x6eb   : > { %v5576_v62 = vadd.f32 %v10662_v10, %v5575_v8 }
 0x6ec   : > { %5671 = vst.msk [vmem:[%s10669_s22 + $0x38] sm:$0xff] %vm387_vm0, %v5581_v18 }
 0x6ed   : > { %5670 = vst.msk [vmem:[%s10669_s22 + $0x30] sm:$0xff] %vm387_vm0, %v5576_v62  ;;  %v7363_v21 = vpop.f32.mrb[164].mxu0 }
 0x6ee   : > { %v5591_v9 = vadd.f32 %v7363_v21, %v10662_v10  ;;  %v5585_v40 = vpop.f32.mrb[165].mxu0 }
 0x6ef   : > { %v5586_v33 = vadd.f32 %v10662_v10, %v5585_v40 }
 0x6f0   : > { %5673 = vst.msk [vmem:[%s10669_s22 + $0x48] sm:$0xff] %vm387_vm0, %v5591_v9 }
 0x6f1   : > { %5672 = vst.msk [vmem:[%s10669_s22 + $0x40] sm:$0xff] %vm387_vm0, %v5586_v33  ;;  %v7366_v29 = vpop.f32.mrb[166].mxu0 }
 0x6f2   : > { %v5601_v2 = vadd.f32 %v7366_v29, %v10662_v10  ;;  %v5595_v60 = vpop.f32.mrb[167].mxu0 }
 0x6f3   : > { %v5596_v61 = vadd.f32 %v10662_v10, %v5595_v60 }
 0x6f4   : > { %5675 = vst.msk [vmem:[%s10669_s22 + $0x58] sm:$0xff] %vm387_vm0, %v5601_v2 }
 0x6f5   : > { %5674 = vst.msk [vmem:[%s10669_s22 + $0x50] sm:$0xff] %vm387_vm0, %v5596_v61  ;;  %v7369_v26 = vpop.f32.mrb[168].mxu0 }
 0x6f6   : > { %v5611_v27 = vadd.f32 %v7369_v26, %v10662_v10  ;;  %v5605_v13 = vpop.f32.mrb[169].mxu0 }
 0x6f7   : > { %v5606_v6 = vadd.f32 %v10662_v10, %v5605_v13 }
 0x6f8   : > { %5677 = vst.msk [vmem:[%s10669_s22 + $0x68] sm:$0xff] %vm387_vm0, %v5611_v27 }
 0x6f9   : > { %5676 = vst.msk [vmem:[%s10669_s22 + $0x60] sm:$0xff] %vm387_vm0, %v5606_v6  ;;  %v7372_v22 = vpop.f32.mrb[170].mxu0 }
 0x6fa   : > { %v5621_v24 = vadd.f32 %v7372_v22, %v10662_v10  ;;  %v5615_v42 = vpop.f32.mrb[171].mxu0 }
 0x6fb   : > { %v5616_v47 = vadd.f32 %v10662_v10, %v5615_v42 }
 0x6fc   : > { %5679 = vst.msk [vmem:[%s10669_s22 + $0x78] sm:$0xff] %vm387_vm0, %v5621_v24 }
 0x6fd   : > { %5678 = vst.msk [vmem:[%s10669_s22 + $0x70] sm:$0xff] %vm387_vm0, %v5616_v47  ;;  %v7375_v11 = vpop.f32.mrb[172].mxu0 }
 0x6fe   : > { %v5631_v36 = vadd.f32 %v7375_v11, %v10662_v10  ;;  %v5625_v56 = vpop.f32.mrb[173].mxu0 }
 0x6ff   : > { %v5626_v23 = vadd.f32 %v10662_v10, %v5625_v56 }
 0x700   : > { %5681 = vst.msk [vmem:[%s10669_s22 + $0x88] sm:$0xff] %vm387_vm0, %v5631_v36 }
 0x701   : > { %5680 = vst.msk [vmem:[%s10669_s22 + $0x80] sm:$0xff] %vm387_vm0, %v5626_v23  ;;  %v7378_v45 = vpop.f32.mrb[174].mxu0 }
 0x702   : > { %v5641_v19 = vadd.f32 %v7378_v45, %v10662_v10  ;;  %v5635_v59 = vpop.f32.mrb[175].mxu0 }
 0x703   : > { %v5636_v44 = vadd.f32 %v10662_v10, %v5635_v59 }
 0x704   : > { %5683 = vst.msk [vmem:[%s10669_s22 + $0x98] sm:$0xff] %vm387_vm0, %v5641_v19 }
 0x705   : > { %5682 = vst.msk [vmem:[%s10669_s22 + $0x90] sm:$0xff] %vm387_vm0, %v5636_v44  ;;  %v7381_v57 = vpop.f32.mrb[176].mxu0 }
 0x706   : > { %v5651_v1 = vadd.f32 %v7381_v57, %v10662_v10  ;;  %v5645_v39 = vpop.f32.mrb[177].mxu0 }
 0x707   : > { %v5646_v20 = vadd.f32 %v10662_v10, %v5645_v39 }
 0x708   : > { %5685 = vst.msk [vmem:[%s10669_s22 + $0xa8] sm:$0xff] %vm387_vm0, %v5651_v1 }
 0x709   : > { %5684 = vst.msk [vmem:[%s10669_s22 + $0xa0] sm:$0xff] %vm387_vm0, %v5646_v20  ;;  %v7384_v51 = vpop.f32.mrb[178].mxu0 }
 0x70a   : > { %v5661_v32 = vadd.f32 %v7384_v51, %v10662_v10  ;;  %v5655_v41 = vpop.f32.mrb[179].mxu0 }
 0x70b   : > { %v5656_v34 = vadd.f32 %v10662_v10, %v5655_v41 }
 0x70c   : > { %5687 = vst.msk [vmem:[%s10669_s22 + $0xb8] sm:$0xff] %vm387_vm0, %v5661_v32 }
 0x70d   : > { %5686 = vst.msk [vmem:[%s10669_s22 + $0xb0] sm:$0xff] %vm387_vm0, %v5656_v34 }
 0x70e PF: > { %s15_s20 = sadd.s32 1, %s8100_s20   ;;  %s11091_s18 = smov %s8096_s19 }
 0x70f   : > { %p12_p5 = scmp.ge.s32.totalorder %s15_s20, 4   ;;  %s11092_s19 = smov %s11094_s21 }
 0x711   :  { %14 = sbr.rel (!%p12_p5) target bundleno = 2 (0x2), region = 76 }

</bundles_post_ra>
